<compile_context>
chip_gen: v6e
topology: v6e:2x2x1
jax: 0.10.0
libtpu: 0.0.40
codegen_flags: <defaults>
</compile_context>

<pallas_src>
import functools

import jax
import jax.numpy as jnp
from jax import lax
from jax.experimental import pallas as pl
from jax.experimental.pallas import tpu as pltpu


# --------------------------------------------------------------------------- helpers

def _round_up(v, m):
    return (v + m - 1) // m * m


def _vmem_limit_bytes():
    """Generation-aware scoped-VMEM limit: ~3/4 of physical VMEM, capped at 96 MiB
    (v5e/v6e: 128 MiB -> 96 MiB; v7x: 64 MiB -> 48 MiB). Falls back to the v7x-safe
    48 MiB if the hardware query is unavailable."""
    cap = None
    try:
        cap = getattr(pltpu.get_tpu_info(), "vmem_capacity_bytes", None)
    except Exception:
        cap = None
    if not cap:
        cap = 64 * 1024 * 1024
    return min((int(cap) * 3) // 4, 96 * 1024 * 1024)


def _choose_tiles(C, n_pad, itemsize, vmem_limit):
    """Pick (channel_block, lane_tile) so the per-step VMEM footprint (double-buffered
    full rows + strips + bounded (CB, TI, JC) chunk intermediates) stays inside ~60%
    of the scoped limit.  CB is a multiple of 8 dividing C, or C itself (BlockSpec
    sublane rule), so the choice is always legal."""
    budget = (vmem_limit * 3) // 5
    cands = sorted({C} | {m for m in range(8, C + 1, 8) if C % m == 0})
    tile_opts = [t for t in (256, 128) if n_pad % t == 0]

    def footprint(cb, tile):
        rows = 2 * cb * n_pad * (itemsize + 4)    # y rows (native) + rank_y rows (f32), double-buffered
        strips = 6 * cb * tile * 4                # x / rank_x / out strips, double-buffered
        temps = 4 * cb * tile * tile * 4          # chunk compare/select/accumulator temporaries
        return rows + strips + temps

    best, best_work = (min(cands), 128), -1
    for tile in tile_opts:
        for cb in cands:
            if footprint(cb, tile) <= budget and cb * tile > best_work:
                best, best_work = (cb, tile), cb * tile
    return best


def _chunk_unroll(nchunks):
    if nchunks <= 8:
        return max(nchunks, 1)
    return max(u for u in (8, 4, 2, 1) if nchunks % u == 0)


# --------------------------------------------------------------------------- kernels

def _rank_kernel(x_ref, rank_ref, *, jc, unroll):
    """Pass 1: stable-sort ranks of one (batch, channel-block, TI query strip).

    x_ref    : VMEM (1, CB, N_pad) -- full padded rows (resident across i-strips)
    rank_ref : VMEM (1, CB, TI)    -- f32 stable ranks of this strip
    """
    cb, ti = rank_ref.shape[1], rank_ref.shape[2]
    n_pad = x_ref.shape[2]
    start = pl.multiple_of(pl.program_id(2) * ti, ti)

    x_q = x_ref[0, :, pl.ds(start, ti)]              # (CB, TI) queries, native dtype
    vi = x_q[:, :, None]

    # Hoisted iota difference; per chunk the tie mask is one compare + one select on a
    # (TI, JC) tile:  j_glob < i_glob  <=>  (j_loc - i_loc) < (start - off).
    dji = (lax.broadcasted_iota(jnp.int32, (ti, jc), 1)
           - lax.broadcasted_iota(jnp.int32, (ti, jc), 0))

    def body(t, acc):
        off = pl.multiple_of(t * jc, jc)
        vj = x_ref[0, :, pl.ds(off, jc)][:, None, :]             # (CB, 1, JC)
        tie = jnp.where(dji < (start - off), 1.0, 0.0)           # (TI, JC) f32
        # Nested selects produce the 0/1 contribution directly (no bool->f32 casts).
        contrib = jnp.where(vj < vi, 1.0,
                            jnp.where(vj == vi, tie[None, :, :], 0.0))
        return acc + contrib                                     # elementwise VPU adds

    acc = lax.fori_loop(0, n_pad // jc, body,
                        jnp.zeros((cb, ti, jc), jnp.float32), unroll=unroll)
    rank_ref[0] = jnp.sum(acc, axis=-1)              # single cross-lane (XLU) reduce


def _mix_kernel(perm_ref, lmda_ref, xq_ref, rxq_ref, y_ref, ry_ref, out_ref, *,
                jc, unroll):
    """Pass 2: rank-match gather from the permuted sample + EFDMix blend.

    perm_ref : SMEM int32 (B,)      -- batch permutation (scalar prefetch)
    lmda_ref : SMEM f32   (B,)      -- per-sample Beta(alpha, alpha) draw
    xq_ref   : VMEM (1, CB, TI)     -- this sample's value strip
    rxq_ref  : VMEM (1, CB, TI) f32 -- this sample's rank strip
    y_ref    : VMEM (1, CB, N_pad)  -- permuted sample's full value rows
    ry_ref   : VMEM (1, CB, N_pad)  -- permuted sample's full rank rows (f32)
    out_ref  : VMEM (1, CB, TI)
    """
    b = pl.program_id(0)
    cb, ti = out_ref.shape[1], out_ref.shape[2]
    n_pad = y_ref.shape[2]
    lam = lmda_ref[b]

    rxi = rxq_ref[0][:, :, None]                     # (CB, TI, 1) f32 ranks

    def body(t, acc):
        off = pl.multiple_of(t * jc, jc)
        ry_j = ry_ref[0, :, pl.ds(off, jc)][:, None, :]                    # (CB, 1, JC)
        y_j = y_ref[0, :, pl.ds(off, jc)].astype(jnp.float32)[:, None, :]  # (CB, 1, JC)
        # Exactly one j over the whole row matches each query rank (fused select+add;
        # no separate f32 "match" tensor beyond the bounded chunk).
        return acc + jnp.where(ry_j == rxi, y_j, 0.0)

    acc = lax.fori_loop(0, n_pad // jc, body,
                        jnp.zeros((cb, ti, jc), jnp.float32), unroll=unroll)
    x_copy = jnp.sum(acc, axis=-1)                   # (CB, TI)

    x_q = xq_ref[0].astype(jnp.float32)
    out = x_q + (x_copy - x_q) * (1.0 - lam)
    out_ref[0] = out.astype(out_ref.dtype)


# --------------------------------------------------------------------------- wrapper

def efdmix(x, perm, lmda, *, use_core_parallel=False):
    """EFDMix forward. x: (B, C, H, W); perm: (B,) int32; lmda: (B,) f32."""
    B, C, H, W = x.shape
    N = H * W
    assert N < (1 << 24), "f32 rank counts are exact only for N < 2**24"

    n_pad = _round_up(N, 128)
    vmem_limit = _vmem_limit_bytes()
    cb, tile = _choose_tiles(C, n_pad, jnp.dtype(x.dtype).itemsize, vmem_limit)
    ti = jc = tile
    unroll = _chunk_unroll(n_pad // jc)

    x_view = x.reshape(B, C, N)
    if n_pad != N:
        # +inf padding keeps the stable ranks of all real (finite) elements unchanged;
        # the padded output columns (which may contain inf/NaN) are sliced off below.
        x_view = jnp.pad(x_view, ((0, 0), (0, 0), (0, n_pad - N)),
                         constant_values=jnp.inf)

    grid = (B, C // cb, n_pad // ti)
    if use_core_parallel:
        # v7x: guarantee the batch axis shards across the two TensorCores.
        sem = (pltpu.CORE_PARALLEL, pltpu.PARALLEL, pltpu.PARALLEL)
    else:
        sem = ("parallel", "parallel", "parallel")
    cparams = pltpu.CompilerParams(dimension_semantics=sem,
                                   vmem_limit_bytes=vmem_limit)

    # ---- pass 1: per-sample stable ranks (each element's rank computed exactly once)
    rank = pl.pallas_call(
        functools.partial(_rank_kernel, jc=jc, unroll=unroll),
        out_shape=jax.ShapeDtypeStruct((B, C, n_pad), jnp.float32),
        grid_spec=pltpu.PrefetchScalarGridSpec(
            num_scalar_prefetch=0,
            grid=grid,
            in_specs=[pl.BlockSpec((1, cb, n_pad), lambda b, c, i: (b, c, 0))],
            out_specs=pl.BlockSpec((1, cb, ti), lambda b, c, i: (b, c, i)),
        ),
        compiler_params=cparams,
    )(x_view)

    # ---- pass 2: rank-match gather from x[perm] + blend
    out = pl.pallas_call(
        functools.partial(_mix_kernel, jc=jc, unroll=unroll),
        out_shape=jax.ShapeDtypeStruct((B, C, n_pad), x.dtype),
        grid_spec=pltpu.PrefetchScalarGridSpec(
            num_scalar_prefetch=2,
            grid=grid,
            in_specs=[
                pl.BlockSpec((1, cb, ti), lambda b, c, i, p, l: (b, c, i)),        # x strip
                pl.BlockSpec((1, cb, ti), lambda b, c, i, p, l: (b, c, i)),        # rank_x strip
                pl.BlockSpec((1, cb, n_pad), lambda b, c, i, p, l: (p[b], c, 0)),  # y rows
                pl.BlockSpec((1, cb, n_pad), lambda b, c, i, p, l: (p[b], c, 0)),  # rank_y rows
            ],
            out_specs=pl.BlockSpec((1, cb, ti), lambda b, c, i, p, l: (b, c, i)),
        ),
        compiler_params=cparams,
    )(perm, lmda, x_view, rank, x_view, rank)

    return out[:, :, :N].reshape(B, C, H, W)


def efdmix_module_forward(x, key, *, p=0.5, alpha=0.1, mix="random"):
    """Full EFDMixOP forward: Bernoulli(p) gate, Beta(alpha, alpha) lambda and batch
    permutation are host-side randomness (made deterministic via jax.random); the
    deterministic mixing runs in the Pallas kernels."""
    B = x.shape[0]
    kg, kp, ka, kl = jax.random.split(key, 4)
    if not bool(jax.random.uniform(kg, ()) <= p):      # host-side skip gate
        return x
    if mix == "random":
        perm = jax.random.permutation(kp, B)
    elif mix == "crossdomain":
        perm = jnp.arange(B - 1, -1, -1)
        half = (B + 1) // 2                            # torch.chunk(2) split point
        perm_b = perm[:half][jax.random.permutation(kp, half)]
        perm_a = perm[half:][jax.random.permutation(ka, B - half)]
        perm = jnp.concatenate([perm_b, perm_a], 0)
    else:
        raise NotImplementedError(mix)
    lmda = jax.random.beta(kl, alpha, alpha, (B,)).astype(jnp.float32)
    return efdmix(x, perm.astype(jnp.int32), lmda)


def efdmix_reference(x, perm, lmda):
    """Pure-JAX reference mirroring the PyTorch forward (sort/gather form)."""
    B, C, H, W = x.shape
    N = H * W
    x_view = x.reshape(B, C, N)
    x_value = jnp.sort(x_view, axis=-1)
    x_index = jnp.argsort(x_view, axis=-1)
    inverse_index = jnp.argsort(x_index, axis=-1)
    x_copy = jnp.take_along_axis(x_value[perm], inverse_index, axis=-1)
    x_new = x_view + (x_copy - x_view) * (1.0 - lmda[:, None, None])
    return x_new.reshape(B, C, H, W)


if __name__ == "__main__":
    # Module hyperparameters: EFDMixOP(p=0.5, alpha=0.1, mix='random').
    p, alpha = 0.5, 0.1
    key = jax.random.PRNGKey(0)

    # f32 correctness checks against the sort/gather reference.
    for shape in [(2, 4, 16, 16),      # lane-aligned N = 256
                  (3, 6, 9, 9)]:       # N = 81 -> padded to 128 (padding path)
        B = shape[0]
        key, kx, kp, kl = jax.random.split(key, 4)
        x = jax.random.normal(kx, shape, dtype=jnp.float32)
        perm = jax.random.permutation(kp, B).astype(jnp.int32)
        lmda = jax.random.beta(kl, alpha, alpha, (B,)).astype(jnp.float32)

        y = jax.block_until_ready(efdmix(x, perm, lmda))
        y_ref = efdmix_reference(x, perm, lmda)
        assert y.shape == shape
        assert jnp.allclose(y, y_ref, atol=1e-5, rtol=1e-5), f"mismatch at {shape}"

    # bf16 path: value compares run in native bf16 (v6e/v7x), ranks stay exact.
    key, kx, kp, kl = jax.random.split(key, 4)
    xb = jax.random.normal(kx, (2, 16, 16, 16), dtype=jnp.float32).astype(jnp.bfloat16)
    perm = jax.random.permutation(kp, 2).astype(jnp.int32)
    lmda = jax.random.beta(kl, alpha, alpha, (2,)).astype(jnp.float32)
    yb = jax.block_until_ready(efdmix(xb, perm, lmda))
    yb_ref = efdmix_reference(xb.astype(jnp.float32), perm, lmda)
    assert jnp.allclose(yb.astype(jnp.float32), yb_ref, atol=5e-2, rtol=5e-2)

    # Full module forward (Bernoulli(p) gate + 'random' mix), run once end-to-end.
    key, kfwd, kx = jax.random.split(key, 3)
    x = jax.random.normal(kx, (2, 4, 16, 16), dtype=jnp.float32)
    _ = jax.block_until_ready(efdmix_module_forward(x, kfwd, p=p, alpha=alpha))

    print("KERNEL_OK")
</pallas_src>

<mosaic_0001>
module attributes {stable_mosaic.version = 11 : i64} {
  func.func @_rank_kernel(%arg0: i32, %arg1: i32, %arg2: i32, %arg3: memref<1x4x256xf32, #tpu.memory_space<vmem>>, %arg4: memref<1x4x256xf32, #tpu.memory_space<vmem>>) attributes {dimension_semantics = [#tpu.dimension_semantics<parallel>, #tpu.dimension_semantics<parallel>, #tpu.dimension_semantics<parallel>], iteration_bounds = array<i64: 2, 1, 1>, scalar_prefetch = 0 : i64, scratch_operands = 0 : i64, tpu.core_type = #tpu.core_type<tc>, window_params = [{transform_indices = @transform_0, window_bounds = array<i64: 1, 4, 256>}, {transform_indices = @transform_1, window_bounds = array<i64: 1, 4, 256>}]} {
    %c256_i32 = arith.constant 256 : i32
    %0 = arith.muli %arg2, %c256_i32 : i32
    %1 = tpu.assume_multiple %0, 256 : i32
    %c0 = arith.constant 0 : index
    %c0_0 = arith.constant 0 : index
    %2 = arith.index_cast %1 : i32 to index
    %3 = vector.load %arg3[%c0, %c0_0, %2] : memref<1x4x256xf32, #tpu.memory_space<vmem>>, vector<1x4x256xf32>
    %4 = vector.shape_cast %3 : vector<1x4x256xf32> to vector<4x256xf32>
    %5 = vector.shape_cast %4 : vector<4x256xf32> to vector<4x256x1xf32>
    %6 = tpu.iota {dimensions = array<i32: 1>} : vector<256x256xi32>
    %7 = tpu.iota {dimensions = array<i32: 0>} : vector<256x256xi32>
    %8 = arith.subi %6, %7 : vector<256x256xi32>
    %cst = arith.constant 0.000000e+00 : f32
    %9 = vector.broadcast %cst : f32 to vector<4x256x256xf32>
    %c0_i32 = arith.constant 0 : i32
    %c256_i32_1 = arith.constant 256 : i32
    %10 = arith.muli %c0_i32, %c256_i32_1 : i32
    %11 = tpu.assume_multiple %10, 256 : i32
    %c0_2 = arith.constant 0 : index
    %c0_3 = arith.constant 0 : index
    %12 = arith.index_cast %11 : i32 to index
    %13 = vector.load %arg3[%c0_2, %c0_3, %12] : memref<1x4x256xf32, #tpu.memory_space<vmem>>, vector<1x4x256xf32>
    %14 = vector.shape_cast %13 : vector<1x4x256xf32> to vector<4x256xf32>
    %15 = vector.shape_cast %14 : vector<4x256xf32> to vector<4x1x256xf32>
    %16 = arith.subi %1, %11 : i32
    %17 = vector.broadcast %16 : i32 to vector<256x256xi32>
    %18 = arith.cmpi slt, %8, %17 : vector<256x256xi32>
    %cst_4 = arith.constant 1.000000e+00 : f32
    %cst_5 = arith.constant 0.000000e+00 : f32
    %19 = vector.broadcast %cst_4 : f32 to vector<256x256xf32>
    %20 = vector.broadcast %cst_5 : f32 to vector<256x256xf32>
    %21 = arith.select %18, %19, %20 : vector<256x256xi1>, vector<256x256xf32>
    %22 = vector.broadcast %15 : vector<4x1x256xf32> to vector<4x256x256xf32>
    %23 = vector.broadcast %5 : vector<4x256x1xf32> to vector<4x256x256xf32>
    %24 = arith.cmpf olt, %22, %23 : vector<4x256x256xf32>
    %25 = vector.broadcast %15 : vector<4x1x256xf32> to vector<4x256x256xf32>
    %26 = vector.broadcast %5 : vector<4x256x1xf32> to vector<4x256x256xf32>
    %27 = arith.cmpf oeq, %25, %26 : vector<4x256x256xf32>
    %28 = vector.shape_cast %21 : vector<256x256xf32> to vector<1x256x256xf32>
    %cst_6 = arith.constant 0.000000e+00 : f32
    %29 = vector.shape_cast %28 : vector<1x256x256xf32> to vector<1x256x256xf32>
    %30 = vector.broadcast %29 : vector<1x256x256xf32> to vector<4x256x256xf32>
    %31 = vector.broadcast %cst_6 : f32 to vector<4x256x256xf32>
    %32 = arith.select %27, %30, %31 : vector<4x256x256xi1>, vector<4x256x256xf32>
    %cst_7 = arith.constant 1.000000e+00 : f32
    %33 = vector.broadcast %cst_7 : f32 to vector<4x256x256xf32>
    %34 = arith.select %24, %33, %32 : vector<4x256x256xi1>, vector<4x256x256xf32>
    %35 = arith.addf %9, %34 : vector<4x256x256xf32>
    %c1_i32 = arith.constant 1 : i32
    %cst_8 = arith.constant dense<0.000000e+00> : vector<4x256xf32>
    %36 = vector.multi_reduction <add>, %35, %cst_8 [2] : vector<4x256x256xf32> to vector<4x256xf32>
    %c0_9 = arith.constant 0 : index
    %c0_10 = arith.constant 0 : index
    %c0_11 = arith.constant 0 : index
    %37 = vector.load %arg4[%c0_9, %c0_10, %c0_11] : memref<1x4x256xf32, #tpu.memory_space<vmem>>, vector<1x4x256xf32>
    %38 = vector.shape_cast %37 : vector<1x4x256xf32> to vector<4x256xf32>
    %39 = vector.shape_cast %36 : vector<4x256xf32> to vector<1x4x256xf32>
    tpu.vector_store %arg4[%c0_9, %c0_10, %c0_11], %39 {strides = array<i32>} : memref<1x4x256xf32, #tpu.memory_space<vmem>>, vector<1x4x256xf32>,
    return
  }
  func.func @transform_0(%arg0: i32, %arg1: i32, %arg2: i32) -> (i32, i32, i32) {
    %c0_i32 = arith.constant 0 : i32
    %c0_i32_0 = arith.constant 0 : i32
    return %arg0, %arg1, %c0_i32 : i32, i32, i32
  }
  func.func @transform_1(%arg0: i32, %arg1: i32, %arg2: i32) -> (i32, i32, i32) {
    %c0_i32 = arith.constant 0 : i32
    return %arg0, %arg1, %arg2 : i32, i32, i32
  }
}

</mosaic_0001>

<bundles_post_ra>
// kernel: tpu_custom_call.1
= control target key start
LH: loop header
LB: loop body
LE: loop exit
PB: predicated region body
PF: predicated region fallthrough
CT: control target
= control target key end

     0   :  { %6 = vsyncpa [#allocation3], 0  ;;  %s10061_s0 = inlined_call_operand.hbm [shape: f32[2,4,256], index: 0, kind: input, shape index: {}]   ;;  %s10062_s1 = inlined_call_operand.hbm [shape: f32[2,4,256], index: 1, kind: output, shape index: {}]  }
   0x1   :  { %8 = vsyncpa [#allocation3 + $0x1], 0 }
   0x2   :  { %9 = vsyncpa [#allocation4], 0 }
   0x3   :  { %11 = vsyncpa [#allocation4 + $0x1], 0  ;;  %s6097_s6 = smov 0   ;;  %s6099_s7 = smov 0  }
   0x4   :  { %s6101_s8 = smov 0   ;;  %s6103_s9 = smov 0  }
   0x5   :  { %s6105_s10 = smov 0   ;;  %s6107_s11 = smov 0  }
   0x6 LB: > { %s5882_s12 = sadd.s32 4294967295, %s6078_s11   ;;  %s5883_s13 = sadd.s32 4294967294, %s6078_s11   ;;  %s6078_s11 = sphi %s6107_s11, %s17_s11   ;;  %s6074_s10 = sphi %s6105_s10, %s10623_s10   ;;  %s6070_s9 = sphi %s6103_s9, %s10622_s9   ;;  %s6066_s8 = sphi %s6101_s8, %s10621_s8   ;;  %s6062_s7 = sphi %s6099_s7, %s10620_s7   ;;  %s6058_s6 = sphi %s6097_s6, %s10619_s6  }
   0x7   : > { %s36_s14 = sadd.s32 1, %s6074_s10  ;;  %s45_s15 = sadd.s32 1, %s6066_s8 }
   0x8   : > { %p38_p0 = scmp.ge.s32.totalorder %s36_s14, 2  ;;  %p52_p1 = scmp.ne.s32.totalorder %s6066_s8, %s6062_s7 }
   0x9   : > { %p53_p2 = scmp.eq.s32.totalorder %s6078_s11, 0  ;;  %p58_p3 = scmp.ne.s32.totalorder %s6062_s7, %s6058_s6 }
   0xa   : > { %s10625_s14 = smov (%p38_p0, %s36_s14), 0  ;;  %p59_p5 = scmp.eq.s32.totalorder %s5882_s12, 0 }
   0xb   : > { %p6138_p4 = por %p53_p2, %p52_p1  ;;  %s40_s17 = ssub.s32 %s6074_s10, %s10625_s14 }
   0xc   : > { %p86_p6 = scmp.eq.s32.totalorder %s5882_s12, 1  ;;  %p43_p7 = scmp.eq.s32.totalorder %s40_s17, 0 }
   0xd   : > { %p6144_p8 = por %p59_p5, %p58_p3  ;;  %p92_p10 = scmp.eq.s32.totalorder %s5883_s13, 1 }
   0xe   : > { %p6148_p9 = por %p86_p6, %p52_p1  ;;  %p5912_p13 = scmp.lt.s32.totalorder %s6078_s11, 2 }
   0xf   : > { %s6153_s20 = scalar_select %p43_p7, %s6066_s8, %s45_s15  }
  0x10   : > { %p6155_p11 = por %p92_p10, %p58_p3  ;;  %s112_s22 = sand.u32 1, %s6066_s8  }
  0x11   : > { %s5886_s23 = sshll.u32 %s112_s22, 3  ;;  %s5898_s24 = sshll.u32 %s6074_s10, 7 }
  0x12   : > { %s10232_s21 = scalar_select %p6155_p11, 1, 0 }
  0x13   : > { %s124_s27 = scalar_lea.hbm %s10061_s0, %s5898_s24  ;;  %s116_s28 = scalar_lea.vmem [#allocation2], %s5886_s23 }
  0x14   : > { %s126_s29 = sshll.u32 %s116_s28, 4  ;;  %p6168_p0 = pnand %p5912_p13, %p6138_p4  ;;  %s127_s29 = int_to_ptr.vmem [resolvable:$true] %s126_s29 }
  0x15   : > { %p5889_p1 = scmp.ge.s32.totalorder %s6078_s11, 1  ;;  %p131_p2 = scmp.lt.s32.totalorder %s6078_s11, 3 }
  0x16   : > { %s113_s2 = scalar_lea.sflag [#allocation3], %s112_s22  ;;  %p5972_p3 = pneg %p6168_p0 }
  0x17   : > { %s5983_s3 = scalar_lea.vmem %s127_s29, 128  ;;  %s6080_s4 = smov [#allocation2]  }
  0x18   : > { %p5984_p5 = scmp.ne.s32.totalorder %s127_s29, %s5983_s3  ;;  %s5988_s5 = sshll.u32 %s6080_s4, 4  ;;  %s5989_s5 = int_to_ptr.vmem [resolvable:$false] %s5988_s5 }
  0x19   : > { %s5990_s12 = scalar_lea.vmem %s5989_s5, 256  ;;  %p5991_p10 = scmp.lt.s32.totalorder %s127_s29, %s5989_s5 }
  0x1a   : > { %p5986_p6 = pnand %p5984_p5, %p5972_p3  ;;  %p5992_p12 = scmp.lt.s32.totalorder %s5990_s12, %s5983_s3 }
  0x1c   : > { %p5987_p7 = pneg %p5986_p6  ;;  %p5993_p4 = por %p5992_p12, %p5991_p10 }
  0x1e   : > { %p5994_p13 = pnand %p5993_p4, %p5987_p7 }
  0x20   : > { %5997 = shalt.err (!%p5994_p13)
}
  0x21   : > { %5907 = dma.hbm_to_vmem [thread:$0]  (!%p6168_p0), %s124_s27, 128, %s127_s29, %s113_s2  }
  0x22   : > { %p132_p11 = pnand %p5889_p1, %p131_p2 }
  0x24   : > { %135 = sbr.rel (%p132_p11) target bundleno = 1018 (0x3fa), region = 24 }
  0x29   : > { %s6183_s13 = sand.u32 1, %s6062_s7  }
  0x2a   : > { %s5890_s15 = sshll.u32 %s6183_s13, 3  ;;  %s138_s16 = scalar_lea.sflag [#allocation3], %s6183_s13 }
  0x2b   : > { %s141_s17 = scalar_lea.vmem [#allocation2], %s5890_s15 }
  0x2c   : > { %6049 = dma.done.wait (%p6144_p8), %s138_s16, 128  }
  0x2d   : > { %6051 = vsyncadd (%p6144_p8), %s138_s16, 4294967168  ;;  %v10063_v0 = vlaneseq  ;;  %v6081_v1 = vmov 1966171168   ;;  %v6200_v7 = vld [vmem:[%s141_s17] sm:$0xff]  ;;  %s5899_s18 = sshll.u32 %s6070_s9, 7  ;;  %s159_s22 = scalar_lea.vmem [#allocation5], %s5890_s15 }
  0x2e   : > { %v817_v2 = vunpack.c.l.s4 %v6081_v1  ;;  %v5892_v8 = vld.sshfl [vmem:[%s141_s17] sm:$0xff pattern:$0x75316420]  ;;  %v6231_v22 = vcombine.high %v6200_v7, %v6200_v7  ;;  %s5791_s23 = sshll.u32 %s159_s22, 4  ;;  %s5789_s26 = scalar_lea.hbm %s10062_s1, %s5899_s18  ;;  %s5792_s23 = int_to_ptr.vmem [resolvable:$true] %s5791_s23 }
  0x2f   : > { %v6194_v3 = vshrl.u32 %v10063_v0, 7  ;;  %v815_v10 = vcombine.high %v5892_v8, %v5892_v8  ;;  %s5773_s27 = scalar_lea.sflag [#allocation4], %s6183_s13  ;;  %s5998_s28 = scalar_lea.vmem %s5792_s23, 128 }
  0x30   : > { %v818_v4 = vunpack.c.0.s8 %v817_v2  ;;  %p5999_p8 = scmp.ne.s32.totalorder %s5792_s23, %s5998_s28  ;;  %s6086_s9 = smov [#allocation5]  }
  0x31   : > { %10234 = vst [vmem:[#allocation8_spill] sm:$0xff] %v6194_v3  ;;  %v6197_v5 = vsub.s32 0, %v6194_v3  ;;  %v6207_v12 = vsub.s32 1, %v6194_v3  ;;  %v440_v30 = vsub.s32 2, %v6194_v3  ;;  %v574_v2 = vsub.s32 3, %v6194_v3  ;;  %s6002_s29 = sshll.u32 %s6086_s9, 4  ;;  %s6003_s29 = int_to_ptr.vmem [resolvable:$false] %s6002_s29 }
  0x32   : > { %v821_v6 = vsub.s32 %v818_v4, %v6194_v3  ;;  %p6000_p11 = pnand %p5999_p8, %p6148_p9  ;;  %s6004_s30 = scalar_lea.vmem %s6003_s29, 256 }
  0x33   : > { %v173_v9 = vrot.slane %v6200_v7, %v6197_v5  ;;  %v240_v23 = vrot.slane %v6231_v22, %v6197_v5  ;;  %v307_v24 = vrot.slane %v6200_v7, %v6207_v12  ;;  %v374_v25 = vrot.slane %v6231_v22, %v6207_v12  ;;  %p6005_p0 = scmp.lt.s32.totalorder %s5792_s23, %s6003_s29  ;;  %p6006_p1 = scmp.lt.s32.totalorder %s6004_s30, %s5998_s28 }
  0x34   : > { %v6204_v11 = vrot.slane %v5892_v8, %v821_v6  ;;  %v829_v13 = vrot.slane %v815_v10, %v821_v6  ;;  %v441_v33 = vrot.slane %v6200_v7, %v440_v30  ;;  %v508_v50 = vrot.slane %v6231_v22, %v440_v30  ;;  %p6001_p12 = pneg %p6000_p11 }
  0x35   : > { %183 = vbcast.lane.b32.xlu1 %v173_v9, 272  ;;  %175 = vbcast.lane.b32.xlu0 %v173_v9, 256  ;;  %v575_v8 = vrot.slane %v6200_v7, %v574_v2  ;;  %p6007_p2 = por %p6006_p1, %p6005_p0 }
  0x36   : > { %v830_v14 = vcombine.high %v6204_v11, %v6204_v11  ;;  %v831_v15 = vcombine.high %v829_v13, %v829_v13  ;;  %v6212_v16 = vrot.slane %v829_v13, %v6197_v5  ;;  %v6215_v17 = vrot.slane %v829_v13, %v6207_v12 }
  0x37   : > { %p6008_p3 = pnand %p6007_p2, %p6001_p12 }
  0x38   : > { %10235 = vst [vmem:[#allocation9_spill] sm:$0xff] %v6212_v16  ;;  %10236 = vst [vmem:[#allocation10_spill] sm:$0xff] %v6215_v17  ;;  %v6218_v18 = vrot.slane %v830_v14, %v6197_v5  ;;  %v6221_v19 = vrot.slane %v830_v14, %v6207_v12  ;;  %v6224_v20 = vrot.slane %v831_v15, %v6197_v5  ;;  %v724_v17 = vadd.s32 112, %v6194_v3 }
  0x39   : > { %187 = vbcast.lane.b32.xlu1 %v173_v9, 280  ;;  %v6227_v21 = vrot.slane %v831_v15, %v6207_v12  ;;  %179 = vbcast.lane.b32.xlu0 %v173_v9, 264 }
  0x3a   : > { %10237 = vst [vmem:[#allocation11_spill] sm:$0xff] %v6218_v18  ;;  %10238 = vst [vmem:[#allocation12_spill] sm:$0xff] %v6221_v19  ;;  %v6353_v18 = vrot.slane %v6231_v22, %v574_v2 }
  0x3b   : > { %10239 = vst [vmem:[#allocation13_spill] sm:$0xff] %v6224_v20  ;;  %10240 = vst [vmem:[#allocation14_spill] sm:$0xff] %v6227_v21 }
  0x3d   : > { %195 = vbcast.lane.b32.xlu1 %v173_v9, 296  ;;  %191 = vbcast.lane.b32.xlu0 %v173_v9, 288 }
  0x41   : > { %203 = vbcast.lane.b32.xlu1 %v173_v9, 312  ;;  %199 = vbcast.lane.b32.xlu0 %v173_v9, 304 }
  0x45   : > { %211 = vbcast.lane.b32.xlu1 %v173_v9, 328  ;;  %207 = vbcast.lane.b32.xlu0 %v173_v9, 320 }
  0x49   : > { %219 = vbcast.lane.b32.xlu1 %v173_v9, 344  ;;  %215 = vbcast.lane.b32.xlu0 %v173_v9, 336 }
  0x4d   : > { %227 = vbcast.lane.b32.xlu1 %v173_v9, 360  ;;  %223 = vbcast.lane.b32.xlu0 %v173_v9, 352 }
  0x51   : > { %235 = vbcast.lane.b32.xlu1 %v173_v9, 376  ;;  %231 = vbcast.lane.b32.xlu0 %v173_v9, 368 }
  0x55   : > { %246 = vbcast.lane.b32.xlu1 %v240_v23, 264  ;;  %242 = vbcast.lane.b32.xlu0 %v240_v23, 256 }
  0x59   : > { %254 = vbcast.lane.b32.xlu1 %v240_v23, 280  ;;  %250 = vbcast.lane.b32.xlu0 %v240_v23, 272 }
  0x5d   : > { %262 = vbcast.lane.b32.xlu1 %v240_v23, 296  ;;  %258 = vbcast.lane.b32.xlu0 %v240_v23, 288 }
  0x61   : > { %270 = vbcast.lane.b32.xlu1 %v240_v23, 312  ;;  %266 = vbcast.lane.b32.xlu0 %v240_v23, 304 }
  0x65   : > { %278 = vbcast.lane.b32.xlu1 %v240_v23, 328  ;;  %274 = vbcast.lane.b32.xlu0 %v240_v23, 320 }
  0x69   : > { %286 = vbcast.lane.b32.xlu1 %v240_v23, 344  ;;  %282 = vbcast.lane.b32.xlu0 %v240_v23, 336 }
  0x6d   : > { %294 = vbcast.lane.b32.xlu1 %v240_v23, 360  ;;  %290 = vbcast.lane.b32.xlu0 %v240_v23, 352 }
  0x71   : > { %302 = vbcast.lane.b32.xlu1 %v240_v23, 376  ;;  %298 = vbcast.lane.b32.xlu0 %v240_v23, 368 }
  0x75   : > { %313 = vbcast.lane.b32.xlu1 %v307_v24, 264  ;;  %309 = vbcast.lane.b32.xlu0 %v307_v24, 256 }
  0x79   : > { %321 = vbcast.lane.b32.xlu1 %v307_v24, 280  ;;  %317 = vbcast.lane.b32.xlu0 %v307_v24, 272 }
  0x7d   : > { %329 = vbcast.lane.b32.xlu1 %v307_v24, 296  ;;  %325 = vbcast.lane.b32.xlu0 %v307_v24, 288 }
  0x81   : > { %337 = vbcast.lane.b32.xlu1 %v307_v24, 312  ;;  %333 = vbcast.lane.b32.xlu0 %v307_v24, 304 }
  0x85   : > { %345 = vbcast.lane.b32.xlu1 %v307_v24, 328  ;;  %341 = vbcast.lane.b32.xlu0 %v307_v24, 320 }
  0x89   : > { %353 = vbcast.lane.b32.xlu1 %v307_v24, 344  ;;  %349 = vbcast.lane.b32.xlu0 %v307_v24, 336 }
  0x8d   : > { %361 = vbcast.lane.b32.xlu1 %v307_v24, 360  ;;  %357 = vbcast.lane.b32.xlu0 %v307_v24, 352 }
  0x91   : > { %369 = vbcast.lane.b32.xlu1 %v307_v24, 376  ;;  %365 = vbcast.lane.b32.xlu0 %v307_v24, 368 }
  0x95   : > { %380 = vbcast.lane.b32.xlu1 %v374_v25, 264  ;;  %376 = vbcast.lane.b32.xlu0 %v374_v25, 256 }
  0x99   : > { %388 = vbcast.lane.b32.xlu1 %v374_v25, 280  ;;  %384 = vbcast.lane.b32.xlu0 %v374_v25, 272 }
  0x9d   : > { %396 = vbcast.lane.b32.xlu1 %v374_v25, 296  ;;  %392 = vbcast.lane.b32.xlu0 %v374_v25, 288 }
  0xa1   : > { %404 = vbcast.lane.b32.xlu1 %v374_v25, 312  ;;  %400 = vbcast.lane.b32.xlu0 %v374_v25, 304 }
  0xa5   : > { %412 = vbcast.lane.b32.xlu1 %v374_v25, 328  ;;  %408 = vbcast.lane.b32.xlu0 %v374_v25, 320 }
  0xa7   : > { %v6239_v26 = vpop.permute.xlu1 %183  ;;  %v6241_v27 = vpop.permute.xlu0 %175 }
  0xa9   : > { %420 = vbcast.lane.b32.xlu1 %v374_v25, 344  ;;  %416 = vbcast.lane.b32.xlu0 %v374_v25, 336 }
  0xab   : > { %v6243_v28 = vpop.permute.xlu1 %187  ;;  %v6245_v29 = vpop.permute.xlu0 %179 }
  0xad   : > { %428 = vbcast.lane.b32.xlu1 %v374_v25, 360  ;;  %424 = vbcast.lane.b32.xlu0 %v374_v25, 352 }
  0xaf   : > { %v6248_v31 = vpop.permute.xlu1 %195  ;;  %v6250_v32 = vpop.permute.xlu0 %191 }
  0xb1   : > { %436 = vbcast.lane.b32.xlu1 %v374_v25, 376  ;;  %432 = vbcast.lane.b32.xlu0 %v374_v25, 368 }
  0xb3   : > { %v6253_v34 = vpop.permute.xlu1 %203  ;;  %v6255_v35 = vpop.permute.xlu0 %199 }
  0xb5   : > { %447 = vbcast.lane.b32.xlu1 %v441_v33, 264  ;;  %443 = vbcast.lane.b32.xlu0 %v441_v33, 256 }
  0xb7   : > { %v6257_v36 = vpop.permute.xlu1 %211  ;;  %v6259_v37 = vpop.permute.xlu0 %207 }
  0xb9   : > { %455 = vbcast.lane.b32.xlu1 %v441_v33, 280  ;;  %451 = vbcast.lane.b32.xlu0 %v441_v33, 272 }
  0xbb   : > { %v6261_v38 = vpop.permute.xlu1 %219  ;;  %v6263_v39 = vpop.permute.xlu0 %215 }
  0xbd   : > { %463 = vbcast.lane.b32.xlu1 %v441_v33, 296  ;;  %459 = vbcast.lane.b32.xlu0 %v441_v33, 288 }
  0xbf   : > { %v6265_v40 = vpop.permute.xlu1 %227  ;;  %v6267_v41 = vpop.permute.xlu0 %223 }
  0xc1   : > { %471 = vbcast.lane.b32.xlu1 %v441_v33, 312  ;;  %467 = vbcast.lane.b32.xlu0 %v441_v33, 304 }
  0xc3   : > { %v6269_v42 = vpop.permute.xlu1 %235  ;;  %v6271_v43 = vpop.permute.xlu0 %231 }
  0xc5   : > { %479 = vbcast.lane.b32.xlu1 %v441_v33, 328  ;;  %475 = vbcast.lane.b32.xlu0 %v441_v33, 320 }
  0xc7   : > { %v6273_v44 = vpop.permute.xlu1 %246  ;;  %v6275_v45 = vpop.permute.xlu0 %242 }
  0xc9   : > { %487 = vbcast.lane.b32.xlu1 %v441_v33, 344  ;;  %483 = vbcast.lane.b32.xlu0 %v441_v33, 336 }
  0xcb   : > { %v6277_v46 = vpop.permute.xlu1 %254  ;;  %v6279_v47 = vpop.permute.xlu0 %250 }
  0xcd   : > { %495 = vbcast.lane.b32.xlu1 %v441_v33, 360  ;;  %491 = vbcast.lane.b32.xlu0 %v441_v33, 352 }
  0xcf   : > { %v6281_v48 = vpop.permute.xlu1 %262  ;;  %v6283_v49 = vpop.permute.xlu0 %258 }
  0xd0   : > { %10241 = vst [vmem:[#allocation15_spill] sm:$0xff] %v6281_v48  ;;  %10242 = vst [vmem:[#allocation16_spill] sm:$0xff] %v6283_v49 }
  0xd1   : > { %503 = vbcast.lane.b32.xlu1 %v441_v33, 376  ;;  %499 = vbcast.lane.b32.xlu0 %v441_v33, 368 }
  0xd3   : > { %v6286_v51 = vpop.permute.xlu1 %270  ;;  %v6288_v52 = vpop.permute.xlu0 %266 }
  0xd4   : > { %10243 = vst [vmem:[#allocation17_spill] sm:$0xff] %v6286_v51  ;;  %10244 = vst [vmem:[#allocation18_spill] sm:$0xff] %v6288_v52 }
  0xd5   : > { %514 = vbcast.lane.b32.xlu1 %v508_v50, 264  ;;  %510 = vbcast.lane.b32.xlu0 %v508_v50, 256 }
  0xd7   : > { %v6290_v53 = vpop.permute.xlu1 %278  ;;  %v6292_v54 = vpop.permute.xlu0 %274 }
  0xd8   : > { %10245 = vst [vmem:[#allocation19_spill] sm:$0xff] %v6290_v53  ;;  %10246 = vst [vmem:[#allocation20_spill] sm:$0xff] %v6292_v54 }
  0xd9   : > { %522 = vbcast.lane.b32.xlu1 %v508_v50, 280  ;;  %518 = vbcast.lane.b32.xlu0 %v508_v50, 272 }
  0xdb   : > { %v6294_v55 = vpop.permute.xlu1 %286  ;;  %v6296_v56 = vpop.permute.xlu0 %282 }
  0xdc   : > { %10247 = vst [vmem:[#allocation21_spill] sm:$0xff] %v6294_v55  ;;  %10248 = vst [vmem:[#allocation22_spill] sm:$0xff] %v6296_v56  ;;  %v736_v55 = vadd.s32 208, %v6194_v3 }
  0xdd   : > { %530 = vbcast.lane.b32.xlu1 %v508_v50, 296  ;;  %526 = vbcast.lane.b32.xlu0 %v508_v50, 288 }
  0xdf   : > { %v6298_v57 = vpop.permute.xlu1 %294  ;;  %v6300_v58 = vpop.permute.xlu0 %290 }
  0xe0   : > { %10249 = vst [vmem:[#allocation23_spill] sm:$0xff] %v6298_v57  ;;  %10250 = vst [vmem:[#allocation24_spill] sm:$0xff] %v6300_v58  ;;  %v737_v57 = vadd.s32 216, %v6194_v3 }
  0xe1   : > { %538 = vbcast.lane.b32.xlu1 %v508_v50, 312  ;;  %534 = vbcast.lane.b32.xlu0 %v508_v50, 304 }
  0xe3   : > { %v6302_v59 = vpop.permute.xlu1 %302  ;;  %v6304_v60 = vpop.permute.xlu0 %298 }
  0xe4   : > { %10251 = vst [vmem:[#allocation25_spill] sm:$0xff] %v6302_v59  ;;  %10252 = vst [vmem:[#allocation26_spill] sm:$0xff] %v6304_v60  ;;  %v726_v60 = vadd.s32 128, %v6194_v3 }
  0xe5   : > { %546 = vbcast.lane.b32.xlu1 %v508_v50, 328  ;;  %542 = vbcast.lane.b32.xlu0 %v508_v50, 320 }
  0xe7   : > { %v6306_v61 = vpop.permute.xlu1 %313  ;;  %v6308_v62 = vpop.permute.xlu0 %309 }
  0xe8   : > { %10253 = vst [vmem:[#allocation27_spill] sm:$0xff] %v6306_v61  ;;  %10254 = vst [vmem:[#allocation28_spill] sm:$0xff] %v6308_v62 }
  0xe9   : > { %554 = vbcast.lane.b32.xlu1 %v508_v50, 344  ;;  %550 = vbcast.lane.b32.xlu0 %v508_v50, 336 }
  0xeb   : > { %v6310_v63 = vpop.permute.xlu1 %321  ;;  %v6312_v1 = vpop.permute.xlu0 %317 }
  0xec   : > { %10255 = vst [vmem:[#allocation29_spill] sm:$0xff] %v6310_v63  ;;  %10256 = vst [vmem:[#allocation30_spill] sm:$0xff] %v6312_v1 }
  0xed   : > { %562 = vbcast.lane.b32.xlu1 %v508_v50, 360  ;;  %558 = vbcast.lane.b32.xlu0 %v508_v50, 352 }
  0xef   : > { %v6315_v4 = vpop.permute.xlu1 %329  ;;  %v6317_v6 = vpop.permute.xlu0 %325 }
  0xf0   : > { %10257 = vst [vmem:[#allocation31_spill] sm:$0xff] %v6315_v4  ;;  %10258 = vst [vmem:[#allocation32_spill] sm:$0xff] %v6317_v6  ;;  %v718_v6 = vadd.s32 64, %v6194_v3 }
  0xf1   : > { %570 = vbcast.lane.b32.xlu1 %v508_v50, 376  ;;  %566 = vbcast.lane.b32.xlu0 %v508_v50, 368 }
  0xf3   : > { %v6320_v9 = vpop.permute.xlu1 %337  ;;  %v6322_v10 = vpop.permute.xlu0 %333 }
  0xf4   : > { %10259 = vst [vmem:[#allocation33_spill] sm:$0xff] %v6320_v9  ;;  %10260 = vst [vmem:[#allocation34_spill] sm:$0xff] %v6322_v10 }
  0xf5   : > { %581 = vbcast.lane.b32.xlu1 %v575_v8, 264  ;;  %577 = vbcast.lane.b32.xlu0 %v575_v8, 256 }
  0xf7   : > { %v6324_v13 = vpop.permute.xlu1 %345  ;;  %v6326_v14 = vpop.permute.xlu0 %341 }
  0xf8   : > { %10261 = vst [vmem:[#allocation35_spill] sm:$0xff] %v6324_v13  ;;  %10262 = vst [vmem:[#allocation36_spill] sm:$0xff] %v6326_v14  ;;  %v6425_v13 = vrot.slane %v6204_v11, %v6207_v12 }
  0xf9   : > { %589 = vbcast.lane.b32.xlu1 %v575_v8, 280  ;;  %585 = vbcast.lane.b32.xlu0 %v575_v8, 272 }
  0xfb   : > { %v6328_v15 = vpop.permute.xlu1 %353  ;;  %v6330_v23 = vpop.permute.xlu0 %349 }
  0xfc   : > { %10263 = vst [vmem:[#allocation37_spill] sm:$0xff] %v6328_v15  ;;  %10264 = vst [vmem:[#allocation38_spill] sm:$0xff] %v6330_v23  ;;  %v725_v23 = vadd.s32 120, %v6194_v3 }
  0xfd   : > { %597 = vbcast.lane.b32.xlu1 %v575_v8, 296  ;;  %593 = vbcast.lane.b32.xlu0 %v575_v8, 288 }
  0xff   : > { %v6332_v7 = vpop.permute.xlu1 %361  ;;  %v6334_v24 = vpop.permute.xlu0 %357 }
 0x100   : > { %10265 = vst [vmem:[#allocation39_spill] sm:$0xff] %v6332_v7  ;;  %10266 = vst [vmem:[#allocation40_spill] sm:$0xff] %v6334_v24 }
 0x101   : > { %605 = vbcast.lane.b32.xlu1 %v575_v8, 312  ;;  %601 = vbcast.lane.b32.xlu0 %v575_v8, 304 }
 0x103   : > { %v6336_v25 = vpop.permute.xlu1 %369  ;;  %v6338_v30 = vpop.permute.xlu0 %365 }
 0x104   : > { %10267 = vst [vmem:[#allocation41_spill] sm:$0xff] %v6336_v25  ;;  %10268 = vst [vmem:[#allocation42_spill] sm:$0xff] %v6338_v30  ;;  %v719_v30 = vadd.s32 72, %v6194_v3 }
 0x105   : > { %613 = vbcast.lane.b32.xlu1 %v575_v8, 328  ;;  %609 = vbcast.lane.b32.xlu0 %v575_v8, 320 }
 0x107   : > { %v6340_v33 = vpop.permute.xlu1 %380  ;;  %v6342_v50 = vpop.permute.xlu0 %376 }
 0x108   : > { %10269 = vst [vmem:[#allocation43_spill] sm:$0xff] %v6340_v33  ;;  %10270 = vst [vmem:[#allocation44_spill] sm:$0xff] %v6342_v50 }
 0x109   : > { %621 = vbcast.lane.b32.xlu1 %v575_v8, 344  ;;  %617 = vbcast.lane.b32.xlu0 %v575_v8, 336 }
 0x10b   : > { %v6344_v0 = vpop.permute.xlu1 %388  ;;  %v6346_v20 = vpop.permute.xlu0 %384 }
 0x10c   : > { %10271 = vst [vmem:[#allocation45_spill] sm:$0xff] %v6344_v0  ;;  %10272 = vst [vmem:[#allocation46_spill] sm:$0xff] %v6346_v20 }
 0x10d   : > { %629 = vbcast.lane.b32.xlu1 %v575_v8, 360  ;;  %625 = vbcast.lane.b32.xlu0 %v575_v8, 352 }
 0x10f   : > { %v6348_v21 = vpop.permute.xlu1 %396  ;;  %v6350_v19 = vpop.permute.xlu0 %392 }
 0x110   : > { %10273 = vst [vmem:[#allocation47_spill] sm:$0xff] %v6348_v21  ;;  %10274 = vst [vmem:[#allocation48_spill] sm:$0xff] %v6350_v19  ;;  %v713_v21 = vadd.s32 24, %v6194_v3  ;;  %v715_v19 = vadd.s32 40, %v6194_v3 }
 0x111   : > { %637 = vbcast.lane.b32.xlu1 %v575_v8, 376  ;;  %633 = vbcast.lane.b32.xlu0 %v575_v8, 368 }
 0x113   : > { %v6355_v33 = vpop.permute.xlu1 %404  ;;  %v6357_v50 = vpop.permute.xlu0 %400 }
 0x114   : > { %10275 = vst [vmem:[#allocation49_spill] sm:$0xff] %v6355_v33  ;;  %10276 = vst [vmem:[#allocation50_spill] sm:$0xff] %v6357_v50  ;;  %v10282_v33 = vlaneseq }
 0x115   : > { %648 = vbcast.lane.b32.xlu1 %v6353_v18, 264  ;;  %644 = vbcast.lane.b32.xlu0 %v6353_v18, 256 }
 0x116   : > { %v6376_v50 = vand.u32 127, %v10282_v33  ;;  %v717_v33 = vadd.s32 56, %v6194_v3 }
 0x117   : > { %v6361_v0 = vpop.permute.xlu1 %412  ;;  %v6363_v20 = vpop.permute.xlu0 %408 }
 0x118   : > { %10277 = vst [vmem:[#allocation51_spill] sm:$0xff] %v6361_v0  ;;  %10278 = vst [vmem:[#allocation52_spill] sm:$0xff] %v6363_v20  ;;  %v712_v0 = vadd.s32 16, %v6194_v3  ;;  %v752_v25 = vsub.s32 %v6376_v50, %v715_v19  ;;  %v756_v24 = vsub.s32 %v6376_v50, %v717_v33  ;;  %v760_v15 = vsub.s32 %v6376_v50, %v719_v30 }
 0x119   : > { %656 = vbcast.lane.b32.xlu1 %v6353_v18, 280  ;;  %652 = vbcast.lane.b32.xlu0 %v6353_v18, 272  ;;  %10283 = vst [vmem:[#allocation56_spill] sm:$0xff] %v6376_v50  ;;  %v723_v19 = vadd.s32 104, %v6194_v3  ;;  %v6419_v33 = vadd.s32 128, %v6376_v50  ;;  %v727_v30 = vadd.s32 136, %v6194_v3  ;;  %v6442_v1 = vsub.s32 %v6376_v50, %v6194_v3 }
 0x11a   : > { %vm6433_vm2 = vcmp.lt.s32.totalorder %v752_v25, 0  ;;  %vm6444_vm3 = vcmp.lt.s32.totalorder %v756_v24, 0  ;;  %vm6448_vm4 = vcmp.lt.s32.totalorder %v760_v15, 0  ;;  %v772_v63 = vsub.s32 %v6376_v50, %v725_v23 }
 0x11b   : > { %v6367_v22 = vpop.permute.xlu1 %420  ;;  %v6369_v2 = vpop.permute.xlu0 %416  ;;  %10297 = vst [vmem:[#allocation64_spill] sm:$0xff] %v6442_v1  ;;  %v10115_v24 = vmov 0.0   ;;  %v777_v62 = vsub.s32 %v6419_v33, %v727_v30  ;;  %vm834_vm5 = vcmp.lt.s32.totalorder %v6442_v1, 0  ;;  %v770_v53 = vsub.s32 %v6376_v50, %v724_v17 }
 0x11c   : > { %10279 = vst [vmem:[#allocation53_spill] sm:$0xff] %v6367_v22  ;;  %10280 = vst [vmem:[#allocation54_spill] sm:$0xff] %v6369_v2  ;;  %v746_v2 = vsub.s32 %v6376_v50, %v712_v0  ;;  %v748_v0 = vsub.s32 %v6376_v50, %v713_v21  ;;  %v714_v21 = vadd.s32 32, %v6194_v3  ;;  %v6492_v9 = vsel %vm6448_vm4, 1.0, %v10115_v24 }
 0x11d   : > { %664 = vbcast.lane.b32.xlu1 %v6353_v18, 296  ;;  %660 = vbcast.lane.b32.xlu0 %v6353_v18, 288  ;;  %vm6507_vm10 = vcmp.lt.s32.totalorder %v772_v63, 0  ;;  %vm869_vm12 = vcmp.lt.s32.totalorder %v777_v62, 0  ;;  %v722_v63 = vadd.s32 96, %v6194_v3  ;;  %vm862_vm4 = vcmp.lt.s32.totalorder %v770_v53, 0 }
 0x11e   : > { %vm6396_vm0 = vcmp.lt.s32.totalorder %v746_v2, 0  ;;  %v711_v2 = vadd.s32 8, %v6194_v3  ;;  %vm6429_vm1 = vcmp.lt.s32.totalorder %v748_v0, 0  ;;  %v6555_v10 = vsel %vm6507_vm10, 1.0, %v10115_v24 }
 0x11f   : > { %v6373_v8 = vpop.permute.xlu1 %428  ;;  %v6379_v20 = vpop.permute.xlu0 %424  ;;  %v6462_v15 = vsel %vm6396_vm0, 1.0, %v10115_v24  ;;  %v6472_v23 = vsel %vm6429_vm1, 1.0, %v10115_v24 }
 0x120   : > { %10281 = vst [vmem:[#allocation55_spill] sm:$0xff] %v6373_v8  ;;  %10284 = vst [vmem:[#allocation57_spill] sm:$0xff] %v6379_v20  ;;  %v744_v0 = vsub.s32 %v6376_v50, %v711_v2 }
 0x121   : > { %672 = vbcast.lane.b32.xlu1 %v6353_v18, 312  ;;  %668 = vbcast.lane.b32.xlu0 %v6353_v18, 304 }
 0x122   : > { %vm6499_vm7 = vcmp.lt.s32.totalorder %v744_v0, 0  ;;  %v739_v0 = vadd.s32 232, %v6194_v3 }
 0x123   : > { %v6383_v22 = vpop.permute.xlu1 %436  ;;  %v6388_v8 = vpop.permute.xlu0 %432 }
 0x124   : > { %10285 = vst [vmem:[#allocation58_spill] sm:$0xff] %v6383_v22  ;;  %10286 = vst [vmem:[#allocation59_spill] sm:$0xff] %v6388_v8  ;;  %v6404_v8 = vrot.slane %v6204_v11, %v6197_v5  ;;  %v716_v5 = vadd.s32 48, %v6194_v3  ;;  %v758_v22 = vsub.s32 %v6376_v50, %v718_v6  ;;  %v766_v11 = vsub.s32 %v6376_v50, %v722_v63 }
 0x125   : > { %680 = vbcast.lane.b32.xlu1 %v6353_v18, 328  ;;  %676 = vbcast.lane.b32.xlu0 %v6353_v18, 320  ;;  %v730_v63 = vadd.s32 160, %v6194_v3  ;;  %v801_v48 = vsub.s32 %v6419_v33, %v739_v0  ;;  %v740_v0 = vadd.s32 240, %v6194_v3 }
 0x126   : > { %vm850_vm14 = vcmp.lt.s32.totalorder %v758_v22, 0  ;;  %v735_v22 = vadd.s32 200, %v6194_v3  ;;  %vm6598_vm1 = vcmp.lt.s32.totalorder %v766_v11, 0  ;;  %v797_v11 = vsub.s32 %v6419_v33, %v737_v57 }
 0x127   : > { %v6394_v20 = vpop.permute.xlu1 %447  ;;  %v6406_v7 = vpop.permute.xlu0 %443  ;;  %v6566_v6 = vsel %vm850_vm14, 1.0, %v10115_v24  ;;  %v795_v57 = vsub.s32 %v6419_v33, %v736_v55  ;;  %v803_v54 = vsub.s32 %v6419_v33, %v740_v0 }
 0x128   : > { %10287 = vst [vmem:[#allocation60_spill] sm:$0xff] %v6394_v20  ;;  %10290 = vst [vmem:[#allocation61_spill] sm:$0xff] %v6406_v7  ;;  %v721_v20 = vadd.s32 88, %v6194_v3  ;;  %v729_v7 = vadd.s32 152, %v6194_v3 }
 0x129   : > { %688 = vbcast.lane.b32.xlu1 %v6353_v18, 344  ;;  %684 = vbcast.lane.b32.xlu0 %v6353_v18, 336 }
 0x12a   : > { %v764_v25 = vsub.s32 %v6376_v50, %v721_v20  ;;  %v754_v20 = vsub.s32 %v6376_v50, %v716_v5  ;;  %v781_v2 = vsub.s32 %v6419_v33, %v729_v7  ;;  %v6487_v7 = vsel %vm6444_vm3, 1.0, %v10115_v24 }
 0x12b   : > { %v6427_v14 = vpop.permute.xlu1 %455  ;;  %v6438_v4 = vpop.permute.xlu0 %451 }
 0x12c   : > { %10291 = vst [vmem:[#allocation62_spill] sm:$0xff] %v6427_v14  ;;  %10296 = vst [vmem:[#allocation63_spill] sm:$0xff] %v6438_v4  ;;  %v750_v4 = vsub.s32 %v6376_v50, %v714_v21  ;;  %v768_v14 = vsub.s32 %v6376_v50, %v723_v19  ;;  %v6477_v21 = vsel %vm6433_vm2, 1.0, %v10115_v24  ;;  %v731_v19 = vadd.s32 168, %v6194_v3 }
 0x12d   : > { %696 = vbcast.lane.b32.xlu1 %v6353_v18, 360  ;;  %692 = vbcast.lane.b32.xlu0 %v6353_v18, 352  ;;  %10303 = vst [vmem:[#allocation66_spill] sm:$0xff] %v6477_v21  ;;  %vm6494_vm6 = vcmp.lt.s32.totalorder %v764_v25, 0  ;;  %vm6512_vm11 = vcmp.lt.s32.totalorder %v754_v20, 0  ;;  %v720_v25 = vadd.s32 80, %v6194_v3 }
 0x12e   : > { %vm6503_vm8 = vcmp.lt.s32.totalorder %v750_v4, 0  ;;  %vm860_vm9 = vcmp.lt.s32.totalorder %v768_v14, 0  ;;  %vm6517_vm13 = vcmp.lt.s32.totalorder %v781_v2, 0  ;;  %v785_v14 = vsub.s32 %v6419_v33, %v731_v19 }
 0x12f   : > { %v6467_v59 = vpop.permute.xlu1 %463  ;;  %v6481_v5 = vpop.permute.xlu0 %459  ;;  %v6536_v62 = vsel %vm6494_vm6, 1.0, %v10115_v24  ;;  %v6539_v2 = vsel %vm860_vm9, 1.0, %v10115_v24  ;;  %v6545_v19 = vsel %vm6499_vm7, 1.0, %v10115_v24  ;;  %v6550_v1 = vsel %vm6503_vm8, 1.0, %v10115_v24 }
 0x130   : > { %10302 = vst [vmem:[#allocation65_spill] sm:$0xff] %v6467_v59  ;;  %10304 = vst [vmem:[#allocation67_spill] sm:$0xff] %v6481_v5  ;;  %v6531_v5 = vsel %vm834_vm5, 1.0, %v10115_v24  ;;  %v762_v30 = vsub.s32 %v6376_v50, %v720_v25  ;;  %v6572_v59 = vsel %vm6517_vm13, 1.0, %v10115_v24  ;;  %vm877_vm15 = vcmp.lt.s32.totalorder %v785_v14, 0 }
 0x131   : > { %704 = vbcast.lane.b32.xlu1 %v6353_v18, 376  ;;  %700 = vbcast.lane.b32.xlu0 %v6353_v18, 368  ;;  %v733_v18 = vadd.s32 184, %v6194_v3  ;;  %10319 = vst [vmem:[#allocation70_spill] sm:$0xff] %v6572_v59  ;;  %v793_v25 = vsub.s32 %v6419_v33, %v735_v22  ;;  %v732_v14 = vadd.s32 176, %v6194_v3  ;;  %v734_v22 = vadd.s32 192, %v6194_v3 }
 0x132   : > { %vm6589_vm0 = vcmp.lt.s32.totalorder %v762_v30, 0  ;;  %v738_v30 = vadd.s32 224, %v6194_v3  ;;  %vm889_vm6 = vcmp.lt.s32.totalorder %v797_v11, 0  ;;  %vm893_vm7 = vcmp.lt.s32.totalorder %v801_v48, 0 }
 0x133   : > { %v6521_v4 = vpop.permute.xlu1 %471  ;;  %v6526_v20 = vpop.permute.xlu0 %467  ;;  %v789_v16 = vsub.s32 %v6419_v33, %v733_v18  ;;  %v741_v18 = vadd.s32 248, %v6194_v3  ;;  %vm6611_vm3 = vcmp.lt.s32.totalorder %v793_v25, 0  ;;  %v787_v50 = vsub.s32 %v6419_v33, %v732_v14 }
 0x134   : > { %10317 = vst [vmem:[#allocation68_spill] sm:$0xff] %v6521_v4  ;;  %10318 = vst [vmem:[#allocation69_spill] sm:$0xff] %v6526_v20  ;;  %v6558_v20 = vsel %vm869_vm12, 1.0, %v10115_v24  ;;  %v6563_v4 = vsel %vm6512_vm11, 1.0, %v10115_v24  ;;  %v728_v24 = vadd.s32 144, %v6194_v3  ;;  %v791_v25 = vsub.s32 %v6419_v33, %v734_v22 }
 0x135   : > { %vm6603_vm2 = vcmp.lt.s32.totalorder %v789_v16, 0  ;;  %v783_v16 = vsub.s32 %v6419_v33, %v730_v63  ;;  %v805_v59 = vsub.s32 %v6419_v33, %v741_v18  ;;  %vm879_vm10 = vcmp.lt.s32.totalorder %v787_v50, 0 }
 0x136   : > { %v779_v17 = vsub.s32 %v6419_v33, %v728_v24  ;;  %vm883_vm12 = vcmp.lt.s32.totalorder %v791_v25, 0  ;;  %vm887_vm13 = vcmp.lt.s32.totalorder %v795_v57, 0 }
 0x137   : > { %v6577_v12 = vpop.permute.xlu1 %479  ;;  %v6579_v61 = vpop.permute.xlu0 %475  ;;  %vm875_vm9 = vcmp.lt.s32.totalorder %v783_v16, 0  ;;  %vm897_vm11 = vcmp.lt.s32.totalorder %v805_v59, 0 }
 0x138   : > { %10320 = vst [vmem:[#allocation71_spill] sm:$0xff] %v6577_v12  ;;  %10321 = vst [vmem:[#allocation72_spill] sm:$0xff] %v6579_v61  ;;  %v10324_v61 = vmov 0.0   ;;  %v799_v12 = vsub.s32 %v6419_v33, %v738_v30  ;;  %vm871_vm8 = vcmp.lt.s32.totalorder %v779_v17, 0 }
 0x139   : > { %v6594_v58 = vsel %vm877_vm15, 1.0, %v10324_v61  ;;  %v6634_v24 = vsel %vm6598_vm1, 1.0, %v10324_v61  ;;  %v6639_v63 = vsel %vm6603_vm2, 1.0, %v10324_v61  ;;  %v6647_v55 = vsel %vm6611_vm3, 1.0, %v10324_v61 }
 0x13a   : > { %10325 = vst [vmem:[#allocation73_spill] sm:$0xff] %v6594_v58  ;;  %v775_v58 = vsub.s32 %v6419_v33, %v726_v60  ;;  %v6626_v60 = vsel %vm6589_vm0, 1.0, %v10324_v61  ;;  %v6650_v53 = vsel %vm862_vm4, 1.0, %v10324_v61  ;;  %v6657_v52 = vsel %vm889_vm6, 1.0, %v10324_v61 }
 0x13b   : > { %v6608_v51 = vpop.permute.xlu0 %483  ;;  %v6621_v49 = vpop.permute.xlu1 %487  ;;  %vm891_vm14 = vcmp.lt.s32.totalorder %v799_v12, 0  ;;  %v6660_v48 = vsel %vm893_vm7, 1.0, %v10324_v61  ;;  %v6665_v59 = vsel %vm871_vm8, 1.0, %v10324_v61  ;;  %v6668_v50 = vsel %vm875_vm9, 1.0, %v10324_v61 }
 0x13c   : > { %10330 = vst [vmem:[#allocation74_spill] sm:$0xff] %v6608_v51  ;;  %10333 = vst [vmem:[#allocation75_spill] sm:$0xff] %v6621_v49  ;;  %vm867_vm5 = vcmp.lt.s32.totalorder %v775_v58, 0  ;;  %v6671_v33 = vsel %vm879_vm10, 1.0, %v10324_v61  ;;  %v6674_v18 = vsel %vm897_vm11, 1.0, %v10324_v61  ;;  %vm1262_vm15 = vcmp.eq.f32.partialorder %v6404_v8, %v6239_v26 }
 0x13d   : > { %v6654_v56 = vsel %vm867_vm5, 1.0, %v10324_v61  ;;  %10336 = vst [vmem:[#allocation78_spill] sm:$0xff] %v6671_v33  ;;  %vm1258_vm0 = vcmp.eq.f32.partialorder %v6404_v8, %v6241_v27  ;;  %v6681_v22 = vsel %vm883_vm12, 1.0, %v10324_v61  ;;  %v6684_v30 = vsel %vm887_vm13, 1.0, %v10324_v61 }
 0x13e   : > { %vm1006_vm1 = vcmp.lt.f32.partialorder %v6404_v8, %v6239_v26  ;;  %vm1007_vm2 = vcmp.lt.f32.partialorder %v6425_v13, %v6239_v26  ;;  %v6693_v17 = vsel %vm891_vm14, 1.0, %v10324_v61  ;;  %vm6695_vm3 = vcmp.lt.s32.totalorder %v803_v54, 0 }
 0x13f   : > { %v6642_v14 = vpop.permute.xlu0 %491  ;;  %v6662_v58 = vpop.permute.xlu1 %495  ;;  %vm1264_vm4 = vcmp.eq.f32.partialorder %v6404_v8, %v6243_v28  ;;  %vm1002_vm5 = vcmp.lt.f32.partialorder %v6404_v8, %v6241_v27  ;;  %vm1003_vm6 = vcmp.lt.f32.partialorder %v6425_v13, %v6241_v27  ;;  %vm1260_vm7 = vcmp.eq.f32.partialorder %v6404_v8, %v6245_v29 }
 0x140   : > { %10334 = vst [vmem:[#allocation76_spill] sm:$0xff] %v6642_v14  ;;  %10335 = vst [vmem:[#allocation77_spill] sm:$0xff] %v6662_v58  ;;  %vm1268_vm8 = vcmp.eq.f32.partialorder %v6404_v8, %v6248_v31  ;;  %vm1266_vm9 = vcmp.eq.f32.partialorder %v6404_v8, %v6250_v32  ;;  %v1514_v25 = vsel %vm1258_vm0, %v6531_v5, 0.0  ;;  %v1518_v57 = vsel %vm1262_vm15, %v6462_v15, 0.0 }
 0x141   : > { %vm1008_vm10 = vcmp.lt.f32.partialorder %v6404_v8, %v6243_v28  ;;  %vm1004_vm12 = vcmp.lt.f32.partialorder %v6404_v8, %v6245_v29  ;;  %vm1005_vm13 = vcmp.lt.f32.partialorder %v6425_v13, %v6245_v29  ;;  %vm1012_vm14 = vcmp.lt.f32.partialorder %v6404_v8, %v6248_v31 }
 0x142   : > { %vm1013_vm0 = vcmp.lt.f32.partialorder %v6425_v13, %v6248_v31  ;;  %v1516_v12 = vsel %vm1260_vm7, %v6545_v19, 0.0  ;;  %v1520_v54 = vsel %vm1264_vm4, %v6472_v23, 0.0  ;;  %vm1010_vm15 = vcmp.lt.f32.partialorder %v6404_v8, %v6250_v32 }
 0x143   : > { %v6690_v11 = vpop.permute.xlu0 %499  ;;  %v6728_v0 = vpop.permute.xlu1 %503  ;;  %vm1011_vm11 = vcmp.lt.f32.partialorder %v6425_v13, %v6250_v32  ;;  %v1522_v3 = vsel %vm1266_vm9, %v6550_v1, 0.0  ;;  %v1771_v58 = vsel %vm1003_vm6, 1.0, %v10324_v61  ;;  %v1774_v32 = vsel %vm1006_vm1, 1.0, %v1518_v57 }
 0x144   : > { %10337 = vst [vmem:[#allocation79_spill] sm:$0xff] %v6690_v11  ;;  %10340 = vst [vmem:[#allocation80_spill] sm:$0xff] %v6728_v0  ;;  %v1524_v11 = vsel %vm1268_vm8, %v6477_v21, 0.0  ;;  %v1770_v0 = vsel %vm1002_vm5, 1.0, %v1514_v25  ;;  %v1775_v14 = vsel %vm1007_vm2, 1.0, %v10324_v61  ;;  %v1772_v25 = vsel %vm1004_vm12, 1.0, %v1516_v12 }
 0x145   : > { %v1773_v27 = vsel %vm1005_vm13, 1.0, %v10324_v61  ;;  %v1776_v57 = vsel %vm1008_vm10, 1.0, %v1520_v54  ;;  %vm10342_vm1 = vcmp.lt.f32.partialorder %v6425_v13, %v6243_v28  ;;  %v1778_v51 = vsel %vm1010_vm15, 1.0, %v1522_v3 }
 0x146   : > { %v1777_v26 = vsel %vm10342_vm1, 1.0, %v10324_v61  ;;  %v1780_v12 = vsel %vm1012_vm14, 1.0, %v1524_v11  ;;  %v1781_v29 = vsel %vm1013_vm0, 1.0, %v10324_v61  ;;  %vm1272_vm2 = vcmp.eq.f32.partialorder %v6404_v8, %v6253_v34 }
 0x147   : > { %v6758_v49 = vpop.permute.xlu0 %510  ;;  %v2282_v54 = vadd.f32 %v1771_v58, %v1770_v0  ;;  %v2288_v21 = vadd.f32 %v1775_v14, %v1774_v32  ;;  %v6787_v3 = vsel %vm6695_vm3, 1.0, %v10324_v61  ;;  %vm1015_vm4 = vcmp.lt.f32.partialorder %v6425_v13, %v6255_v35  ;;  %v6793_v28 = vpop.permute.xlu1 %514 }
 0x148   : > { %10341 = vst [vmem:[#allocation81_spill] sm:$0xff] %v6758_v49  ;;  %v1779_v49 = vsel %vm1011_vm11, 1.0, %v10324_v61  ;;  %vm1270_vm5 = vcmp.eq.f32.partialorder %v6404_v8, %v6255_v35  ;;  %v2285_v31 = vadd.f32 %v1773_v27, %v1772_v25  ;;  %v2291_v11 = vadd.f32 %v1777_v26, %v1776_v57 }
 0x149   : > { %vm1016_vm6 = vcmp.lt.f32.partialorder %v6404_v8, %v6253_v34  ;;  %vm1017_vm7 = vcmp.lt.f32.partialorder %v6425_v13, %v6253_v34  ;;  %v2294_v14 = vadd.f32 %v1779_v49, %v1778_v51  ;;  %v2297_v58 = vadd.f32 %v1781_v29, %v1780_v12 }
 0x14a   : > { %vm1276_vm3 = vcmp.eq.f32.partialorder %v6404_v8, %v6257_v36  ;;  %vm1014_vm8 = vcmp.lt.f32.partialorder %v6404_v8, %v6255_v35  ;;  %vm1274_vm9 = vcmp.eq.f32.partialorder %v6404_v8, %v6259_v37  ;;  %v1528_v16 = vsel %vm1272_vm2, %v6487_v7, 0.0 }
 0x14b   : > { %v6809_v0 = vpop.permute.xlu0 %518  ;;  %vm1280_vm10 = vcmp.eq.f32.partialorder %v6404_v8, %v6261_v38  ;;  %vm1278_vm11 = vcmp.eq.f32.partialorder %v6404_v8, %v6263_v39  ;;  %v1526_v49 = vsel %vm1270_vm5, %v6563_v4, 0.0  ;;  %v1783_v51 = vsel %vm1015_vm4, 1.0, %v10324_v61  ;;  %v6844_v27 = vpop.permute.xlu1 %522 }
 0x14c   : > { %vm1020_vm12 = vcmp.lt.f32.partialorder %v6404_v8, %v6257_v36  ;;  %vm1021_vm13 = vcmp.lt.f32.partialorder %v6425_v13, %v6257_v36  ;;  %vm1018_vm14 = vcmp.lt.f32.partialorder %v6404_v8, %v6259_v37  ;;  %vm1019_vm0 = vcmp.lt.f32.partialorder %v6425_v13, %v6259_v37 }
 0x14d   : > { %vm1024_vm15 = vcmp.lt.f32.partialorder %v6404_v8, %v6261_v38  ;;  %vm1025_vm1 = vcmp.lt.f32.partialorder %v6425_v13, %v6261_v38  ;;  %v1530_v32 = vsel %vm1274_vm9, %v6566_v6, 0.0  ;;  %v1532_v25 = vsel %vm1276_vm3, %v6492_v9, 0.0 }
 0x14e   : > { %vm1022_vm2 = vcmp.lt.f32.partialorder %v6404_v8, %v6263_v39  ;;  %vm1023_vm4 = vcmp.lt.f32.partialorder %v6425_v13, %v6263_v39  ;;  %v1536_v57 = vsel %vm1280_vm10, %v6536_v62, 0.0  ;;  %v1782_v26 = vsel %vm1014_vm8, 1.0, %v1526_v49 }
 0x14f   : > { %v1784_v12 = vsel %vm1016_vm6, 1.0, %v1528_v16  ;;  %v1785_v29 = vsel %vm1017_vm7, 1.0, %v10324_v61  ;;  %vm1284_vm5 = vcmp.eq.f32.partialorder %v6404_v8, %v6265_v40  ;;  %v1788_v35 = vsel %vm1020_vm12, 1.0, %v1532_v25  ;;  %v6877_v34 = vpop.permute.xlu0 %526  ;;  %v6907_v25 = vpop.permute.xlu1 %530 }
 0x150   : > { %2283 = vadd.xlane.f32.xlu0 %v2282_v54  ;;  %v1787_v54 = vsel %vm1019_vm0, 1.0, %v10324_v61  ;;  %v1789_v16 = vsel %vm1021_vm13, 1.0, %v10324_v61  ;;  %v1791_v37 = vsel %vm1023_vm4, 1.0, %v10324_v61  ;;  %v1793_v36 = vsel %vm1025_vm1, 1.0, %v10324_v61 }
 0x151   : > { %vm1027_vm6 = vcmp.lt.f32.partialorder %v6425_v13, %v6267_v41  ;;  %vm1282_vm7 = vcmp.eq.f32.partialorder %v6404_v8, %v6267_v41  ;;  %vm1028_vm3 = vcmp.lt.f32.partialorder %v6404_v8, %v6265_v40  ;;  %vm1029_vm8 = vcmp.lt.f32.partialorder %v6425_v13, %v6265_v40 }
 0x152   : > { %v2309_v39 = vadd.f32 %v1789_v16, %v1788_v35  ;;  %v1540_v38 = vsel %vm1284_vm5, %v6539_v2, 0.0  ;;  %vm1026_vm9 = vcmp.lt.f32.partialorder %v6404_v8, %v6267_v41  ;;  %vm1288_vm10 = vcmp.eq.f32.partialorder %v6404_v8, %v6269_v42 }
 0x153   : > { %vm1290_vm12 = vcmp.eq.f32.partialorder %v6404_v8, %v6275_v45  ;;  %vm1291_vm13 = vcmp.eq.f32.partialorder %v6425_v13, %v6275_v45  ;;  %vm1033_vm0 = vcmp.lt.f32.partialorder %v6425_v13, %v6269_v42  ;;  %vm1292_vm1 = vcmp.eq.f32.partialorder %v6404_v8, %v6273_v44 }
 0x154   : > { %2289 = vadd.xlane.f32.xlu0 %v2288_v21  ;;  %v1534_v21 = vsel %vm1278_vm11, %v6626_v60, 0.0  ;;  %vm1286_vm11 = vcmp.eq.f32.partialorder %v6404_v8, %v6271_v43  ;;  %vm1293_vm4 = vcmp.eq.f32.partialorder %v6425_v13, %v6273_v44  ;;  %vm1034_vm5 = vcmp.lt.f32.partialorder %v6404_v8, %v6275_v45 }
 0x155   : > { %2286 = vadd.xlane.f32.xlu1 %v2285_v31  ;;  %v1786_v31 = vsel %vm1018_vm14, 1.0, %v1530_v32  ;;  %v1790_v49 = vsel %vm1022_vm2, 1.0, %v1534_v21  ;;  %v1792_v32 = vsel %vm1024_vm15, 1.0, %v1536_v57  ;;  %vm1032_vm14 = vcmp.lt.f32.partialorder %v6404_v8, %v6269_v42 }
 0x156   : > { %v2306_v21 = vadd.f32 %v1787_v54, %v1786_v31  ;;  %v2315_v57 = vadd.f32 %v1793_v36, %v1792_v32  ;;  %v1796_v54 = vsel %vm1028_vm3, 1.0, %v1540_v38  ;;  %vm1031_vm15 = vcmp.lt.f32.partialorder %v6425_v13, %v6271_v43 }
 0x157   : > { %vm1030_vm2 = vcmp.lt.f32.partialorder %v6404_v8, %v6271_v43  ;;  %v1542_v40 = vsel %vm1286_vm11, %v6650_v53, 0.0  ;;  %v1544_v31 = vsel %vm1288_vm10, %v6555_v10, 0.0  ;;  %v1546_v35 = vsel %vm1290_vm12, 1.0, %v10324_v61 }
 0x158   : > { %2292 = vadd.xlane.f32.xlu0 %v2291_v11  ;;  %v2300_v11 = vadd.f32 %v1783_v51, %v1782_v26  ;;  %v2312_v51 = vadd.f32 %v1791_v37, %v1790_v49  ;;  %v1538_v26 = vsel %vm1282_vm7, %v6634_v24, 0.0  ;;  %v1547_v16 = vsel %vm1291_vm13, %v6654_v56, 0.0  ;;  %v6957_v49 = vpop.permute.xlu1 %538 }
 0x159   : > { %2295 = vadd.xlane.f32.xlu1 %v2294_v14  ;;  %v2303_v14 = vadd.f32 %v1785_v29, %v1784_v12  ;;  %v1795_v12 = vsel %vm1027_vm6, 1.0, %v10324_v61  ;;  %v6921_v29 = vpop.permute.xlu0 %534  ;;  %vm1035_vm6 = vcmp.lt.f32.partialorder %v6425_v13, %v6275_v45  ;;  %10343 = vst [vmem:[#allocation82_spill] sm:$0xff] %v6957_v49  ;;  %v1794_v37 = vsel %vm1026_vm9, 1.0, %v1538_v26 }
 0x15a   : > { %v1799_v32 = vsel %vm1031_vm15, 1.0, %v10324_v61  ;;  %vm1036_vm7 = vcmp.lt.f32.partialorder %v6404_v8, %v6273_v44  ;;  %v1548_v36 = vsel %vm1292_vm1, 1.0, %v10324_v61  ;;  %vm1037_vm3 = vcmp.lt.f32.partialorder %v6425_v13, %v6273_v44 }
 0x15b   : > { %v1798_v41 = vsel %vm1030_vm2, 1.0, %v1542_v40  ;;  %v1802_v44 = vsel %vm1034_vm5, 1.0, %v1546_v35  ;;  %v1803_v26 = vsel %vm1035_vm6, 1.0, %v1547_v16  ;;  %v1804_v40 = vsel %vm1036_vm7, 1.0, %v1548_v36 }
 0x15c   : > { %2298 = vadd.xlane.f32.xlu0 %v2297_v58  ;;  %v1797_v58 = vsel %vm1029_vm8, 1.0, %v10324_v61  ;;  %vm1294_vm8 = vcmp.eq.f32.partialorder %v6404_v8, %v6279_v47  ;;  %vm1295_vm9 = vcmp.eq.f32.partialorder %v6425_v13, %v6279_v47  ;;  %vm1038_vm10 = vcmp.lt.f32.partialorder %v6404_v8, %v6279_v47 }
 0x15d   : > { %2301 = vadd.xlane.f32.xlu1 %v2300_v11  ;;  %v1800_v11 = vsel %vm1032_vm14, 1.0, %v1544_v31  ;;  %v6977_v38 = vpop.permute.xlu0 %542  ;;  %v2318_v31 = vadd.f32 %v1795_v12, %v1794_v37  ;;  %v2321_v43 = vadd.f32 %v1797_v58, %v1796_v54  ;;  %v1550_v42 = vsel %vm1294_vm8, 1.0, %v10324_v61  ;;  %v10346_v37 = vld [vmem:[#allocation16_spill] sm:$0xff] }
 0x15e   : > { %10344 = vst [vmem:[#allocation83_spill] sm:$0xff] %v6977_v38  ;;  %vm1296_vm11 = vcmp.eq.f32.partialorder %v6404_v8, %v6277_v46  ;;  %v2324_v35 = vadd.f32 %v1799_v32, %v1798_v41  ;;  %v2330_v16 = vadd.f32 %v1803_v26, %v1802_v44  ;;  %vm1297_vm12 = vcmp.eq.f32.partialorder %v6425_v13, %v6277_v46  ;;  %v10351_v44 = vld [vmem:[#allocation73_spill] sm:$0xff] }
 0x15f   : > { %vm1039_vm13 = vcmp.lt.f32.partialorder %v6425_v13, %v6279_v47  ;;  %vm1040_vm14 = vcmp.lt.f32.partialorder %v6404_v8, %v6277_v46  ;;  %v1806_v54 = vsel %vm1038_vm10, 1.0, %v1550_v42  ;;  %v1552_v58 = vsel %vm1296_vm11, 1.0, %v10324_v61  ;;  %v10348_v47 = vld [vmem:[#allocation70_spill] sm:$0xff] }
 0x160   : > { %2304 = vadd.xlane.f32.xlu0 %v2303_v14  ;;  %v1549_v14 = vsel %vm1293_vm4, %v6558_v20, 0.0  ;;  %vm1298_vm15 = vcmp.eq.f32.partialorder %v6404_v8, %v10346_v37  ;;  %v1553_v36 = vsel %vm1297_vm12, %v10348_v47, 0.0  ;;  %vm1299_vm1 = vcmp.eq.f32.partialorder %v6425_v13, %v10346_v37 }
 0x161   : > { %2307 = vadd.xlane.f32.xlu1 %v2306_v21  ;;  %v1801_v21 = vsel %vm1033_vm0, 1.0, %v10324_v61  ;;  %v1805_v38 = vsel %vm1037_vm3, 1.0, %v1549_v14  ;;  %vm1041_vm0 = vcmp.lt.f32.partialorder %v6425_v13, %v6277_v46  ;;  %v7010_v32 = vpop.permute.xlu0 %550  ;;  %v10350_v14 = vld [vmem:[#allocation18_spill] sm:$0xff]  ;;  %vm1042_vm3 = vcmp.lt.f32.partialorder %v6404_v8, %v10346_v37 }
 0x162   : > { %v2327_v45 = vadd.f32 %v1801_v21, %v1800_v11  ;;  %v2333_v12 = vadd.f32 %v1805_v38, %v1804_v40  ;;  %10347 = vst [vmem:[#allocation16_spill] sm:$0xff] %v7010_v32  ;;  %v10349_v11 = vld [vmem:[#allocation15_spill] sm:$0xff]  ;;  %vm1302_vm6 = vcmp.eq.f32.partialorder %v6404_v8, %v10350_v14  ;;  %vm1303_vm7 = vcmp.eq.f32.partialorder %v6425_v13, %v10350_v14 }
 0x163   : > { %vm1300_vm2 = vcmp.eq.f32.partialorder %v6404_v8, %v10349_v11  ;;  %vm1301_vm4 = vcmp.eq.f32.partialorder %v6425_v13, %v10349_v11  ;;  %vm1044_vm5 = vcmp.lt.f32.partialorder %v6404_v8, %v10349_v11  ;;  %vm1043_vm8 = vcmp.lt.f32.partialorder %v6425_v13, %v10346_v37 }
 0x164   : > { %2310 = vadd.xlane.f32.xlu0 %v2309_v39  ;;  %v6998_v39 = vpop.permute.xlu1 %546  ;;  %v1554_v41 = vsel %vm1298_vm15, 1.0, %v10324_v61  ;;  %v1555_v38 = vsel %vm1299_vm1, %v6668_v50, 0.0  ;;  %v1556_v21 = vsel %vm1300_vm2, 1.0, %v10324_v61  ;;  %v1557_v26 = vsel %vm1301_vm4, %v10351_v44, 0.0 }
 0x165   : > { %2313 = vadd.xlane.f32.xlu1 %v2312_v51  ;;  %10345 = vst [vmem:[#allocation84_spill] sm:$0xff] %v6998_v39  ;;  %v1551_v51 = vsel %vm1295_vm9, %v6665_v59, 0.0  ;;  %vm1045_vm9 = vcmp.lt.f32.partialorder %v6425_v13, %v10349_v11  ;;  %vm1046_vm10 = vcmp.lt.f32.partialorder %v6404_v8, %v10350_v14  ;;  %vm1047_vm11 = vcmp.lt.f32.partialorder %v6425_v13, %v10350_v14  ;;  %v7056_v32 = vpop.permute.xlu0 %558 }
 0x166   : > { %v1558_v40 = vsel %vm1302_vm6, 1.0, %v10324_v61  ;;  %v1559_v42 = vsel %vm1303_vm7, %v6671_v33, 0.0  ;;  %10354 = vst [vmem:[#allocation15_spill] sm:$0xff] %v7056_v32  ;;  %v1811_v39 = vsel %vm1043_vm8, 1.0, %v1555_v38  ;;  %v1813_v46 = vsel %vm1045_vm9, 1.0, %v1557_v26 }
 0x167   : > { %v1815_v37 = vsel %vm1047_vm11, 1.0, %v1559_v42 }
 0x168   : > { %2316 = vadd.xlane.f32.xlu0 %v2315_v57  ;;  %v1807_v57 = vsel %vm1039_vm13, 1.0, %v1551_v51  ;;  %v1809_v51 = vsel %vm1041_vm0, 1.0, %v1553_v36  ;;  %v10355_v36 = vld [vmem:[#allocation20_spill] sm:$0xff] }
 0x169   : > { %2319 = vadd.xlane.f32.xlu1 %v2318_v31  ;;  %v7037_v31 = vpop.permute.xlu1 %554  ;;  %v2336_v11 = vadd.f32 %v1807_v57, %v1806_v54  ;;  %vm1307_vm1 = vcmp.eq.f32.partialorder %v6425_v13, %v10355_v36  ;;  %vm1050_vm2 = vcmp.lt.f32.partialorder %v6404_v8, %v10355_v36  ;;  %v10357_v57 = vld [vmem:[#allocation19_spill] sm:$0xff] }
 0x16a   : > { %10352 = vst [vmem:[#allocation70_spill] sm:$0xff] %v7037_v31  ;;  %v1810_v31 = vsel %vm1042_vm3, 1.0, %v1554_v41  ;;  %v1814_v41 = vsel %vm1046_vm10, 1.0, %v1558_v40  ;;  %vm1308_vm4 = vcmp.eq.f32.partialorder %v6404_v8, %v10357_v57  ;;  %vm1309_vm6 = vcmp.eq.f32.partialorder %v6425_v13, %v10357_v57 }
 0x16b   : > { %v2348_v42 = vadd.f32 %v1815_v37, %v1814_v41  ;;  %vm1052_vm7 = vcmp.lt.f32.partialorder %v6404_v8, %v10357_v57  ;;  %vm1053_vm9 = vcmp.lt.f32.partialorder %v6425_v13, %v10357_v57  ;;  %v10361_v41 = vld [vmem:[#allocation24_spill] sm:$0xff] }
 0x16c   : > { %2322 = vadd.xlane.f32.xlu0 %v2321_v43  ;;  %v10353_v43 = vld [vmem:[#allocation17_spill] sm:$0xff] }
 0x16d   : > { %2325 = vadd.xlane.f32.xlu1 %v2324_v35  ;;  %vm1304_vm12 = vcmp.eq.f32.partialorder %v6404_v8, %v10353_v43  ;;  %v1808_v35 = vsel %vm1040_vm14, 1.0, %v1552_v58  ;;  %vm1305_vm13 = vcmp.eq.f32.partialorder %v6425_v13, %v10353_v43  ;;  %v1812_v58 = vsel %vm1044_vm5, 1.0, %v1556_v21  ;;  %v7086_v26 = vpop.permute.xlu1 %562 }
 0x16e   : > { %vm1306_vm14 = vcmp.eq.f32.partialorder %v6404_v8, %v10355_v36  ;;  %vm1048_vm0 = vcmp.lt.f32.partialorder %v6404_v8, %v10353_v43  ;;  %v1560_v38 = vsel %vm1304_vm12, 1.0, %v10324_v61  ;;  %vm1049_vm15 = vcmp.lt.f32.partialorder %v6425_v13, %v10353_v43  ;;  %10356 = vst [vmem:[#allocation18_spill] sm:$0xff] %v7086_v26 }
 0x16f   : > { %v2342_v21 = vadd.f32 %v1811_v39, %v1810_v31  ;;  %v1562_v14 = vsel %vm1306_vm14, 1.0, %v10324_v61  ;;  %v2345_v40 = vadd.f32 %v1813_v46, %v1812_v58  ;;  %v1816_v54 = vsel %vm1048_vm0, 1.0, %v1560_v38  ;;  %v7095_v31 = vpop.permute.xlu0 %566  ;;  %v10360_v58 = vld [vmem:[#allocation21_spill] sm:$0xff] }
 0x170   : > { %2328 = vadd.xlane.f32.xlu0 %v2327_v45  ;;  %v1561_v45 = vsel %vm1305_vm13, %v6639_v63, 0.0  ;;  %vm1051_vm5 = vcmp.lt.f32.partialorder %v6425_v13, %v10355_v36  ;;  %v1563_v39 = vsel %vm1307_vm1, %v6681_v22, 0.0  ;;  %10358 = vst [vmem:[#allocation73_spill] sm:$0xff] %v7095_v31  ;;  %vm1312_vm10 = vcmp.eq.f32.partialorder %v6404_v8, %v10360_v58  ;;  %v10363_v31 = vld [vmem:[#allocation23_spill] sm:$0xff] }
 0x171   : > { %2331 = vadd.xlane.f32.xlu1 %v2330_v16  ;;  %v2339_v16 = vadd.f32 %v1809_v51, %v1808_v35  ;;  %v1817_v43 = vsel %vm1049_vm15, 1.0, %v1561_v45  ;;  %v1818_v35 = vsel %vm1050_vm2, 1.0, %v1562_v14  ;;  %v10359_v51 = vld [vmem:[#allocation22_spill] sm:$0xff]  ;;  %vm1313_vm11 = vcmp.eq.f32.partialorder %v6425_v13, %v10360_v58 }
 0x172   : > { %vm1310_vm3 = vcmp.eq.f32.partialorder %v6404_v8, %v10359_v51  ;;  %vm1311_vm8 = vcmp.eq.f32.partialorder %v6425_v13, %v10359_v51  ;;  %v1565_v46 = vsel %vm1309_vm6, %v6647_v55, 0.0  ;;  %vm1054_vm12 = vcmp.lt.f32.partialorder %v6404_v8, %v10359_v51 }
 0x173   : > { %vm1314_vm13 = vcmp.eq.f32.partialorder %v6404_v8, %v10361_v41  ;;  %vm1315_vm14 = vcmp.eq.f32.partialorder %v6425_v13, %v10361_v41  ;;  %vm1055_vm0 = vcmp.lt.f32.partialorder %v6425_v13, %v10359_v51  ;;  %v1566_v37 = vsel %vm1310_vm3, 1.0, %v10324_v61 }
 0x174   : > { %2334 = vadd.xlane.f32.xlu0 %v2333_v12  ;;  %v1564_v12 = vsel %vm1308_vm4, 1.0, %v10324_v61  ;;  %v1567_v38 = vsel %vm1311_vm8, %v6684_v30, 0.0  ;;  %vm1056_vm15 = vcmp.lt.f32.partialorder %v6404_v8, %v10360_v58  ;;  %vm1057_vm1 = vcmp.lt.f32.partialorder %v6425_v13, %v10360_v58 }
 0x175   : > { %2337 = vadd.xlane.f32.xlu1 %v2336_v11  ;;  %v7123_v11 = vpop.permute.xlu1 %570  ;;  %v1568_v45 = vsel %vm1312_vm10, 1.0, %v10324_v61  ;;  %vm1058_vm2 = vcmp.lt.f32.partialorder %v6404_v8, %v10361_v41  ;;  %vm1059_vm4 = vcmp.lt.f32.partialorder %v6425_v13, %v10361_v41  ;;  %v1571_v14 = vsel %vm1315_vm14, %v6693_v17, 0.0 }
 0x176   : > { %10362 = vst [vmem:[#allocation17_spill] sm:$0xff] %v7123_v11  ;;  %vm1316_vm6 = vcmp.eq.f32.partialorder %v6404_v8, %v10363_v31  ;;  %v7137_v11 = vpop.permute.xlu0 %577  ;;  %v1819_v26 = vsel %vm1051_vm5, 1.0, %v1563_v39  ;;  %v1820_v32 = vsel %vm1052_vm7, 1.0, %v1564_v12  ;;  %v1821_v49 = vsel %vm1053_vm9, 1.0, %v1565_v46 }
 0x177   : > { %10364 = vst [vmem:[#allocation20_spill] sm:$0xff] %v7137_v11  ;;  %vm1317_vm3 = vcmp.eq.f32.partialorder %v6425_v13, %v10363_v31  ;;  %v1822_v11 = vsel %vm1054_vm12, 1.0, %v1566_v37  ;;  %v1823_v36 = vsel %vm1055_vm0, 1.0, %v1567_v38  ;;  %v1824_v39 = vsel %vm1056_vm15, 1.0, %v1568_v45 }
 0x178   : > { %2340 = vadd.xlane.f32.xlu0 %v2339_v16  ;;  %v1569_v16 = vsel %vm1313_vm11, %v6657_v52, 0.0  ;;  %vm1060_vm5 = vcmp.lt.f32.partialorder %v6404_v8, %v10363_v31  ;;  %v1572_v51 = vsel %vm1316_vm6, 1.0, %v10324_v61  ;;  %v2351_v12 = vadd.f32 %v1817_v43, %v1816_v54  ;;  %v10367_v43 = vld [vmem:[#allocation27_spill] sm:$0xff] }
 0x179   : > { %2343 = vadd.xlane.f32.xlu1 %v2342_v21  ;;  %v1570_v21 = vsel %vm1314_vm13, 1.0, %v10324_v61  ;;  %v1825_v57 = vsel %vm1057_vm1, 1.0, %v1569_v16  ;;  %v2354_v46 = vadd.f32 %v1819_v26, %v1818_v35  ;;  %vm1061_vm7 = vcmp.lt.f32.partialorder %v6425_v13, %v10363_v31  ;;  %v7174_v37 = vpop.permute.xlu1 %581  ;;  %v10366_v16 = vld [vmem:[#allocation26_spill] sm:$0xff]  ;;  %v10368_v35 = vld [vmem:[#allocation9_spill] sm:$0xff] }
 0x17a   : > { %v1573_v58 = vsel %vm1317_vm3, %v6660_v48, 0.0  ;;  %10365 = vst [vmem:[#allocation19_spill] sm:$0xff] %v7174_v37  ;;  %v2357_v38 = vadd.f32 %v1821_v49, %v1820_v32  ;;  %v2360_v45 = vadd.f32 %v1823_v36, %v1822_v11  ;;  %vm1318_vm8 = vcmp.eq.f32.partialorder %v6404_v8, %v10366_v16  ;;  %v10369_v49 = vld [vmem:[#allocation10_spill] sm:$0xff]  ;;  %v7186_v32 = vpop.permute.xlu0 %585  ;;  %v10371_v36 = vld [vmem:[#allocation25_spill] sm:$0xff] }
 0x17b   : > { %vm1319_vm9 = vcmp.eq.f32.partialorder %v6425_v13, %v10366_v16  ;;  %v2363_v41 = vadd.f32 %v1825_v57, %v1824_v39  ;;  %v1828_v26 = vsel %vm1060_vm5, 1.0, %v1572_v51  ;;  %vm1062_vm10 = vcmp.lt.f32.partialorder %v6404_v8, %v10366_v16  ;;  %10370 = vst [vmem:[#allocation22_spill] sm:$0xff] %v7186_v32  ;;  %v10372_v39 = vld [vmem:[#allocation28_spill] sm:$0xff] }
 0x17c   : > { %2346 = vadd.xlane.f32.xlu0 %v2345_v40  ;;  %v1826_v40 = vsel %vm1058_vm2, 1.0, %v1570_v21  ;;  %vm1068_vm11 = vcmp.lt.f32.partialorder %v10368_v35, %v10367_v43  ;;  %vm1069_vm12 = vcmp.lt.f32.partialorder %v10369_v49, %v10367_v43  ;;  %v1829_v11 = vsel %vm1061_vm7, 1.0, %v1573_v58  ;;  %v10375_v58 = vld [vmem:[#allocation30_spill] sm:$0xff] }
 0x17d   : > { %2349 = vadd.xlane.f32.xlu1 %v2348_v42  ;;  %v1827_v42 = vsel %vm1059_vm4, 1.0, %v1571_v14  ;;  %vm1063_vm13 = vcmp.lt.f32.partialorder %v6425_v13, %v10366_v16  ;;  %v1574_v21 = vsel %vm1318_vm8, 1.0, %v10324_v61  ;;  %v1575_v14 = vsel %vm1319_vm9, %v6787_v3, 0.0  ;;  %v7211_v57 = vpop.permute.xlu1 %589 }
 0x17e   : > { %v2366_v54 = vadd.f32 %v1827_v42, %v1826_v40  ;;  %vm1320_vm14 = vcmp.eq.f32.partialorder %v6404_v8, %v10371_v36  ;;  %vm1321_vm0 = vcmp.eq.f32.partialorder %v6425_v13, %v10371_v36  ;;  %vm1324_vm15 = vcmp.eq.f32.partialorder %v10368_v35, %v10367_v43  ;;  %10373 = vst [vmem:[#allocation21_spill] sm:$0xff] %v7211_v57 }
 0x17f   : > { %vm1066_vm1 = vcmp.lt.f32.partialorder %v10368_v35, %v10372_v39  ;;  %vm1067_vm2 = vcmp.lt.f32.partialorder %v10369_v49, %v10372_v39  ;;  %vm1322_vm4 = vcmp.eq.f32.partialorder %v10368_v35, %v10372_v39  ;;  %v2369_v31 = vadd.f32 %v1829_v11, %v1828_v26 }
 0x180   : > { %2352 = vadd.xlane.f32.xlu0 %v2351_v12  ;;  %vm1064_vm6 = vcmp.lt.f32.partialorder %v6404_v8, %v10371_v36  ;;  %vm1065_vm3 = vcmp.lt.f32.partialorder %v6425_v13, %v10371_v36  ;;  %v1830_v40 = vsel %vm1062_vm10, 1.0, %v1574_v21  ;;  %v1831_v42 = vsel %vm1063_vm13, 1.0, %v1575_v14 }
 0x181   : > { %2355 = vadd.xlane.f32.xlu1 %v2354_v46  ;;  %v1576_v51 = vsel %vm1320_vm14, 1.0, %v10324_v61  ;;  %v1577_v12 = vsel %vm1321_vm0, %v6674_v18, 0.0  ;;  %v10374_v46 = vld [vmem:[#allocation29_spill] sm:$0xff]  ;;  %vm1326_vm8 = vcmp.eq.f32.partialorder %v10368_v35, %v10375_v58  ;;  %vm1070_vm10 = vcmp.lt.f32.partialorder %v10368_v35, %v10375_v58 }
 0x182   : > { %vm1072_vm5 = vcmp.lt.f32.partialorder %v10368_v35, %v10374_v46  ;;  %vm1073_vm7 = vcmp.lt.f32.partialorder %v10369_v49, %v10374_v46  ;;  %vm1328_vm9 = vcmp.eq.f32.partialorder %v10368_v35, %v10374_v46  ;;  %vm1071_vm13 = vcmp.lt.f32.partialorder %v10369_v49, %v10375_v58  ;;  %v10383_v58 = vld [vmem:[#allocation66_spill] sm:$0xff] }
 0x183   : > { %v1580_v16 = vsel %vm1324_vm15, %v6545_v19, 0.0  ;;  %v2372_v26 = vadd.f32 %v1831_v42, %v1830_v40  ;;  %v1832_v11 = vsel %vm1064_vm6, 1.0, %v1576_v51  ;;  %v1833_v21 = vsel %vm1065_vm3, 1.0, %v1577_v12  ;;  %v7280_v40 = vpop.permute.xlu1 %597  ;;  %v10380_v51 = vld [vmem:[#allocation34_spill] sm:$0xff] }
 0x184   : > { %2358 = vadd.xlane.f32.xlu0 %v2357_v38  ;;  %v1578_v38 = vsel %vm1322_vm4, %v6531_v5, 0.0  ;;  %v1835_v14 = vsel %vm1067_vm2, 1.0, %v10324_v61  ;;  %v1582_v13 = vsel %vm1326_vm8, %v6462_v15, 0.0  ;;  %v1837_v36 = vsel %vm1069_vm12, 1.0, %v10324_v61  ;;  %10379 = vst [vmem:[#allocation23_spill] sm:$0xff] %v7280_v40 }
 0x185   : > { %2361 = vadd.xlane.f32.xlu1 %v2360_v45  ;;  %v7234_v45 = vpop.permute.xlu0 %593  ;;  %v1834_v8 = vsel %vm1066_vm1, 1.0, %v1578_v38  ;;  %v1584_v39 = vsel %vm1328_vm9, %v6472_v23, 0.0  ;;  %v2375_v42 = vadd.f32 %v1833_v21, %v1832_v11  ;;  %v1838_v12 = vsel %vm1070_vm10, 1.0, %v1582_v13  ;;  %v10382_v21 = vld [vmem:[#allocation33_spill] sm:$0xff]  ;;  %v10384_v13 = vld [vmem:[#allocation36_spill] sm:$0xff] }
 0x186   : > { %10376 = vst [vmem:[#allocation24_spill] sm:$0xff] %v7234_v45  ;;  %v10377_v45 = vld [vmem:[#allocation31_spill] sm:$0xff]  ;;  %v2378_v43 = vadd.f32 %v1835_v14, %v1834_v8  ;;  %v1839_v38 = vsel %vm1071_vm13, 1.0, %v10324_v61  ;;  %v1840_v11 = vsel %vm1072_vm5, 1.0, %v1584_v39  ;;  %vm1080_vm12 = vcmp.lt.f32.partialorder %v10368_v35, %v10382_v21 }
 0x187   : > { %vm1076_vm14 = vcmp.lt.f32.partialorder %v10368_v35, %v10377_v45  ;;  %vm1077_vm0 = vcmp.lt.f32.partialorder %v10369_v49, %v10377_v45  ;;  %vm1332_vm1 = vcmp.eq.f32.partialorder %v10368_v35, %v10377_v45  ;;  %vm1081_vm6 = vcmp.lt.f32.partialorder %v10369_v49, %v10382_v21  ;;  %v10387_v45 = vld [vmem:[#allocation38_spill] sm:$0xff] }
 0x188   : > { %2364 = vadd.xlane.f32.xlu0 %v2363_v41  ;;  %v10378_v41 = vld [vmem:[#allocation32_spill] sm:$0xff]  ;;  %vm1336_vm3 = vcmp.eq.f32.partialorder %v10368_v35, %v10382_v21  ;;  %v1588_v46 = vsel %vm1332_vm1, %v10383_v58, 0.0  ;;  %vm1078_vm5 = vcmp.lt.f32.partialorder %v10368_v35, %v10380_v51  ;;  %v2384_v14 = vadd.f32 %v1839_v38, %v1838_v12  ;;  %v10385_v12 = vld [vmem:[#allocation35_spill] sm:$0xff]  ;;  %v7335_v38 = vpop.permute.xlu1 %605 }
 0x189   : > { %2367 = vadd.xlane.f32.xlu1 %v2366_v54  ;;  %vm1330_vm15 = vcmp.eq.f32.partialorder %v10368_v35, %v10378_v41  ;;  %v1836_v54 = vsel %vm1068_vm11, 1.0, %v1580_v16  ;;  %vm1074_vm2 = vcmp.lt.f32.partialorder %v10368_v35, %v10378_v41  ;;  %vm1075_vm4 = vcmp.lt.f32.partialorder %v10369_v49, %v10378_v41  ;;  %v7291_v16 = vpop.permute.xlu0 %601  ;;  %10386 = vst [vmem:[#allocation27_spill] sm:$0xff] %v7335_v38 }
 0x18a   : > { %vm1334_vm11 = vcmp.eq.f32.partialorder %v10368_v35, %v10380_v51  ;;  %10381 = vst [vmem:[#allocation26_spill] sm:$0xff] %v7291_v16  ;;  %v2381_v32 = vadd.f32 %v1837_v36, %v1836_v54  ;;  %vm1338_vm8 = vcmp.eq.f32.partialorder %v10368_v35, %v10384_v13  ;;  %v1843_v39 = vsel %vm1075_vm4, 1.0, %v10324_v61 }
 0x18b   : > { %v1590_v8 = vsel %vm1334_vm11, %v6563_v4, 0.0  ;;  %vm1084_vm9 = vcmp.lt.f32.partialorder %v10368_v35, %v10385_v12  ;;  %vm1340_vm10 = vcmp.eq.f32.partialorder %v10368_v35, %v10385_v12  ;;  %vm1083_vm13 = vcmp.lt.f32.partialorder %v10369_v49, %v10384_v13 }
 0x18c   : > { %2370 = vadd.xlane.f32.xlu0 %v2369_v31  ;;  %v1841_v31 = vsel %vm1073_vm7, 1.0, %v10324_v61  ;;  %vm1079_vm7 = vcmp.lt.f32.partialorder %v10369_v49, %v10380_v51  ;;  %v1846_v41 = vsel %vm1078_vm5, 1.0, %v1590_v8  ;;  %v1594_v51 = vsel %vm1338_vm8, %v6566_v6, 0.0 }
 0x18d   : > { %2373 = vadd.xlane.f32.xlu1 %v2372_v26  ;;  %v1586_v26 = vsel %vm1330_vm15, %v6550_v1, 0.0  ;;  %v2387_v54 = vadd.f32 %v1841_v31, %v1840_v11  ;;  %v1847_v11 = vsel %vm1079_vm7, 1.0, %v10324_v61  ;;  %v1592_v31 = vsel %vm1336_vm3, %v6487_v7, 0.0 }
 0x18e   : > { %v1842_v36 = vsel %vm1074_vm2, 1.0, %v1586_v26  ;;  %vm1342_vm15 = vcmp.eq.f32.partialorder %v10368_v35, %v10387_v45  ;;  %v7363_v26 = vpop.permute.xlu0 %609  ;;  %v1849_v38 = vsel %vm1081_vm6, 1.0, %v10324_v61  ;;  %v2396_v40 = vadd.f32 %v1847_v11, %v1846_v41 }
 0x18f   : > { %10388 = vst [vmem:[#allocation9_spill] sm:$0xff] %v7363_v26  ;;  %v2390_v8 = vadd.f32 %v1843_v39, %v1842_v36  ;;  %v1848_v26 = vsel %vm1080_vm12, 1.0, %v1592_v31  ;;  %v1851_v57 = vsel %vm1083_vm13, 1.0, %v10324_v61  ;;  %vm1086_vm2 = vcmp.lt.f32.partialorder %v10368_v35, %v10387_v45  ;;  %v10390_v36 = vld [vmem:[#allocation40_spill] sm:$0xff]  ;;  %v7403_v39 = vpop.permute.xlu1 %613 }
 0x190   : > { %2376 = vadd.xlane.f32.xlu0 %v2375_v42  ;;  %v1844_v42 = vsel %vm1076_vm14, 1.0, %v1588_v46  ;;  %vm1085_vm14 = vcmp.lt.f32.partialorder %v10369_v49, %v10385_v12  ;;  %v10389_v46 = vld [vmem:[#allocation37_spill] sm:$0xff]  ;;  %vm1087_vm4 = vcmp.lt.f32.partialorder %v10369_v49, %v10387_v45  ;;  %vm1346_vm6 = vcmp.eq.f32.partialorder %v10368_v35, %v10390_v36  ;;  %10391 = vst [vmem:[#allocation10_spill] sm:$0xff] %v7403_v39 }
 0x191   : > { %2379 = vadd.xlane.f32.xlu1 %v2378_v43  ;;  %v1845_v43 = vsel %vm1077_vm0, 1.0, %v10324_v61  ;;  %vm1082_vm0 = vcmp.lt.f32.partialorder %v10368_v35, %v10384_v13  ;;  %vm1344_vm1 = vcmp.eq.f32.partialorder %v10368_v35, %v10389_v46  ;;  %vm1088_vm11 = vcmp.lt.f32.partialorder %v10368_v35, %v10389_v46 }
 0x192   : > { %v2393_v16 = vadd.f32 %v1845_v43, %v1844_v42  ;;  %v1850_v21 = vsel %vm1082_vm0, 1.0, %v1594_v51  ;;  %vm1089_vm12 = vcmp.lt.f32.partialorder %v10369_v49, %v10389_v46  ;;  %v1600_v13 = vsel %vm1344_vm1, %v6536_v62, 0.0  ;;  %v10392_v42 = vld [vmem:[#allocation39_spill] sm:$0xff]  ;;  %v7420_v31 = vpop.permute.xlu0 %617  ;;  %v10395_v46 = vld [vmem:[#allocation42_spill] sm:$0xff] }
 0x193   : > { %vm1348_vm3 = vcmp.eq.f32.partialorder %v10368_v35, %v10392_v42  ;;  %v2399_v43 = vadd.f32 %v1849_v38, %v1848_v26  ;;  %v1853_v11 = vsel %vm1085_vm14, 1.0, %v10324_v61  ;;  %vm1091_vm5 = vcmp.lt.f32.partialorder %v10369_v49, %v10390_v36  ;;  %10393 = vst [vmem:[#allocation25_spill] sm:$0xff] %v7420_v31  ;;  %v10397_v31 = vld [vmem:[#allocation44_spill] sm:$0xff] }
 0x194   : > { %2382 = vadd.xlane.f32.xlu0 %v2381_v32  ;;  %v1596_v32 = vsel %vm1340_vm10, %v6492_v9, 0.0  ;;  %v2402_v51 = vadd.f32 %v1851_v57, %v1850_v21  ;;  %v1855_v38 = vsel %vm1087_vm4, 1.0, %v10324_v61  ;;  %vm1090_vm7 = vcmp.lt.f32.partialorder %v10368_v35, %v10390_v36 }
 0x195   : > { %2385 = vadd.xlane.f32.xlu1 %v2384_v14  ;;  %v1598_v14 = vsel %vm1342_vm15, %v6626_v60, 0.0  ;;  %v1852_v41 = vsel %vm1084_vm9, 1.0, %v1596_v32  ;;  %v1856_v12 = vsel %vm1088_vm11, 1.0, %v1600_v13  ;;  %v1857_v57 = vsel %vm1089_vm12, 1.0, %v10324_v61  ;;  %v10394_v32 = vld [vmem:[#allocation41_spill] sm:$0xff]  ;;  %v7458_v13 = vpop.permute.xlu1 %621 }
 0x196   : > { %v1602_v26 = vsel %vm1346_vm6, %v6634_v24, 0.0  ;;  %vm1092_vm8 = vcmp.lt.f32.partialorder %v10368_v35, %v10392_v42  ;;  %vm1093_vm9 = vcmp.lt.f32.partialorder %v10369_v49, %v10392_v42  ;;  %v2405_v45 = vadd.f32 %v1853_v11, %v1852_v41  ;;  %10396 = vst [vmem:[#allocation28_spill] sm:$0xff] %v7458_v13  ;;  %v7482_v36 = vpop.permute.xlu0 %625 }
 0x197   : > { %vm1352_vm10 = vcmp.eq.f32.partialorder %v10368_v35, %v10394_v32  ;;  %vm1350_vm13 = vcmp.eq.f32.partialorder %v10368_v35, %v10395_v46  ;;  %v2411_v41 = vadd.f32 %v1857_v57, %v1856_v12  ;;  %v1858_v11 = vsel %vm1090_vm7, 1.0, %v1602_v26  ;;  %10398 = vst [vmem:[#allocation29_spill] sm:$0xff] %v7482_v36 }
 0x198   : > { %2388 = vadd.xlane.f32.xlu0 %v2387_v54  ;;  %v1854_v54 = vsel %vm1086_vm2, 1.0, %v1598_v14  ;;  %v1859_v14 = vsel %vm1091_vm5, 1.0, %v10324_v61  ;;  %vm1354_vm14 = vcmp.eq.f32.partialorder %v10368_v35, %v10397_v31  ;;  %vm1355_vm0 = vcmp.eq.f32.partialorder %v10369_v49, %v10397_v31 }
 0x199   : > { %2391 = vadd.xlane.f32.xlu1 %v2390_v8  ;;  %v1604_v8 = vsel %vm1348_vm3, %v6539_v2, 0.0  ;;  %v2408_v21 = vadd.f32 %v1855_v38, %v1854_v54  ;;  %vm1096_vm15 = vcmp.lt.f32.partialorder %v10368_v35, %v10394_v32  ;;  %vm1097_vm1 = vcmp.lt.f32.partialorder %v10369_v49, %v10394_v32  ;;  %v7508_v36 = vpop.permute.xlu1 %629 }
 0x19a   : > { %vm1094_vm2 = vcmp.lt.f32.partialorder %v10368_v35, %v10395_v46  ;;  %vm1095_vm4 = vcmp.lt.f32.partialorder %v10369_v49, %v10395_v46  ;;  %v1606_v54 = vsel %vm1350_vm13, %v6650_v53, 0.0  ;;  %v1608_v38 = vsel %vm1352_vm10, %v6555_v10, 0.0  ;;  %10401 = vst [vmem:[#allocation30_spill] sm:$0xff] %v7508_v36 }
 0x19b   : > { %vm1098_vm11 = vcmp.lt.f32.partialorder %v10368_v35, %v10397_v31  ;;  %vm1099_vm12 = vcmp.lt.f32.partialorder %v10369_v49, %v10397_v31  ;;  %v1610_v42 = vsel %vm1354_vm14, 1.0, %v10324_v61  ;;  %v1611_v12 = vsel %vm1355_vm0, %v6654_v56, 0.0  ;;  %v10400_v31 = vld [vmem:[#allocation46_spill] sm:$0xff] }
 0x19c   : > { %2394 = vadd.xlane.f32.xlu0 %v2393_v16  ;;  %v1861_v16 = vsel %vm1093_vm9, 1.0, %v10324_v61  ;;  %v2414_v57 = vadd.f32 %v1859_v14, %v1858_v11  ;;  %v1864_v46 = vsel %vm1096_vm15, 1.0, %v1608_v38  ;;  %vm1358_vm5 = vcmp.eq.f32.partialorder %v10368_v35, %v10400_v31  ;;  %v7522_v38 = vpop.permute.xlu0 %633 }
 0x19d   : > { %2397 = vadd.xlane.f32.xlu1 %v2396_v40  ;;  %v1860_v40 = vsel %vm1092_vm8, 1.0, %v1604_v8  ;;  %v10399_v8 = vld [vmem:[#allocation43_spill] sm:$0xff]  ;;  %v1865_v14 = vsel %vm1097_vm1, 1.0, %v10324_v61  ;;  %v1866_v11 = vsel %vm1098_vm11, 1.0, %v1610_v42  ;;  %vm1359_vm7 = vcmp.eq.f32.partialorder %v10369_v49, %v10400_v31  ;;  %10402 = vst [vmem:[#allocation31_spill] sm:$0xff] %v7522_v38  ;;  %v10409_v38 = vld [vmem:[#allocation49_spill] sm:$0xff] }
 0x19e   : > { %v2417_v26 = vadd.f32 %v1861_v16, %v1860_v40  ;;  %vm1356_vm6 = vcmp.eq.f32.partialorder %v10368_v35, %v10399_v8  ;;  %vm1357_vm3 = vcmp.eq.f32.partialorder %v10369_v49, %v10399_v8  ;;  %v1867_v40 = vsel %vm1099_vm12, 1.0, %v1611_v12 }
 0x19f   : > { %vm1100_vm8 = vcmp.lt.f32.partialorder %v10368_v35, %v10399_v8  ;;  %vm1101_vm9 = vcmp.lt.f32.partialorder %v10369_v49, %v10399_v8  ;;  %v1612_v16 = vsel %vm1356_vm6, 1.0, %v10324_v61  ;;  %vm1102_vm10 = vcmp.lt.f32.partialorder %v10368_v35, %v10400_v31 }
 0x1a0   : > { %2400 = vadd.xlane.f32.xlu0 %v2399_v43  ;;  %v1862_v43 = vsel %vm1094_vm2, 1.0, %v1606_v54  ;;  %v1613_v54 = vsel %vm1357_vm3, %v6558_v20, 0.0  ;;  %v1614_v42 = vsel %vm1358_vm5, 1.0, %v10324_v61  ;;  %v2426_v12 = vadd.f32 %v1867_v40, %v1866_v11  ;;  %v10406_v11 = vld [vmem:[#allocation47_spill] sm:$0xff]  ;;  %v7556_v40 = vpop.permute.xlu0 %644 }
 0x1a1   : > { %2403 = vadd.xlane.f32.xlu1 %v2402_v51  ;;  %v1863_v51 = vsel %vm1095_vm4, 1.0, %v10324_v61  ;;  %vm1103_vm14 = vcmp.lt.f32.partialorder %v10369_v49, %v10400_v31  ;;  %v1615_v8 = vsel %vm1359_vm7, %v6665_v59, 0.0  ;;  %v1868_v36 = vsel %vm1100_vm8, 1.0, %v1612_v16  ;;  %v7541_v31 = vpop.permute.xlu1 %637  ;;  %10408 = vst [vmem:[#allocation34_spill] sm:$0xff] %v7556_v40 }
 0x1a2   : > { %v2420_v32 = vadd.f32 %v1863_v51, %v1862_v43  ;;  %v1869_v13 = vsel %vm1101_vm9, 1.0, %v1613_v54  ;;  %v1870_v43 = vsel %vm1102_vm10, 1.0, %v1614_v42  ;;  %10405 = vst [vmem:[#allocation32_spill] sm:$0xff] %v7541_v31  ;;  %vm1364_vm11 = vcmp.eq.f32.partialorder %v10368_v35, %v10406_v11 }
 0x1a3   : > { %vm1365_vm12 = vcmp.eq.f32.partialorder %v10369_v49, %v10406_v11  ;;  %vm1108_vm6 = vcmp.lt.f32.partialorder %v10368_v35, %v10406_v11  ;;  %vm1109_vm9 = vcmp.lt.f32.partialorder %v10369_v49, %v10406_v11  ;;  %v1620_v42 = vsel %vm1364_vm11, 1.0, %v10324_v61 }
 0x1a4   : > { %2406 = vadd.xlane.f32.xlu0 %v2405_v45  ;;  %v10403_v45 = vld [vmem:[#allocation45_spill] sm:$0xff]  ;;  %v7609_v11 = vpop.permute.xlu0 %652 }
 0x1a5   : > { %2409 = vadd.xlane.f32.xlu1 %v2408_v21  ;;  %vm1360_vm13 = vcmp.eq.f32.partialorder %v10368_v35, %v10403_v45  ;;  %v2423_v21 = vadd.f32 %v1865_v14, %v1864_v46  ;;  %vm1104_vm0 = vcmp.lt.f32.partialorder %v10368_v35, %v10403_v45  ;;  %vm1361_vm15 = vcmp.eq.f32.partialorder %v10369_v49, %v10403_v45  ;;  %v10404_v46 = vld [vmem:[#allocation48_spill] sm:$0xff]  ;;  %v7587_v37 = vpop.permute.xlu1 %648 }
 0x1a6   : > { %vm1105_vm1 = vcmp.lt.f32.partialorder %v10369_v49, %v10403_v45  ;;  %v1616_v51 = vsel %vm1360_vm13, 1.0, %v10324_v61  ;;  %vm1362_vm2 = vcmp.eq.f32.partialorder %v10368_v35, %v10404_v46  ;;  %v1871_v14 = vsel %vm1103_vm14, 1.0, %v1615_v8  ;;  %10411 = vst [vmem:[#allocation33_spill] sm:$0xff] %v7609_v11 }
 0x1a7   : > { %vm1363_vm4 = vcmp.eq.f32.partialorder %v10369_v49, %v10404_v46  ;;  %vm1106_vm7 = vcmp.lt.f32.partialorder %v10368_v35, %v10404_v46  ;;  %vm1107_vm8 = vcmp.lt.f32.partialorder %v10369_v49, %v10404_v46  ;;  %v1618_v16 = vsel %vm1362_vm2, 1.0, %v10324_v61 }
 0x1a8   : > { %2412 = vadd.xlane.f32.xlu0 %v2411_v41  ;;  %v1617_v41 = vsel %vm1361_vm15, %v10348_v47, 0.0  ;;  %v1619_v54 = vsel %vm1363_vm4, %v6668_v50, 0.0  ;;  %v1621_v8 = vsel %vm1365_vm12, %v10351_v44, 0.0  ;;  %vm1368_vm14 = vcmp.eq.f32.partialorder %v10368_v35, %v10409_v38 }
 0x1a9   : > { %2415 = vadd.xlane.f32.xlu1 %v2414_v57  ;;  %v10407_v57 = vld [vmem:[#allocation50_spill] sm:$0xff]  ;;  %v1874_v39 = vsel %vm1106_vm7, 1.0, %v1618_v16  ;;  %vm1369_vm15 = vcmp.eq.f32.partialorder %v10369_v49, %v10409_v38  ;;  %v1877_v45 = vsel %vm1109_vm9, 1.0, %v1621_v8  ;;  %v2432_v8 = vadd.f32 %v1871_v14, %v1870_v43 }
 0x1aa   : > { %vm1366_vm3 = vcmp.eq.f32.partialorder %v10368_v35, %v10407_v57  ;;  %vm1367_vm5 = vcmp.eq.f32.partialorder %v10369_v49, %v10407_v57  ;;  %vm1110_vm10 = vcmp.lt.f32.partialorder %v10368_v35, %v10407_v57  ;;  %vm1111_vm13 = vcmp.lt.f32.partialorder %v10369_v49, %v10407_v57 }
 0x1ab   : > { %v1622_v40 = vsel %vm1366_vm3, 1.0, %v10324_v61  ;;  %v1623_v31 = vsel %vm1367_vm5, %v6671_v33, 0.0  ;;  %v1875_v33 = vsel %vm1107_vm8, 1.0, %v1619_v54  ;;  %v1624_v54 = vsel %vm1368_vm14, 1.0, %v10324_v61 }
 0x1ac   : > { %2418 = vadd.xlane.f32.xlu0 %v2417_v26  ;;  %v1872_v26 = vsel %vm1104_vm0, 1.0, %v1616_v51  ;;  %v1876_v51 = vsel %vm1108_vm6, 1.0, %v1620_v42  ;;  %v1878_v16 = vsel %vm1110_vm10, 1.0, %v1622_v40  ;;  %v1879_v46 = vsel %vm1111_vm13, 1.0, %v1623_v31  ;;  %v7628_v40 = vpop.permute.xlu1 %656 }
 0x1ad   : > { %2421 = vadd.xlane.f32.xlu1 %v2420_v32  ;;  %v1873_v32 = vsel %vm1105_vm1, 1.0, %v1617_v41  ;;  %v10410_v41 = vld [vmem:[#allocation52_spill] sm:$0xff]  ;;  %vm1112_vm1 = vcmp.lt.f32.partialorder %v10368_v35, %v10409_v38  ;;  %v2429_v42 = vadd.f32 %v1869_v13, %v1868_v36  ;;  %vm1113_vm2 = vcmp.lt.f32.partialorder %v10369_v49, %v10409_v38  ;;  %v10412_v38 = vld [vmem:[#allocation51_spill] sm:$0xff]  ;;  %10413 = vst [vmem:[#allocation66_spill] sm:$0xff] %v7628_v40 }
 0x1ae   : > { %vm1370_vm0 = vcmp.eq.f32.partialorder %v10368_v35, %v10410_v41  ;;  %vm1114_vm4 = vcmp.lt.f32.partialorder %v10368_v35, %v10410_v41  ;;  %vm1371_vm11 = vcmp.eq.f32.partialorder %v10369_v49, %v10410_v41  ;;  %v2438_v57 = vadd.f32 %v1875_v33, %v1874_v39  ;;  %v10414_v39 = vld [vmem:[#allocation54_spill] sm:$0xff] }
 0x1af   : > { %v1626_v31 = vsel %vm1370_vm0, 1.0, %v10324_v61  ;;  %v2441_v13 = vadd.f32 %v1877_v45, %v1876_v51  ;;  %v2444_v36 = vadd.f32 %v1879_v46, %v1878_v16  ;;  %v1880_v43 = vsel %vm1112_vm1, 1.0, %v1624_v54  ;;  %v7643_v51 = vpop.permute.xlu0 %660  ;;  %v10417_v54 = vld [vmem:[#allocation57_spill] sm:$0xff] }
 0x1b0   : > { %2424 = vadd.xlane.f32.xlu0 %v2423_v21  ;;  %v1625_v21 = vsel %vm1369_vm15, %v6639_v63, 0.0  ;;  %vm1115_vm12 = vcmp.lt.f32.partialorder %v10369_v49, %v10410_v41  ;;  %vm1372_vm6 = vcmp.eq.f32.partialorder %v10368_v35, %v10412_v38  ;;  %vm1373_vm3 = vcmp.eq.f32.partialorder %v10369_v49, %v10412_v38  ;;  %10416 = vst [vmem:[#allocation36_spill] sm:$0xff] %v7643_v51  ;;  %v7674_v51 = vpop.permute.xlu1 %664 }
 0x1b1   : > { %2427 = vadd.xlane.f32.xlu1 %v2426_v12  ;;  %v2435_v12 = vadd.f32 %v1873_v32, %v1872_v26  ;;  %v1881_v14 = vsel %vm1113_vm2, 1.0, %v1625_v21  ;;  %v1627_v26 = vsel %vm1371_vm11, %v6681_v22, 0.0  ;;  %v1882_v33 = vsel %vm1114_vm4, 1.0, %v1626_v31  ;;  %v10415_v32 = vld [vmem:[#allocation53_spill] sm:$0xff]  ;;  %10418 = vst [vmem:[#allocation35_spill] sm:$0xff] %v7674_v51 }
 0x1b2   : > { %vm1116_vm5 = vcmp.lt.f32.partialorder %v10368_v35, %v10412_v38  ;;  %vm1374_vm7 = vcmp.eq.f32.partialorder %v10368_v35, %v10414_v39  ;;  %vm1117_vm8 = vcmp.lt.f32.partialorder %v10369_v49, %v10412_v38  ;;  %vm1375_vm9 = vcmp.eq.f32.partialorder %v10369_v49, %v10414_v39 }
 0x1b3   : > { %vm1376_vm10 = vcmp.eq.f32.partialorder %v10368_v35, %v10415_v32  ;;  %vm1377_vm13 = vcmp.eq.f32.partialorder %v10369_v49, %v10415_v32  ;;  %v1628_v45 = vsel %vm1372_vm6, 1.0, %v10324_v61  ;;  %v1629_v16 = vsel %vm1373_vm3, %v6647_v55, 0.0  ;;  %v7694_v11 = vpop.permute.xlu0 %668 }
 0x1b4   : > { %2430 = vadd.xlane.f32.xlu0 %v2429_v42  ;;  %vm1118_vm14 = vcmp.lt.f32.partialorder %v10368_v35, %v10414_v39  ;;  %vm1119_vm15 = vcmp.lt.f32.partialorder %v10369_v49, %v10414_v39  ;;  %v1630_v46 = vsel %vm1374_vm7, 1.0, %v10324_v61  ;;  %vm1120_vm0 = vcmp.lt.f32.partialorder %v10368_v35, %v10415_v32 }
 0x1b5   : > { %2433 = vadd.xlane.f32.xlu1 %v2432_v8  ;;  %vm1378_vm1 = vcmp.eq.f32.partialorder %v10368_v35, %v10417_v54  ;;  %vm1379_vm2 = vcmp.eq.f32.partialorder %v10369_v49, %v10417_v54  ;;  %v1631_v42 = vsel %vm1375_vm9, %v6684_v30, 0.0  ;;  %vm1121_vm4 = vcmp.lt.f32.partialorder %v10369_v49, %v10415_v32 }
 0x1b6   : > { %v1632_v8 = vsel %vm1376_vm10, 1.0, %v10324_v61  ;;  %v1633_v21 = vsel %vm1377_vm13, %v6657_v52, 0.0  ;;  %v1884_v31 = vsel %vm1116_vm5, 1.0, %v1628_v45  ;;  %vm1122_vm11 = vcmp.lt.f32.partialorder %v10368_v35, %v10417_v54 }
 0x1b7   : > { %vm1123_vm6 = vcmp.lt.f32.partialorder %v10369_v49, %v10417_v54  ;;  %v1634_v40 = vsel %vm1378_vm1, 1.0, %v10324_v61  ;;  %v1635_v41 = vsel %vm1379_vm2, %v6693_v17, 0.0  ;;  %v1886_v38 = vsel %vm1118_vm14, 1.0, %v1630_v46 }
 0x1b8   : > { %2436 = vadd.xlane.f32.xlu0 %v2435_v12  ;;  %v1883_v12 = vsel %vm1115_vm12, 1.0, %v1627_v26  ;;  %v10419_v26 = vld [vmem:[#allocation55_spill] sm:$0xff]  ;;  %v1887_v45 = vsel %vm1119_vm15, 1.0, %v1631_v42  ;;  %v1889_v51 = vsel %vm1121_vm4, 1.0, %v1633_v21  ;;  %v1890_v39 = vsel %vm1122_vm11, 1.0, %v1634_v40  ;;  %v7711_v40 = vpop.permute.xlu1 %672 }
 0x1b9   : > { %2439 = vadd.xlane.f32.xlu1 %v2438_v57  ;;  %v1885_v57 = vsel %vm1117_vm8, 1.0, %v1629_v16  ;;  %vm1380_vm12 = vcmp.eq.f32.partialorder %v10368_v35, %v10419_v26  ;;  %v1888_v16 = vsel %vm1120_vm0, 1.0, %v1632_v8  ;;  %vm1381_vm3 = vcmp.eq.f32.partialorder %v10369_v49, %v10419_v26  ;;  %10421 = vst [vmem:[#allocation38_spill] sm:$0xff] %v7711_v40 }
 0x1ba   : > { %v1891_v46 = vsel %vm1123_vm6, 1.0, %v1635_v41  ;;  %vm1124_vm5 = vcmp.lt.f32.partialorder %v10368_v35, %v10419_v26  ;;  %v1636_v42 = vsel %vm1380_vm12, 1.0, %v10324_v61  ;;  %v2453_v8 = vadd.f32 %v1885_v57, %v1884_v31  ;;  %v10424_v31 = vld [vmem:[#allocation12_spill] sm:$0xff]  ;;  %v10425_v57 = vld [vmem:[#allocation58_spill] sm:$0xff]  ;;  %v10426_v41 = vld [vmem:[#allocation61_spill] sm:$0xff] }
 0x1bb   : > { %v2456_v32 = vadd.f32 %v1887_v45, %v1886_v38  ;;  %v2459_v21 = vadd.f32 %v1889_v51, %v1888_v16  ;;  %vm1125_vm7 = vcmp.lt.f32.partialorder %v10369_v49, %v10419_v26  ;;  %v1892_v54 = vsel %vm1124_vm5, 1.0, %v1636_v42  ;;  %v10422_v51 = vld [vmem:[#allocation60_spill] sm:$0xff]  ;;  %v7727_v26 = vpop.permute.xlu0 %676 }
 0x1bc   : > { %2442 = vadd.xlane.f32.xlu0 %v2441_v13  ;;  %v2447_v13 = vadd.f32 %v1881_v14, %v1880_v43  ;;  %v1637_v43 = vsel %vm1381_vm3, %v6660_v48, 0.0  ;;  %v10420_v14 = vld [vmem:[#allocation59_spill] sm:$0xff]  ;;  %vm1133_vm15 = vcmp.lt.f32.partialorder %v10424_v31, %v10422_v51  ;;  %vm1384_vm0 = vcmp.eq.f32.partialorder %v10368_v35, %v10425_v57  ;;  %10427 = vst [vmem:[#allocation37_spill] sm:$0xff] %v7727_v26 }
 0x1bd   : > { %2445 = vadd.xlane.f32.xlu1 %v2444_v36  ;;  %v2450_v36 = vadd.f32 %v1883_v12, %v1882_v33  ;;  %vm1382_vm8 = vcmp.eq.f32.partialorder %v10368_v35, %v10420_v14  ;;  %vm1383_vm9 = vcmp.eq.f32.partialorder %v10369_v49, %v10420_v14  ;;  %v2462_v33 = vadd.f32 %v1891_v46, %v1890_v39  ;;  %v10423_v12 = vld [vmem:[#allocation11_spill] sm:$0xff] }
 0x1be   : > { %vm1126_vm10 = vcmp.lt.f32.partialorder %v10368_v35, %v10420_v14  ;;  %vm1127_vm13 = vcmp.lt.f32.partialorder %v10369_v49, %v10420_v14  ;;  %vm1132_vm14 = vcmp.lt.f32.partialorder %v10423_v12, %v10422_v51  ;;  %vm1385_vm1 = vcmp.eq.f32.partialorder %v10369_v49, %v10425_v57 }
 0x1bf   : > { %vm1386_vm2 = vcmp.eq.f32.partialorder %v10423_v12, %v10426_v41  ;;  %v1893_v38 = vsel %vm1125_vm7, 1.0, %v1637_v43  ;;  %v1638_v45 = vsel %vm1382_vm8, 1.0, %v10324_v61  ;;  %v1639_v16 = vsel %vm1383_vm9, %v6787_v3, 0.0  ;;  %v10429_v43 = vld [vmem:[#allocation63_spill] sm:$0xff] }
 0x1c0   : > { %2448 = vadd.xlane.f32.xlu0 %v2447_v13  ;;  %vm1388_vm4 = vcmp.eq.f32.partialorder %v10423_v12, %v10422_v51  ;;  %vm1130_vm11 = vcmp.lt.f32.partialorder %v10423_v12, %v10426_v41  ;;  %vm1131_vm6 = vcmp.lt.f32.partialorder %v10424_v31, %v10426_v41  ;;  %vm1128_vm12 = vcmp.lt.f32.partialorder %v10368_v35, %v10425_v57 }
 0x1c1   : > { %2451 = vadd.xlane.f32.xlu1 %v2450_v36  ;;  %vm1129_vm3 = vcmp.lt.f32.partialorder %v10369_v49, %v10425_v57  ;;  %v1640_v13 = vsel %vm1384_vm0, 1.0, %v10324_v61  ;;  %v1641_v36 = vsel %vm1385_vm1, %v6674_v18, 0.0  ;;  %v2465_v39 = vadd.f32 %v1893_v38, %v1892_v54  ;;  %v7761_v54 = vpop.permute.xlu1 %680  ;;  %v10433_v49 = vld [vmem:[#allocation67_spill] sm:$0xff] }
 0x1c2   : > { %v1894_v46 = vsel %vm1126_vm10, 1.0, %v1638_v45  ;;  %v1895_v42 = vsel %vm1127_vm13, 1.0, %v1639_v16  ;;  %vm1390_vm9 = vcmp.eq.f32.partialorder %v10423_v12, %v10429_v43  ;;  %10430 = vst [vmem:[#allocation40_spill] sm:$0xff] %v7761_v54  ;;  %vm1134_vm10 = vcmp.lt.f32.partialorder %v10423_v12, %v10429_v43  ;;  %v7773_v45 = vpop.permute.xlu0 %684 }
 0x1c3   : > { %vm1135_vm13 = vcmp.lt.f32.partialorder %v10424_v31, %v10429_v43  ;;  %v1896_v14 = vsel %vm1128_vm12, 1.0, %v1640_v13  ;;  %v1897_v38 = vsel %vm1129_vm3, 1.0, %v1641_v36  ;;  %10431 = vst [vmem:[#allocation39_spill] sm:$0xff] %v7773_v45  ;;  %v2468_v16 = vadd.f32 %v1895_v42, %v1894_v46  ;;  %v10438_v45 = vld [vmem:[#allocation72_spill] sm:$0xff] }
 0x1c4   : > { %2454 = vadd.xlane.f32.xlu0 %v2453_v8  ;;  %v1642_v8 = vsel %vm1386_vm2, %v6531_v5, 0.0  ;;  %v1644_v35 = vsel %vm1388_vm4, %v6545_v19, 0.0  ;;  %vm1394_vm2 = vcmp.eq.f32.partialorder %v10423_v12, %v10433_v49  ;;  %v1646_v57 = vsel %vm1390_vm9, %v6462_v15, 0.0 }
 0x1c5   : > { %2457 = vadd.xlane.f32.xlu1 %v2456_v32  ;;  %v10428_v32 = vld [vmem:[#allocation62_spill] sm:$0xff]  ;;  %v1898_v54 = vsel %vm1130_vm11, 1.0, %v1642_v8  ;;  %vm1138_vm4 = vcmp.lt.f32.partialorder %v10423_v12, %v10433_v49  ;;  %v2471_v41 = vadd.f32 %v1897_v38, %v1896_v14  ;;  %v1900_v46 = vsel %vm1132_vm14, 1.0, %v1644_v35  ;;  %v7813_v8 = vpop.permute.xlu1 %688  ;;  %v10435_v38 = vld [vmem:[#allocation68_spill] sm:$0xff] }
 0x1c6   : > { %vm1136_vm5 = vcmp.lt.f32.partialorder %v10423_v12, %v10428_v32  ;;  %vm1137_vm7 = vcmp.lt.f32.partialorder %v10424_v31, %v10428_v32  ;;  %vm1392_vm8 = vcmp.eq.f32.partialorder %v10423_v12, %v10428_v32  ;;  %v1901_v42 = vsel %vm1133_vm15, 1.0, %v10324_v61  ;;  %10434 = vst [vmem:[#allocation41_spill] sm:$0xff] %v7813_v8  ;;  %v7847_v35 = vpop.permute.xlu0 %692 }
 0x1c7   : > { %v1648_v13 = vsel %vm1392_vm8, %v6472_v23, 0.0  ;;  %v1902_v14 = vsel %vm1134_vm10, 1.0, %v1646_v57  ;;  %v1650_v51 = vsel %vm1394_vm2, %v6550_v1, 0.0  ;;  %vm1144_vm14 = vcmp.lt.f32.partialorder %v10423_v12, %v10435_v38  ;;  %10437 = vst [vmem:[#allocation42_spill] sm:$0xff] %v7847_v35 }
 0x1c8   : > { %2460 = vadd.xlane.f32.xlu0 %v2459_v21  ;;  %v1899_v21 = vsel %vm1131_vm6, 1.0, %v10324_v61  ;;  %vm1139_vm6 = vcmp.lt.f32.partialorder %v10424_v31, %v10433_v49  ;;  %vm1145_vm15 = vcmp.lt.f32.partialorder %v10424_v31, %v10435_v38  ;;  %v1904_v43 = vsel %vm1136_vm5, 1.0, %v1648_v13 }
 0x1c9   : > { %2463 = vadd.xlane.f32.xlu1 %v2462_v33  ;;  %v10432_v33 = vld [vmem:[#allocation65_spill] sm:$0xff]  ;;  %v2474_v36 = vadd.f32 %v1899_v21, %v1898_v54  ;;  %v1905_v54 = vsel %vm1137_vm7, 1.0, %v10324_v61  ;;  %vm1400_vm12 = vcmp.eq.f32.partialorder %v10423_v12, %v10435_v38  ;;  %v2477_v57 = vadd.f32 %v1901_v42, %v1900_v46 }
 0x1ca   : > { %vm1140_vm0 = vcmp.lt.f32.partialorder %v10423_v12, %v10432_v33  ;;  %vm1141_vm1 = vcmp.lt.f32.partialorder %v10424_v31, %v10432_v33  ;;  %vm1396_vm11 = vcmp.eq.f32.partialorder %v10423_v12, %v10432_v33  ;;  %v10436_v21 = vld [vmem:[#allocation69_spill] sm:$0xff]  ;;  %v1906_v13 = vsel %vm1138_vm4, 1.0, %v1650_v51  ;;  %v10440_v33 = vld [vmem:[#allocation74_spill] sm:$0xff] }
 0x1cb   : > { %vm1142_vm3 = vcmp.lt.f32.partialorder %v10423_v12, %v10436_v21  ;;  %vm1398_vm7 = vcmp.eq.f32.partialorder %v10423_v12, %v10436_v21  ;;  %vm1143_vm5 = vcmp.lt.f32.partialorder %v10424_v31, %v10436_v21  ;;  %v1907_v8 = vsel %vm1139_vm6, 1.0, %v10324_v61 }
 0x1cc   : > { %2466 = vadd.xlane.f32.xlu0 %v2465_v39  ;;  %v1903_v39 = vsel %vm1135_vm13, 1.0, %v10324_v61  ;;  %vm1402_vm8 = vcmp.eq.f32.partialorder %v10423_v12, %v10438_v45  ;;  %v2483_v35 = vadd.f32 %v1905_v54, %v1904_v43  ;;  %vm1147_vm10 = vcmp.lt.f32.partialorder %v10424_v31, %v10438_v45 }
 0x1cd   : > { %2469 = vadd.xlane.f32.xlu1 %v2468_v16  ;;  %v1652_v16 = vsel %vm1396_vm11, %v10383_v58, 0.0  ;;  %v2480_v32 = vadd.f32 %v1903_v39, %v1902_v14  ;;  %v1654_v49 = vsel %vm1398_vm7, %v6563_v4, 0.0  ;;  %v1656_v42 = vsel %vm1400_vm12, %v6487_v7, 0.0  ;;  %v7882_v14 = vpop.permute.xlu1 %696 }
 0x1ce   : > { %v1908_v46 = vsel %vm1140_vm0, 1.0, %v1652_v16  ;;  %10441 = vst [vmem:[#allocation44_spill] sm:$0xff] %v7882_v14  ;;  %v2486_v39 = vadd.f32 %v1907_v8, %v1906_v13  ;;  %vm1146_vm2 = vcmp.lt.f32.partialorder %v10423_v12, %v10438_v45  ;;  %v1911_v51 = vsel %vm1143_vm5, 1.0, %v10324_v61  ;;  %v7894_v16 = vpop.permute.xlu0 %700 }
 0x1cf   : > { %v1658_v43 = vsel %vm1402_vm8, %v6566_v6, 0.0  ;;  %10442 = vst [vmem:[#allocation43_spill] sm:$0xff] %v7894_v16  ;;  %v1910_v8 = vsel %vm1142_vm3, 1.0, %v1654_v49  ;;  %v1915_v13 = vsel %vm1147_vm10, 1.0, %v10324_v61  ;;  %vm1150_vm11 = vcmp.lt.f32.partialorder %v10423_v12, %v10440_v33  ;;  %v10444_v49 = vld [vmem:[#allocation76_spill] sm:$0xff] }
 0x1d0   : > { %2472 = vadd.xlane.f32.xlu0 %v2471_v41  ;;  %v1909_v41 = vsel %vm1141_vm1, 1.0, %v10324_v61  ;;  %vm1406_vm1 = vcmp.eq.f32.partialorder %v10423_v12, %v10440_v33  ;;  %vm1151_vm4 = vcmp.lt.f32.partialorder %v10424_v31, %v10440_v33  ;;  %vm1410_vm12 = vcmp.eq.f32.partialorder %v10423_v12, %v10444_v49 }
 0x1d1   : > { %2475 = vadd.xlane.f32.xlu1 %v2474_v36  ;;  %v10439_v36 = vld [vmem:[#allocation71_spill] sm:$0xff]  ;;  %v2489_v54 = vadd.f32 %v1909_v41, %v1908_v46  ;;  %v1662_v38 = vsel %vm1406_vm1, %v6626_v60, 0.0  ;;  %v1914_v41 = vsel %vm1146_vm2, 1.0, %v1658_v43  ;;  %v7933_v14 = vpop.permute.xlu1 %704  ;;  %vm1155_vm7 = vcmp.lt.f32.partialorder %v10424_v31, %v10444_v49 }
 0x1d2   : > { %vm1148_vm9 = vcmp.lt.f32.partialorder %v10423_v12, %v10439_v36  ;;  %vm1149_vm13 = vcmp.lt.f32.partialorder %v10424_v31, %v10439_v36  ;;  %vm1404_vm0 = vcmp.eq.f32.partialorder %v10423_v12, %v10439_v36  ;;  %v10443_v46 = vld [vmem:[#allocation75_spill] sm:$0xff]  ;;  %v2498_v43 = vadd.f32 %v1915_v13, %v1914_v41  ;;  %v10446_v13 = vld [vmem:[#allocation80_spill] sm:$0xff] }
 0x1d3   : > { %v1660_v21 = vsel %vm1404_vm0, %v6492_v9, 0.0  ;;  %vm1152_vm6 = vcmp.lt.f32.partialorder %v10423_v12, %v10443_v46  ;;  %v1917_v45 = vsel %vm1149_vm13, 1.0, %v10324_v61  ;;  %v1666_v33 = vsel %vm1410_vm12, %v6634_v24, 0.0 }
 0x1d4   : > { %2478 = vadd.xlane.f32.xlu0 %v2477_v57  ;;  %v1912_v57 = vsel %vm1144_vm14, 1.0, %v1656_v42  ;;  %vm1153_vm14 = vcmp.lt.f32.partialorder %v10424_v31, %v10443_v46  ;;  %v2492_v42 = vadd.f32 %v1911_v51, %v1910_v8  ;;  %v1916_v40 = vsel %vm1148_vm9, 1.0, %v1660_v21  ;;  %v10445_v51 = vld [vmem:[#allocation77_spill] sm:$0xff]  ;;  %v10447_v21 = vld [vmem:[#allocation79_spill] sm:$0xff] }
 0x1d5   : > { %2481 = vadd.xlane.f32.xlu1 %v2480_v32  ;;  %v1913_v32 = vsel %vm1145_vm15, 1.0, %v10324_v61  ;;  %vm1408_vm15 = vcmp.eq.f32.partialorder %v10423_v12, %v10443_v46  ;;  %vm1156_vm3 = vcmp.lt.f32.partialorder %v10423_v12, %v10445_v51  ;;  %vm1157_vm5 = vcmp.lt.f32.partialorder %v10424_v31, %v10445_v51 }
 0x1d6   : > { %v2495_v16 = vadd.f32 %v1913_v32, %v1912_v57  ;;  %v1664_v36 = vsel %vm1408_vm15, %v6536_v62, 0.0  ;;  %vm1412_vm8 = vcmp.eq.f32.partialorder %v10423_v12, %v10445_v51  ;;  %vm1154_vm9 = vcmp.lt.f32.partialorder %v10423_v12, %v10444_v49 }
 0x1d7   : > { %v2501_v8 = vadd.f32 %v1917_v45, %v1916_v40  ;;  %v1921_v32 = vsel %vm1153_vm14, 1.0, %v10324_v61  ;;  %vm1416_vm10 = vcmp.eq.f32.partialorder %v10423_v12, %v10446_v13  ;;  %vm1414_vm13 = vcmp.eq.f32.partialorder %v10423_v12, %v10447_v21 }
 0x1d8   : > { %2484 = vadd.xlane.f32.xlu0 %v2483_v35  ;;  %v1918_v35 = vsel %vm1150_vm11, 1.0, %v1662_v38  ;;  %v1920_v40 = vsel %vm1152_vm6, 1.0, %v1664_v36  ;;  %v1922_v45 = vsel %vm1154_vm9, 1.0, %v1666_v33  ;;  %vm1160_vm2 = vcmp.lt.f32.partialorder %v10423_v12, %v10446_v13 }
 0x1d9   : > { %2487 = vadd.xlane.f32.xlu1 %v2486_v39  ;;  %v7935_v26 = vpop.xlane.xlu0 %2283  ;;  %v1919_v39 = vsel %vm1151_vm4, 1.0, %v10324_v61  ;;  %vm1161_vm11 = vcmp.lt.f32.partialorder %v10424_v31, %v10446_v13  ;;  %vm1159_vm4 = vcmp.lt.f32.partialorder %v10424_v31, %v10447_v21  ;;  %v1925_v46 = vsel %vm1157_vm5, 1.0, %v10324_v61 }
 0x1da   : > { %v2504_v57 = vadd.f32 %v1919_v39, %v1918_v35  ;;  %v1668_v35 = vsel %vm1412_vm8, %v6539_v2, 0.0  ;;  %v10450_v39 = vld [vmem:[#allocation81_spill] sm:$0xff]  ;;  %vm1158_vm6 = vcmp.lt.f32.partialorder %v10423_v12, %v10447_v21  ;;  %v1670_v49 = vsel %vm1414_vm13, %v6650_v53, 0.0 }
 0x1db   : > { %vm1418_vm0 = vcmp.eq.f32.partialorder %v10423_v12, %v10450_v39  ;;  %vm1419_vm1 = vcmp.eq.f32.partialorder %v10424_v31, %v10450_v39  ;;  %v1672_v36 = vsel %vm1416_vm10, %v6555_v10, 0.0  ;;  %vm1162_vm14 = vcmp.lt.f32.partialorder %v10423_v12, %v10450_v39 }
 0x1dc   : > { %2490 = vadd.xlane.f32.xlu0 %v2489_v54  ;;  %v1923_v54 = vsel %vm1155_vm7, 1.0, %v10324_v61  ;;  %vm1163_vm15 = vcmp.lt.f32.partialorder %v10424_v31, %v10450_v39  ;;  %vm1420_vm12 = vcmp.eq.f32.partialorder %v10423_v12, %v6793_v28  ;;  %vm1421_vm7 = vcmp.eq.f32.partialorder %v10424_v31, %v6793_v28 }
 0x1dd   : > { %2493 = vadd.xlane.f32.xlu1 %v2492_v42  ;;  %v7977_v38 = vpop.xlane.xlu0 %2289  ;;  %v6083_v42 = vmov 0   ;;  %v1929_v51 = vsel %vm1161_vm11, 1.0, %v10324_v61  ;;  %vm1164_vm5 = vcmp.lt.f32.partialorder %v10423_v12, %v6793_v28  ;;  %v2510_v13 = vadd.f32 %v1923_v54, %v1922_v45 }
 0x1de   : > { %10448 = vst [vmem:[#allocation46_spill] sm:$0xff] %v7977_v38  ;;  %v7979_v41 = vpop.xlane.xlu1 %2286  ;;  %5967 = vset.pattern.permute.xlu1 %v6083_v42  ;;  %5968 = vset.pattern.permute.xlu0 %v6083_v42  ;;  %v1924_v38 = vsel %vm1156_vm3, 1.0, %v1668_v35  ;;  %vm1422_vm3 = vcmp.eq.f32.partialorder %v10423_v12, %v6809_v0  ;;  %v1676_v35 = vsel %vm1420_vm12, 1.0, %v10324_v61  ;;  %vm1165_vm8 = vcmp.lt.f32.partialorder %v10424_v31, %v6793_v28 }
 0x1df   : > { %10449 = vst [vmem:[#allocation45_spill] sm:$0xff] %v7979_v41  ;;  %v2507_v41 = vadd.f32 %v1921_v32, %v1920_v40  ;;  %v1928_v32 = vsel %vm1160_vm2, 1.0, %v1672_v36  ;;  %vm1423_vm9 = vcmp.eq.f32.partialorder %v10424_v31, %v6809_v0  ;;  %vm1166_vm10 = vcmp.lt.f32.partialorder %v10423_v12, %v6809_v0 }
 0x1e0   : > { %2496 = vadd.xlane.f32.xlu0 %v2495_v16  ;;  %v1674_v16 = vsel %vm1418_vm0, 1.0, %v10324_v61  ;;  %v1678_v39 = vsel %vm1422_vm3, 1.0, %v10324_v61  ;;  %vm1424_vm13 = vcmp.eq.f32.partialorder %v10423_v12, %v6844_v27  ;;  %v1932_v45 = vsel %vm1164_vm5, 1.0, %v1676_v35 }
 0x1e1   : > { %2499 = vadd.xlane.f32.xlu1 %v2498_v43  ;;  %v8021_v33 = vpop.xlane.xlu0 %2292  ;;  %v1675_v43 = vsel %vm1419_vm1, %v6654_v56, 0.0  ;;  %v1930_v40 = vsel %vm1162_vm14, 1.0, %v1674_v16  ;;  %vm1167_vm0 = vcmp.lt.f32.partialorder %v10424_v31, %v6809_v0  ;;  %vm1168_vm1 = vcmp.lt.f32.partialorder %v10423_v12, %v6844_v27 }
 0x1e2   : > { %10451 = vst [vmem:[#allocation48_spill] sm:$0xff] %v8021_v33  ;;  %v8023_v42 = vpop.xlane.xlu1 %2295  ;;  %v1926_v33 = vsel %vm1158_vm6, 1.0, %v1670_v49  ;;  %v1931_v21 = vsel %vm1163_vm15, 1.0, %v1675_v43  ;;  %v2519_v43 = vadd.f32 %v1929_v51, %v1928_v32  ;;  %vm1169_vm2 = vcmp.lt.f32.partialorder %v10424_v31, %v6844_v27 }
 0x1e3   : > { %10452 = vst [vmem:[#allocation47_spill] sm:$0xff] %v8023_v42  ;;  %v1927_v42 = vsel %vm1159_vm4, 1.0, %v10324_v61  ;;  %v2522_v54 = vadd.f32 %v1931_v21, %v1930_v40  ;;  %vm1425_vm11 = vcmp.eq.f32.partialorder %v10424_v31, %v6844_v27  ;;  %v1680_v0 = vsel %vm1424_vm13, 1.0, %v10324_v61 }
 0x1e4   : > { %2502 = vadd.xlane.f32.xlu0 %v2501_v8  ;;  %v1677_v8 = vsel %vm1421_vm7, %v6558_v20, 0.0  ;;  %v2516_v16 = vadd.f32 %v1927_v42, %v1926_v33  ;;  %vm1426_vm4 = vcmp.eq.f32.partialorder %v10423_v12, %v6877_v34  ;;  %vm1427_vm6 = vcmp.eq.f32.partialorder %v10424_v31, %v6877_v34 }
 0x1e5   : > { %2505 = vadd.xlane.f32.xlu1 %v2504_v57  ;;  %v8058_v49 = vpop.xlane.xlu0 %2298  ;;  %v2513_v57 = vadd.f32 %v1925_v46, %v1924_v38  ;;  %v1933_v28 = vsel %vm1165_vm8, 1.0, %v1677_v8  ;;  %v1679_v38 = vsel %vm1423_vm9, %v6665_v59, 0.0  ;;  %vm1428_vm14 = vcmp.eq.f32.partialorder %v10423_v12, %v6907_v25  ;;  %v10458_v8 = vld [vmem:[#allocation78_spill] sm:$0xff] }
 0x1e6   : > { %10453 = vst [vmem:[#allocation50_spill] sm:$0xff] %v8058_v49  ;;  %v8060_v36 = vpop.xlane.xlu1 %2301  ;;  %v1934_v49 = vsel %vm1166_vm10, 1.0, %v1678_v39  ;;  %vm1429_vm15 = vcmp.eq.f32.partialorder %v10424_v31, %v6907_v25  ;;  %vm1172_vm12 = vcmp.lt.f32.partialorder %v10423_v12, %v6907_v25  ;;  %vm1430_vm7 = vcmp.eq.f32.partialorder %v10423_v12, %v6921_v29 }
 0x1e7   : > { %10454 = vst [vmem:[#allocation49_spill] sm:$0xff] %v8060_v36  ;;  %vm1431_vm3 = vcmp.eq.f32.partialorder %v10424_v31, %v6921_v29  ;;  %v1681_v33 = vsel %vm1425_vm11, %v10348_v47, 0.0  ;;  %vm1170_vm5 = vcmp.lt.f32.partialorder %v10423_v12, %v6877_v34  ;;  %vm1171_vm8 = vcmp.lt.f32.partialorder %v10424_v31, %v6877_v34 }
 0x1e8   : > { %2508 = vadd.xlane.f32.xlu0 %v2507_v41  ;;  %v1935_v41 = vsel %vm1167_vm0, 1.0, %v1679_v38  ;;  %vm1173_vm9 = vcmp.lt.f32.partialorder %v10424_v31, %v6907_v25  ;;  %v1682_v51 = vsel %vm1426_vm4, 1.0, %v10324_v61  ;;  %v1683_v40 = vsel %vm1427_vm6, %v6668_v50, 0.0  ;;  %v10459_v38 = vld [vmem:[#allocation82_spill] sm:$0xff] }
 0x1e9   : > { %2511 = vadd.xlane.f32.xlu1 %v2510_v13  ;;  %v8077_v46 = vpop.xlane.xlu0 %2304  ;;  %v1684_v21 = vsel %vm1428_vm14, 1.0, %v10324_v61  ;;  %v1685_v35 = vsel %vm1429_vm15, %v10351_v44, 0.0  ;;  %vm1174_vm10 = vcmp.lt.f32.partialorder %v10423_v12, %v6921_v29  ;;  %vm1175_vm13 = vcmp.lt.f32.partialorder %v10424_v31, %v6921_v29 }
 0x1ea   : > { %10455 = vst [vmem:[#allocation52_spill] sm:$0xff] %v8077_v46  ;;  %v8079_v36 = vpop.xlane.xlu1 %2307  ;;  %v1686_v13 = vsel %vm1430_vm7, 1.0, %v10324_v61  ;;  %v1936_v39 = vsel %vm1168_vm1, 1.0, %v1680_v0  ;;  %vm1432_vm0 = vcmp.eq.f32.partialorder %v10423_v12, %v10459_v38  ;;  %v1940_v0 = vsel %vm1172_vm12, 1.0, %v1684_v21 }
 0x1eb   : > { %10456 = vst [vmem:[#allocation51_spill] sm:$0xff] %v8079_v36  ;;  %v1939_v36 = vsel %vm1171_vm8, 1.0, %v1683_v40  ;;  %v1941_v27 = vsel %vm1173_vm9, 1.0, %v1685_v35  ;;  %v2528_v46 = vadd.f32 %v1935_v41, %v1934_v49  ;;  %vm1176_vm1 = vcmp.lt.f32.partialorder %v10423_v12, %v10459_v38  ;;  %v10462_v41 = vld [vmem:[#allocation84_spill] sm:$0xff] }
 0x1ec   : > { %2514 = vadd.xlane.f32.xlu0 %v2513_v57  ;;  %v1687_v57 = vsel %vm1431_vm3, %v10458_v8, 0.0  ;;  %v1688_v25 = vsel %vm1432_vm0, 1.0, %v10324_v61  ;;  %vm1177_vm11 = vcmp.lt.f32.partialorder %v10424_v31, %v10459_v38  ;;  %vm1436_vm14 = vcmp.eq.f32.partialorder %v10423_v12, %v10462_v41 }
 0x1ed   : > { %2517 = vadd.xlane.f32.xlu1 %v2516_v16  ;;  %v8110_v42 = vpop.xlane.xlu0 %2310  ;;  %v1937_v16 = vsel %vm1169_vm2, 1.0, %v1681_v33  ;;  %v1943_v34 = vsel %vm1175_vm13, 1.0, %v1687_v57  ;;  %vm1433_vm2 = vcmp.eq.f32.partialorder %v10424_v31, %v10459_v38  ;;  %vm1437_vm7 = vcmp.eq.f32.partialorder %v10424_v31, %v10462_v41 }
 0x1ee   : > { %10457 = vst [vmem:[#allocation54_spill] sm:$0xff] %v8110_v42  ;;  %v8112_v32 = vpop.xlane.xlu1 %2313  ;;  %v1938_v42 = vsel %vm1170_vm5, 1.0, %v1682_v51  ;;  %v1942_v51 = vsel %vm1174_vm10, 1.0, %v1686_v13  ;;  %v2531_v40 = vadd.f32 %v1937_v16, %v1936_v39  ;;  %v10464_v13 = vld [vmem:[#allocation16_spill] sm:$0xff]  ;;  %vm1180_vm8 = vcmp.lt.f32.partialorder %v10423_v12, %v10462_v41 }
 0x1ef   : > { %v2534_v49 = vadd.f32 %v1939_v36, %v1938_v42  ;;  %v2540_v29 = vadd.f32 %v1943_v34, %v1942_v51  ;;  %v1689_v36 = vsel %vm1433_vm2, %v6639_v63, 0.0  ;;  %v1944_v42 = vsel %vm1176_vm1, 1.0, %v1688_v25 }
 0x1f0   : > { %2520 = vadd.xlane.f32.xlu0 %v2519_v43  ;;  %vm1438_vm3 = vcmp.eq.f32.partialorder %v10423_v12, %v10464_v13  ;;  %vm1439_vm5 = vcmp.eq.f32.partialorder %v10424_v31, %v10464_v13  ;;  %vm1181_vm9 = vcmp.lt.f32.partialorder %v10424_v31, %v10462_v41  ;;  %v1692_v39 = vsel %vm1436_vm14, 1.0, %v10324_v61 }
 0x1f1   : > { %2523 = vadd.xlane.f32.xlu1 %v2522_v54  ;;  %v8162_v33 = vpop.xlane.xlu0 %2316  ;;  %v2525_v54 = vadd.f32 %v1933_v28, %v1932_v45  ;;  %v2537_v45 = vadd.f32 %v1941_v27, %v1940_v0  ;;  %v10461_v28 = vld [vmem:[#allocation83_spill] sm:$0xff]  ;;  %v1945_v16 = vsel %vm1177_vm11, 1.0, %v1689_v36  ;;  %vm1182_vm10 = vcmp.lt.f32.partialorder %v10423_v12, %v10464_v13  ;;  %v10465_v0 = vld [vmem:[#allocation70_spill] sm:$0xff] }
 0x1f2   : > { %10460 = vst [vmem:[#allocation53_spill] sm:$0xff] %v8162_v33  ;;  %v8164_v43 = vpop.xlane.xlu1 %2319  ;;  %vm1434_vm4 = vcmp.eq.f32.partialorder %v10423_v12, %v10461_v28  ;;  %vm1435_vm6 = vcmp.eq.f32.partialorder %v10424_v31, %v10461_v28  ;;  %vm1178_vm15 = vcmp.lt.f32.partialorder %v10423_v12, %v10461_v28  ;;  %vm1179_vm12 = vcmp.lt.f32.partialorder %v10424_v31, %v10461_v28 }
 0x1f3   : > { %v1691_v57 = vsel %vm1435_vm6, %v6681_v22, 0.0  ;;  %vm1440_vm13 = vcmp.eq.f32.partialorder %v10423_v12, %v10465_v0  ;;  %vm1441_vm0 = vcmp.eq.f32.partialorder %v10424_v31, %v10465_v0  ;;  %v1693_v51 = vsel %vm1437_vm7, %v6647_v55, 0.0 }
 0x1f4   : > { %2526 = vadd.xlane.f32.xlu0 %v2525_v54  ;;  %vm1183_vm1 = vcmp.lt.f32.partialorder %v10424_v31, %v10464_v13  ;;  %v1694_v38 = vsel %vm1438_vm3, 1.0, %v10324_v61  ;;  %v1695_v34 = vsel %vm1439_vm5, %v6684_v30, 0.0  ;;  %v1947_v25 = vsel %vm1179_vm12, 1.0, %v1691_v57 }
 0x1f5   : > { %2529 = vadd.xlane.f32.xlu1 %v2528_v46  ;;  %v8188_v21 = vpop.xlane.xlu0 %2322  ;;  %v1690_v46 = vsel %vm1434_vm4, 1.0, %v10324_v61  ;;  %vm1184_vm2 = vcmp.lt.f32.partialorder %v10423_v12, %v10465_v0  ;;  %vm1185_vm11 = vcmp.lt.f32.partialorder %v10424_v31, %v10465_v0  ;;  %v1696_v36 = vsel %vm1440_vm13, 1.0, %v10324_v61 }
 0x1f6   : > { %10463 = vst [vmem:[#allocation57_spill] sm:$0xff] %v8188_v21  ;;  %v8190_v35 = vpop.xlane.xlu1 %2325  ;;  %v10468_v21 = vld [vmem:[#allocation15_spill] sm:$0xff]  ;;  %v1949_v28 = vsel %vm1181_vm9, 1.0, %v1693_v51  ;;  %v1951_v57 = vsel %vm1183_vm1, 1.0, %v1695_v34  ;;  %v2543_v33 = vadd.f32 %v1945_v16, %v1944_v42  ;;  %v10470_v34 = vld [vmem:[#allocation18_spill] sm:$0xff]  ;;  %v10471_v42 = vld [vmem:[#allocation73_spill] sm:$0xff] }
 0x1f7   : > { %vm1442_vm4 = vcmp.eq.f32.partialorder %v10423_v12, %v10468_v21  ;;  %vm1443_vm6 = vcmp.eq.f32.partialorder %v10424_v31, %v10468_v21  ;;  %vm1186_vm14 = vcmp.lt.f32.partialorder %v10423_v12, %v10468_v21  ;;  %vm1444_vm12 = vcmp.eq.f32.partialorder %v10423_v12, %v10470_v34 }
 0x1f8   : > { %2532 = vadd.xlane.f32.xlu0 %v2531_v40  ;;  %v1946_v40 = vsel %vm1178_vm15, 1.0, %v1690_v46  ;;  %v1950_v46 = vsel %vm1182_vm10, 1.0, %v1694_v38  ;;  %v1698_v41 = vsel %vm1442_vm4, 1.0, %v10324_v61  ;;  %vm1187_vm15 = vcmp.lt.f32.partialorder %v10424_v31, %v10468_v21  ;;  %v10475_v21 = vld [vmem:[#allocation14_spill] sm:$0xff] }
 0x1f9   : > { %2535 = vadd.xlane.f32.xlu1 %v2534_v49  ;;  %v8219_v27 = vpop.xlane.xlu0 %2328  ;;  %v1948_v49 = vsel %vm1180_vm8, 1.0, %v1692_v39  ;;  %v2552_v13 = vadd.f32 %v1951_v57, %v1950_v46  ;;  %v1699_v38 = vsel %vm1443_vm6, %v6693_v17, 0.0  ;;  %vm1445_vm7 = vcmp.eq.f32.partialorder %v10424_v31, %v10470_v34 }
 0x1fa   : > { %10466 = vst [vmem:[#allocation55_spill] sm:$0xff] %v8219_v27  ;;  %v8221_v54 = vpop.xlane.xlu1 %2331  ;;  %v1697_v27 = vsel %vm1441_vm0, %v6657_v52, 0.0  ;;  %v2549_v51 = vadd.f32 %v1949_v28, %v1948_v49  ;;  %vm1446_vm3 = vcmp.eq.f32.partialorder %v10423_v12, %v10471_v42  ;;  %vm1188_vm5 = vcmp.lt.f32.partialorder %v10423_v12, %v10470_v34 }
 0x1fb   : > { %10467 = vst [vmem:[#allocation59_spill] sm:$0xff] %v8221_v54  ;;  %v2546_v54 = vadd.f32 %v1947_v25, %v1946_v40  ;;  %v1954_v25 = vsel %vm1186_vm14, 1.0, %v1698_v41  ;;  %vm1447_vm8 = vcmp.eq.f32.partialorder %v10424_v31, %v10471_v42  ;;  %v1955_v49 = vsel %vm1187_vm15, 1.0, %v1699_v38 }
 0x1fc   : > { %2538 = vadd.xlane.f32.xlu0 %v2537_v45  ;;  %v1952_v45 = vsel %vm1184_vm2, 1.0, %v1696_v36  ;;  %vm1189_vm13 = vcmp.lt.f32.partialorder %v10424_v31, %v10470_v34  ;;  %v1700_v36 = vsel %vm1444_vm12, 1.0, %v10324_v61  ;;  %v1701_v28 = vsel %vm1445_vm7, %v6660_v48, 0.0  ;;  %v10482_v34 = vld [vmem:[#allocation22_spill] sm:$0xff] }
 0x1fd   : > { %2541 = vadd.xlane.f32.xlu1 %v2540_v29  ;;  %v8259_v39 = vpop.xlane.xlu0 %2334  ;;  %v1953_v29 = vsel %vm1185_vm11, 1.0, %v1697_v27  ;;  %vm1190_vm1 = vcmp.lt.f32.partialorder %v10423_v12, %v10471_v42  ;;  %v1702_v46 = vsel %vm1446_vm3, 1.0, %v10324_v61  ;;  %vm1191_vm2 = vcmp.lt.f32.partialorder %v10424_v31, %v10471_v42 }
 0x1fe   : > { %10469 = vst [vmem:[#allocation60_spill] sm:$0xff] %v8259_v39  ;;  %v8261_v0 = vpop.xlane.xlu1 %2337  ;;  %v2555_v40 = vadd.f32 %v1953_v29, %v1952_v45  ;;  %v1703_v57 = vsel %vm1447_vm8, %v6787_v3, 0.0  ;;  %v10477_v45 = vld [vmem:[#allocation17_spill] sm:$0xff]  ;;  %v10478_v29 = vld [vmem:[#allocation20_spill] sm:$0xff]  ;;  %v1956_v38 = vsel %vm1188_vm5, 1.0, %v1700_v36  ;;  %v1958_v39 = vsel %vm1190_vm1, 1.0, %v1702_v46 }
 0x1ff   : > { %vm1448_vm11 = vcmp.eq.f32.partialorder %v10423_v12, %v10477_v45  ;;  %vm1449_vm4 = vcmp.eq.f32.partialorder %v10424_v31, %v10477_v45  ;;  %vm1195_vm14 = vcmp.lt.f32.partialorder %v10475_v21, %v10478_v29  ;;  %vm1192_vm12 = vcmp.lt.f32.partialorder %v10423_v12, %v10477_v45  ;;  %v10481_v36 = vld [vmem:[#allocation21_spill] sm:$0xff] }
 0x200   : > { %2544 = vadd.xlane.f32.xlu0 %v2543_v33  ;;  %v10474_v33 = vld [vmem:[#allocation19_spill] sm:$0xff]  ;;  %vm1193_vm7 = vcmp.lt.f32.partialorder %v10424_v31, %v10477_v45  ;;  %vm1201_vm5 = vcmp.lt.f32.partialorder %v10475_v21, %v10481_v36  ;;  %v10484_v31 = vld [vmem:[#allocation24_spill] sm:$0xff] }
 0x201   : > { %2547 = vadd.xlane.f32.xlu1 %v2546_v54  ;;  %v8275_v16 = vpop.xlane.xlu0 %2340  ;;  %vm1197_vm9 = vcmp.lt.f32.partialorder %v10475_v21, %v10474_v33  ;;  %v10476_v54 = vld [vmem:[#allocation13_spill] sm:$0xff] }
 0x202   : > { %10472 = vst [vmem:[#allocation11_spill] sm:$0xff] %v8275_v16  ;;  %v8277_v27 = vpop.xlane.xlu1 %2343  ;;  %vm1452_vm10 = vcmp.eq.f32.partialorder %v10476_v54, %v10474_v33  ;;  %vm1196_vm0 = vcmp.lt.f32.partialorder %v10476_v54, %v10474_v33  ;;  %vm1194_vm6 = vcmp.lt.f32.partialorder %v10476_v54, %v10478_v29  ;;  %vm1450_vm15 = vcmp.eq.f32.partialorder %v10476_v54, %v10478_v29  ;;  %v10485_v29 = vld [vmem:[#allocation27_spill] sm:$0xff] }
 0x203   : > { %10473 = vst [vmem:[#allocation12_spill] sm:$0xff] %v8277_v27  ;;  %v1957_v16 = vsel %vm1189_vm13, 1.0, %v1701_v28  ;;  %v1959_v27 = vsel %vm1191_vm2, 1.0, %v1703_v57  ;;  %vm1200_vm3 = vcmp.lt.f32.partialorder %v10476_v54, %v10481_v36  ;;  %vm1454_vm8 = vcmp.eq.f32.partialorder %v10476_v54, %v10482_v34  ;;  %v10483_v57 = vld [vmem:[#allocation23_spill] sm:$0xff] }
 0x204   : > { %2550 = vadd.xlane.f32.xlu0 %v2549_v51  ;;  %v1706_v42 = vsel %vm1450_vm15, %v6531_v5, 0.0  ;;  %vm1456_vm13 = vcmp.eq.f32.partialorder %v10476_v54, %v10481_v36  ;;  %vm1198_vm1 = vcmp.lt.f32.partialorder %v10476_v54, %v10482_v34  ;;  %vm1199_vm2 = vcmp.lt.f32.partialorder %v10475_v21, %v10482_v34 }
 0x205   : > { %2553 = vadd.xlane.f32.xlu1 %v2552_v13  ;;  %v8309_v41 = vpop.xlane.xlu0 %2346  ;;  %v2558_v13 = vadd.f32 %v1955_v49, %v1954_v25  ;;  %v1704_v25 = vsel %vm1448_vm11, 1.0, %v10324_v61  ;;  %v1705_v49 = vsel %vm1449_vm4, %v6674_v18, 0.0  ;;  %vm1204_vm11 = vcmp.lt.f32.partialorder %v10476_v54, %v10483_v57 }
 0x206   : > { %10479 = vst [vmem:[#allocation58_spill] sm:$0xff] %v8309_v41  ;;  %v8311_v51 = vpop.xlane.xlu1 %2349  ;;  %v1960_v5 = vsel %vm1192_vm12, 1.0, %v1704_v25  ;;  %v1961_v41 = vsel %vm1193_vm7, 1.0, %v1705_v49  ;;  %v1710_v12 = vsel %vm1454_vm8, %v6462_v15, 0.0  ;;  %vm1205_vm4 = vcmp.lt.f32.partialorder %v10475_v21, %v10483_v57 }
 0x207   : > { %10480 = vst [vmem:[#allocation61_spill] sm:$0xff] %v8311_v51  ;;  %v1962_v51 = vsel %vm1194_vm6, 1.0, %v1706_v42  ;;  %vm1460_vm6 = vcmp.eq.f32.partialorder %v10476_v54, %v10483_v57  ;;  %vm1458_vm15 = vcmp.eq.f32.partialorder %v10476_v54, %v10484_v31  ;;  %v1965_v45 = vsel %vm1197_vm9, 1.0, %v10324_v61  ;;  %v10486_v42 = vld [vmem:[#allocation26_spill] sm:$0xff] }
 0x208   : > { %2556 = vadd.xlane.f32.xlu0 %v2555_v40  ;;  %v2561_v40 = vadd.f32 %v1957_v16, %v1956_v38  ;;  %v1963_v16 = vsel %vm1195_vm14, 1.0, %v10324_v61  ;;  %vm1202_vm14 = vcmp.lt.f32.partialorder %v10476_v54, %v10484_v31  ;;  %vm1208_vm12 = vcmp.lt.f32.partialorder %v10476_v54, %v10485_v29 }
 0x209   : > { %2559 = vadd.xlane.f32.xlu1 %v2558_v13  ;;  %v8344_v28 = vpop.xlane.xlu0 %2352  ;;  %v2564_v13 = vadd.f32 %v1959_v27, %v1958_v39  ;;  %v1708_v39 = vsel %vm1452_vm10, %v6545_v19, 0.0  ;;  %vm1203_vm10 = vcmp.lt.f32.partialorder %v10475_v21, %v10484_v31  ;;  %v2567_v27 = vadd.f32 %v1961_v41, %v1960_v5 }
 0x20a   : > { %v8346_v46 = vpop.xlane.xlu1 %2355  ;;  %v2570_v38 = vadd.f32 %v1963_v16, %v1962_v51  ;;  %v1964_v25 = vsel %vm1196_vm0, 1.0, %v1708_v39  ;;  %v1966_v49 = vsel %vm1198_vm1, 1.0, %v1710_v12  ;;  %v1967_v41 = vsel %vm1199_vm2, 1.0, %v10324_v61 }
 0x20b   : > { %vm1209_vm9 = vcmp.lt.f32.partialorder %v10475_v21, %v10485_v29  ;;  %vm1462_vm7 = vcmp.eq.f32.partialorder %v10476_v54, %v10486_v42  ;;  %v1712_v33 = vsel %vm1456_vm13, %v6472_v23, 0.0  ;;  %v1714_v51 = vsel %vm1458_vm15, %v6550_v1, 0.0 }
 0x20c   : > { %2562 = vadd.xlane.f32.xlu0 %v2561_v40  ;;  %vm1464_vm0 = vcmp.eq.f32.partialorder %v10476_v54, %v10485_v29  ;;  %vm1206_vm8 = vcmp.lt.f32.partialorder %v10476_v54, %v10486_v42  ;;  %vm1207_vm1 = vcmp.lt.f32.partialorder %v10475_v21, %v10486_v42  ;;  %v2573_v23 = vadd.f32 %v1965_v45, %v1964_v25  ;;  %v10487_v45 = vld [vmem:[#allocation10_spill] sm:$0xff]  ;;  %v10490_v42 = vld [vmem:[#allocation25_spill] sm:$0xff] }
 0x20d   : > { %2565 = vadd.xlane.f32.xlu1 %v2564_v13  ;;  %v8381_v19 = vpop.xlane.xlu0 %2358  ;;  %v2576_v13 = vadd.f32 %v1967_v41, %v1966_v49  ;;  %v1969_v1 = vsel %vm1201_vm5, 1.0, %v10324_v61  ;;  %v1716_v5 = vsel %vm1460_vm6, %v10383_v58, 0.0  ;;  %v1968_v16 = vsel %vm1200_vm3, 1.0, %v1712_v33  ;;  %v10488_v58 = vld [vmem:[#allocation9_spill] sm:$0xff] }
 0x20e   : > { %v8383_v15 = vpop.xlane.xlu1 %2361  ;;  %v1970_v39 = vsel %vm1202_vm14, 1.0, %v1714_v51  ;;  %v1971_v12 = vsel %vm1203_vm10, 1.0, %v10324_v61  ;;  %vm1212_vm5 = vcmp.lt.f32.partialorder %v10476_v54, %v10487_v45  ;;  %vm1213_vm3 = vcmp.lt.f32.partialorder %v10475_v21, %v10487_v45  ;;  %v10489_v51 = vld [vmem:[#allocation28_spill] sm:$0xff] }
 0x20f   : > { %vm1468_vm13 = vcmp.eq.f32.partialorder %v10476_v54, %v10487_v45  ;;  %vm1466_vm2 = vcmp.eq.f32.partialorder %v10476_v54, %v10488_v58  ;;  %vm1210_vm6 = vcmp.lt.f32.partialorder %v10476_v54, %v10488_v58  ;;  %vm1211_vm15 = vcmp.lt.f32.partialorder %v10475_v21, %v10488_v58 }
 0x210   : > { %2568 = vadd.xlane.f32.xlu0 %v2567_v27  ;;  %v1718_v27 = vsel %vm1462_vm7, %v6563_v4, 0.0  ;;  %v1972_v4 = vsel %vm1204_vm11, 1.0, %v1716_v5  ;;  %v1973_v36 = vsel %vm1205_vm4, 1.0, %v10324_v61  ;;  %v2579_v25 = vadd.f32 %v1969_v1, %v1968_v16  ;;  %v10491_v1 = vld [vmem:[#allocation29_spill] sm:$0xff]  ;;  %v10492_v5 = vld [vmem:[#allocation30_spill] sm:$0xff] }
 0x211   : > { %2571 = vadd.xlane.f32.xlu1 %v2570_v38  ;;  %v8419_v34 = vpop.xlane.xlu0 %2364  ;;  %v2582_v49 = vadd.f32 %v1971_v12, %v1970_v39  ;;  %v1974_v41 = vsel %vm1206_vm8, 1.0, %v1718_v27  ;;  %v1975_v33 = vsel %vm1207_vm1, 1.0, %v10324_v61  ;;  %vm1216_vm11 = vcmp.lt.f32.partialorder %v10476_v54, %v10489_v51 }
 0x212   : > { %v8421_v40 = vpop.xlane.xlu1 %2367  ;;  %vm1217_vm4 = vcmp.lt.f32.partialorder %v10475_v21, %v10489_v51  ;;  %v1720_v57 = vsel %vm1464_vm0, %v6487_v7, 0.0  ;;  %vm1472_vm14 = vcmp.eq.f32.partialorder %v10476_v54, %v10489_v51  ;;  %vm1214_vm10 = vcmp.lt.f32.partialorder %v10476_v54, %v10490_v42 }
 0x213   : > { %vm1470_vm7 = vcmp.eq.f32.partialorder %v10476_v54, %v10490_v42  ;;  %vm1215_vm8 = vcmp.lt.f32.partialorder %v10475_v21, %v10490_v42  ;;  %vm1474_vm0 = vcmp.eq.f32.partialorder %v10476_v54, %v10491_v1  ;;  %v2588_v7 = vadd.f32 %v1975_v33, %v1974_v41  ;;  %v10493_v41 = vld [vmem:[#allocation31_spill] sm:$0xff] }
 0x214   : > { %2574 = vadd.xlane.f32.xlu0 %v2573_v23  ;;  %v1722_v23 = vsel %vm1466_vm2, %v6566_v6, 0.0  ;;  %v1977_v6 = vsel %vm1209_vm9, 1.0, %v10324_v61  ;;  %vm1476_vm1 = vcmp.eq.f32.partialorder %v10476_v54, %v10492_v5  ;;  %v1976_v12 = vsel %vm1208_vm12, 1.0, %v1720_v57 }
 0x215   : > { %2577 = vadd.xlane.f32.xlu1 %v2576_v13  ;;  %v8464_v31 = vpop.xlane.xlu0 %2370  ;;  %v2585_v13 = vadd.f32 %v1973_v36, %v1972_v4  ;;  %v1978_v27 = vsel %vm1210_vm6, 1.0, %v1722_v23  ;;  %v1724_v4 = vsel %vm1468_vm13, %v6492_v9, 0.0  ;;  %vm1220_vm9 = vcmp.lt.f32.partialorder %v10476_v54, %v10492_v5 }
 0x216   : > { %v8466_v38 = vpop.xlane.xlu1 %2373  ;;  %vm1221_vm2 = vcmp.lt.f32.partialorder %v10475_v21, %v10492_v5  ;;  %v1979_v29 = vsel %vm1211_vm15, 1.0, %v10324_v61  ;;  %v1726_v36 = vsel %vm1470_vm7, %v6626_v60, 0.0  ;;  %vm1218_vm12 = vcmp.lt.f32.partialorder %v10476_v54, %v10491_v1 }
 0x217   : > { %vm1219_vm13 = vcmp.lt.f32.partialorder %v10475_v21, %v10491_v1  ;;  %v1728_v9 = vsel %vm1472_vm14, %v6536_v62, 0.0  ;;  %v1730_v58 = vsel %vm1474_vm0, %v6634_v24, 0.0  ;;  %v1980_v60 = vsel %vm1212_vm5, 1.0, %v1724_v4 }
 0x218   : > { %2580 = vadd.xlane.f32.xlu0 %v2579_v25  ;;  %v2591_v25 = vadd.f32 %v1977_v6, %v1976_v12  ;;  %v1732_v62 = vsel %vm1476_vm1, %v6539_v2, 0.0  ;;  %vm1478_vm6 = vcmp.eq.f32.partialorder %v10476_v54, %v10493_v41  ;;  %v2594_v57 = vadd.f32 %v1979_v29, %v1978_v27  ;;  %v10494_v27 = vld [vmem:[#allocation32_spill] sm:$0xff] }
 0x219   : > { %2583 = vadd.xlane.f32.xlu1 %v2582_v49  ;;  %v8503_v16 = vpop.xlane.xlu0 %2376  ;;  %v1981_v49 = vsel %vm1213_vm3, 1.0, %v10324_v61  ;;  %v1982_v23 = vsel %vm1214_vm10, 1.0, %v1726_v36  ;;  %v1983_v45 = vsel %vm1215_vm8, 1.0, %v10324_v61  ;;  %v1984_v2 = vsel %vm1216_vm11, 1.0, %v1728_v9 }
 0x21a   : > { %v8505_v39 = vpop.xlane.xlu1 %2379  ;;  %v1987_v6 = vsel %vm1219_vm13, 1.0, %v10324_v61  ;;  %vm1223_vm5 = vcmp.lt.f32.partialorder %v10475_v21, %v10493_v41  ;;  %v2597_v42 = vadd.f32 %v1981_v49, %v1980_v60  ;;  %v1988_v12 = vsel %vm1220_vm9, 1.0, %v1732_v62  ;;  %v10495_v60 = vld [vmem:[#allocation34_spill] sm:$0xff] }
 0x21b   : > { %v1989_v51 = vsel %vm1221_vm2, 1.0, %v10324_v61  ;;  %vm1224_vm3 = vcmp.lt.f32.partialorder %v10476_v54, %v10494_v27  ;;  %vm1480_vm15 = vcmp.eq.f32.partialorder %v10476_v54, %v10494_v27  ;;  %vm1222_vm11 = vcmp.lt.f32.partialorder %v10476_v54, %v10493_v41  ;;  %v10496_v41 = vld [vmem:[#allocation33_spill] sm:$0xff] }
 0x21c   : > { %2586 = vadd.xlane.f32.xlu0 %v2585_v13  ;;  %v1985_v13 = vsel %vm1217_vm4, 1.0, %v10324_v61  ;;  %v1734_v1 = vsel %vm1478_vm6, %v6650_v53, 0.0  ;;  %vm1225_vm4 = vcmp.lt.f32.partialorder %v10475_v21, %v10494_v27  ;;  %v2600_v29 = vadd.f32 %v1983_v45, %v1982_v23 }
 0x21d   : > { %2589 = vadd.xlane.f32.xlu1 %v2588_v7  ;;  %v8554_v24 = vpop.xlane.xlu0 %2382  ;;  %v1986_v7 = vsel %vm1218_vm12, 1.0, %v1730_v58  ;;  %v2603_v36 = vadd.f32 %v1985_v13, %v1984_v2  ;;  %v2609_v58 = vadd.f32 %v1989_v51, %v1988_v12  ;;  %vm1482_vm14 = vcmp.eq.f32.partialorder %v10476_v54, %v10495_v60 }
 0x21e   : > { %v8556_v33 = vpop.xlane.xlu1 %2385  ;;  %v2606_v9 = vadd.f32 %v1987_v6, %v1986_v7  ;;  %vm1483_vm10 = vcmp.eq.f32.partialorder %v10475_v21, %v10495_v60  ;;  %v1990_v53 = vsel %vm1222_vm11, 1.0, %v1734_v1  ;;  %v1736_v49 = vsel %vm1480_vm15, %v6555_v10, 0.0  ;;  %v10497_v6 = vld [vmem:[#allocation66_spill] sm:$0xff] }
 0x21f   : > { %vm1484_vm7 = vcmp.eq.f32.partialorder %v10476_v54, %v7587_v37  ;;  %vm1485_vm8 = vcmp.eq.f32.partialorder %v10475_v21, %v7587_v37  ;;  %v1993_v62 = vsel %vm1225_vm4, 1.0, %v10324_v61  ;;  %vm1226_vm0 = vcmp.lt.f32.partialorder %v10476_v54, %v10495_v60 }
 0x220   : > { %2592 = vadd.xlane.f32.xlu0 %v2591_v25  ;;  %v1991_v25 = vsel %vm1223_vm5, 1.0, %v10324_v61  ;;  %vm1486_vm1 = vcmp.eq.f32.partialorder %v10476_v54, %v10496_v41  ;;  %vm1487_vm9 = vcmp.eq.f32.partialorder %v10475_v21, %v10496_v41  ;;  %vm1227_vm2 = vcmp.lt.f32.partialorder %v10475_v21, %v10495_v60  ;;  %v10498_v60 = vld [vmem:[#allocation36_spill] sm:$0xff] }
 0x221   : > { %2595 = vadd.xlane.f32.xlu1 %v2594_v57  ;;  %v8600_v5 = vpop.xlane.xlu0 %2388  ;;  %v1738_v23 = vsel %vm1482_vm14, 1.0, %v10324_v61  ;;  %v1739_v45 = vsel %vm1483_vm10, %v6654_v56, 0.0  ;;  %vm1228_vm12 = vcmp.lt.f32.partialorder %v10476_v54, %v7587_v37  ;;  %vm1229_vm13 = vcmp.lt.f32.partialorder %v10475_v21, %v7587_v37 }
 0x222   : > { %v8602_v4 = vpop.xlane.xlu1 %2391  ;;  %v1740_v2 = vsel %vm1484_vm7, 1.0, %v10324_v61  ;;  %v1741_v13 = vsel %vm1485_vm8, %v6558_v20, 0.0  ;;  %vm1230_vm6 = vcmp.lt.f32.partialorder %v10476_v54, %v10496_v41  ;;  %vm1231_vm5 = vcmp.lt.f32.partialorder %v10475_v21, %v10496_v41 }
 0x223   : > { %v1742_v7 = vsel %vm1486_vm1, 1.0, %v10324_v61  ;;  %v1743_v56 = vsel %vm1487_vm9, %v6665_v59, 0.0  ;;  %vm1488_vm15 = vcmp.eq.f32.partialorder %v10476_v54, %v10497_v6  ;;  %v1992_v20 = vsel %vm1224_vm3, 1.0, %v1736_v49 }
 0x224   : > { %2598 = vadd.xlane.f32.xlu0 %v2597_v42  ;;  %v2612_v42 = vadd.f32 %v1991_v25, %v1990_v53  ;;  %v1994_v12 = vsel %vm1226_vm0, 1.0, %v1738_v23  ;;  %v1995_v51 = vsel %vm1227_vm2, 1.0, %v1739_v45  ;;  %v1997_v27 = vsel %vm1229_vm13, 1.0, %v1741_v13 }
 0x225   : > { %2601 = vadd.xlane.f32.xlu1 %v2600_v29  ;;  %v8630_v10 = vpop.xlane.xlu0 %2394  ;;  %v1996_v29 = vsel %vm1228_vm12, 1.0, %v1740_v2  ;;  %vm1232_vm3 = vcmp.lt.f32.partialorder %v10476_v54, %v10497_v6  ;;  %vm1489_vm11 = vcmp.eq.f32.partialorder %v10475_v21, %v10497_v6  ;;  %v1744_v25 = vsel %vm1488_vm15, 1.0, %v10324_v61 }
 0x226   : > { %v8632_v57 = vpop.xlane.xlu1 %2397  ;;  %vm1490_vm4 = vcmp.eq.f32.partialorder %v10476_v54, %v10498_v60  ;;  %v2615_v37 = vadd.f32 %v1993_v62, %v1992_v20  ;;  %vm1491_vm14 = vcmp.eq.f32.partialorder %v10475_v21, %v10498_v60  ;;  %v2618_v53 = vadd.f32 %v1995_v51, %v1994_v12 }
 0x227   : > { %v2621_v49 = vadd.f32 %v1997_v27, %v1996_v29  ;;  %vm1233_vm10 = vcmp.lt.f32.partialorder %v10475_v21, %v10497_v6  ;;  %v1745_v23 = vsel %vm1489_vm11, %v10348_v47, 0.0  ;;  %v2000_v62 = vsel %vm1232_vm3, 1.0, %v1744_v25  ;;  %v10499_v47 = vld [vmem:[#allocation35_spill] sm:$0xff] }
 0x228   : > { %2604 = vadd.xlane.f32.xlu0 %v2603_v36  ;;  %v1998_v36 = vsel %vm1230_vm6, 1.0, %v1742_v7  ;;  %vm1234_vm7 = vcmp.lt.f32.partialorder %v10476_v54, %v10498_v60  ;;  %vm1235_vm8 = vcmp.lt.f32.partialorder %v10475_v21, %v10498_v60  ;;  %v1747_v13 = vsel %vm1491_vm14, %v6668_v50, 0.0  ;;  %v10500_v50 = vld [vmem:[#allocation38_spill] sm:$0xff] }
 0x229   : > { %2607 = vadd.xlane.f32.xlu1 %v2606_v9  ;;  %v8661_v1 = vpop.xlane.xlu0 %2400  ;;  %v1999_v9 = vsel %vm1231_vm5, 1.0, %v1743_v56  ;;  %vm1492_vm0 = vcmp.eq.f32.partialorder %v10476_v54, %v10499_v47  ;;  %vm1493_vm1 = vcmp.eq.f32.partialorder %v10475_v21, %v10499_v47  ;;  %v2001_v7 = vsel %vm1233_vm10, 1.0, %v1745_v23 }
 0x22a   : > { %v8663_v59 = vpop.xlane.xlu1 %2403  ;;  %v2624_v2 = vadd.f32 %v1999_v9, %v1998_v36  ;;  %vm1236_vm9 = vcmp.lt.f32.partialorder %v10476_v54, %v10499_v47  ;;  %vm1494_vm2 = vcmp.eq.f32.partialorder %v10476_v54, %v7694_v11  ;;  %vm1495_vm12 = vcmp.eq.f32.partialorder %v10475_v21, %v7694_v11  ;;  %v10501_v9 = vld [vmem:[#allocation37_spill] sm:$0xff] }
 0x22b   : > { %vm1237_vm13 = vcmp.lt.f32.partialorder %v10475_v21, %v10499_v47  ;;  %vm1496_vm6 = vcmp.eq.f32.partialorder %v10476_v54, %v10500_v50  ;;  %vm1497_vm5 = vcmp.eq.f32.partialorder %v10475_v21, %v10500_v50  ;;  %v2003_v20 = vsel %vm1235_vm8, 1.0, %v1747_v13 }
 0x22c   : > { %2610 = vadd.xlane.f32.xlu0 %v2609_v58  ;;  %v1746_v58 = vsel %vm1490_vm4, 1.0, %v10324_v61  ;;  %v1748_v12 = vsel %vm1492_vm0, 1.0, %v10324_v61  ;;  %v1749_v51 = vsel %vm1493_vm1, %v10351_v44, 0.0  ;;  %vm1238_vm15 = vcmp.lt.f32.partialorder %v10476_v54, %v7694_v11 }
 0x22d   : > { %2613 = vadd.xlane.f32.xlu1 %v2612_v42  ;;  %v8689_v41 = vpop.xlane.xlu0 %2406  ;;  %v2002_v56 = vsel %vm1234_vm7, 1.0, %v1746_v58  ;;  %vm1239_vm3 = vcmp.lt.f32.partialorder %v10475_v21, %v7694_v11  ;;  %v1750_v29 = vsel %vm1494_vm2, 1.0, %v10324_v61  ;;  %v1751_v27 = vsel %vm1495_vm12, %v10458_v8, 0.0  ;;  %v10502_v11 = vld [vmem:[#allocation40_spill] sm:$0xff] }
 0x22e   : > { %v8691_v45 = vpop.xlane.xlu1 %2409  ;;  %vm1240_vm11 = vcmp.lt.f32.partialorder %v10476_v54, %v10500_v50  ;;  %vm1241_vm4 = vcmp.lt.f32.partialorder %v10475_v21, %v10500_v50  ;;  %v1752_v36 = vsel %vm1496_vm6, 1.0, %v10324_v61  ;;  %v1753_v44 = vsel %vm1497_vm5, %v6639_v63, 0.0 }
 0x22f   : > { %vm1498_vm14 = vcmp.eq.f32.partialorder %v10476_v54, %v10501_v9  ;;  %v2627_v25 = vadd.f32 %v2001_v7, %v2000_v62  ;;  %v2630_v60 = vadd.f32 %v2003_v20, %v2002_v56  ;;  %vm1499_vm10 = vcmp.eq.f32.partialorder %v10475_v21, %v10501_v9  ;;  %v10503_v7 = vld [vmem:[#allocation39_spill] sm:$0xff] }
 0x230   : > { %2616 = vadd.xlane.f32.xlu0 %v2615_v37  ;;  %v2005_v63 = vsel %vm1237_vm13, 1.0, %v1749_v51  ;;  %v2007_v23 = vsel %vm1239_vm3, 1.0, %v1751_v27  ;;  %v2009_v62 = vsel %vm1241_vm4, 1.0, %v1753_v44  ;;  %vm1242_vm7 = vcmp.lt.f32.partialorder %v10476_v54, %v10501_v9 }
 0x231   : > { %2619 = vadd.xlane.f32.xlu1 %v2618_v53  ;;  %v8718_v6 = vpop.xlane.xlu0 %2412  ;;  %v2004_v53 = vsel %vm1236_vm9, 1.0, %v1748_v12  ;;  %v1754_v58 = vsel %vm1498_vm14, 1.0, %v10324_v61  ;;  %vm1243_vm8 = vcmp.lt.f32.partialorder %v10475_v21, %v10501_v9  ;;  %v1755_v13 = vsel %vm1499_vm10, %v6681_v22, 0.0  ;;  %v10504_v9 = vld [vmem:[#allocation41_spill] sm:$0xff] }
 0x232   : > { %v8720_v42 = vpop.xlane.xlu1 %2415  ;;  %vm1500_vm0 = vcmp.eq.f32.partialorder %v10476_v54, %v10502_v11  ;;  %vm1501_vm1 = vcmp.eq.f32.partialorder %v10475_v21, %v10502_v11  ;;  %v2633_v47 = vadd.f32 %v2005_v63, %v2004_v53  ;;  %vm1502_vm9 = vcmp.eq.f32.partialorder %v10476_v54, %v10503_v7 }
 0x233   : > { %vm1503_vm2 = vcmp.eq.f32.partialorder %v10475_v21, %v10503_v7  ;;  %v2010_v12 = vsel %vm1242_vm7, 1.0, %v1754_v58  ;;  %vm1244_vm12 = vcmp.lt.f32.partialorder %v10476_v54, %v10502_v11  ;;  %v2011_v51 = vsel %vm1243_vm8, 1.0, %v1755_v13 }
 0x234   : > { %2622 = vadd.xlane.f32.xlu0 %v2621_v49  ;;  %v2006_v49 = vsel %vm1238_vm15, 1.0, %v1750_v29  ;;  %vm1245_vm13 = vcmp.lt.f32.partialorder %v10475_v21, %v10502_v11  ;;  %v1756_v29 = vsel %vm1500_vm0, 1.0, %v10324_v61  ;;  %v1757_v27 = vsel %vm1501_vm1, %v6647_v55, 0.0 }
 0x235   : > { %2625 = vadd.xlane.f32.xlu1 %v2624_v2  ;;  %v8743_v8 = vpop.xlane.xlu0 %2418  ;;  %v2008_v2 = vsel %vm1240_vm11, 1.0, %v1752_v36  ;;  %v2636_v22 = vadd.f32 %v2007_v23, %v2006_v49  ;;  %vm1246_vm6 = vcmp.lt.f32.partialorder %v10476_v54, %v10503_v7  ;;  %vm1247_vm5 = vcmp.lt.f32.partialorder %v10475_v21, %v10503_v7 }
 0x236   : > { %v8745_v37 = vpop.xlane.xlu1 %2421  ;;  %v2639_v20 = vadd.f32 %v2009_v62, %v2008_v2  ;;  %v1758_v36 = vsel %vm1502_vm9, 1.0, %v10324_v61  ;;  %v1759_v44 = vsel %vm1503_vm2, %v6684_v30, 0.0  ;;  %vm1504_vm15 = vcmp.eq.f32.partialorder %v10476_v54, %v10504_v9 }
 0x237   : > { %vm1505_vm3 = vcmp.eq.f32.partialorder %v10475_v21, %v10504_v9  ;;  %v2642_v53 = vadd.f32 %v2011_v51, %v2010_v12  ;;  %v2012_v30 = vsel %vm1244_vm12, 1.0, %v1756_v29  ;;  %v2013_v63 = vsel %vm1245_vm13, 1.0, %v1757_v27  ;;  %v10507_v12 = vld [vmem:[#allocation43_spill] sm:$0xff] }
 0x238   : > { %2628 = vadd.xlane.f32.xlu0 %v2627_v25  ;;  %v10505_v25 = vld [vmem:[#allocation42_spill] sm:$0xff]  ;;  %v2014_v49 = vsel %vm1246_vm6, 1.0, %v1758_v36  ;;  %v2015_v23 = vsel %vm1247_vm5, 1.0, %v1759_v44  ;;  %vm1248_vm14 = vcmp.lt.f32.partialorder %v10476_v54, %v10504_v9  ;;  %vm1249_vm10 = vcmp.lt.f32.partialorder %v10475_v21, %v10504_v9 }
 0x239   : > { %2631 = vadd.xlane.f32.xlu1 %v2630_v60  ;;  %v8779_v56 = vpop.xlane.xlu0 %2424  ;;  %vm1506_vm11 = vcmp.eq.f32.partialorder %v10476_v54, %v10505_v25  ;;  %vm1507_vm4 = vcmp.eq.f32.partialorder %v10475_v21, %v10505_v25  ;;  %v1760_v2 = vsel %vm1504_vm15, 1.0, %v10324_v61  ;;  %v1761_v62 = vsel %vm1505_vm3, %v6657_v52, 0.0 }
 0x23a   : > { %v8781_v50 = vpop.xlane.xlu1 %2427  ;;  %vm1250_vm7 = vcmp.lt.f32.partialorder %v10476_v54, %v10505_v25  ;;  %v1762_v58 = vsel %vm1506_vm11, 1.0, %v10324_v61  ;;  %v2645_v13 = vadd.f32 %v2013_v63, %v2012_v30  ;;  %vm1251_vm8 = vcmp.lt.f32.partialorder %v10475_v21, %v10505_v25 }
 0x23b   : > { %v1763_v11 = vsel %vm1507_vm4, %v6693_v17, 0.0  ;;  %v2648_v52 = vadd.f32 %v2015_v23, %v2014_v49  ;;  %vm1510_vm9 = vcmp.eq.f32.partialorder %v10476_v54, %v10507_v12  ;;  %vm1511_vm2 = vcmp.eq.f32.partialorder %v10475_v21, %v10507_v12 }
 0x23c   : > { %2634 = vadd.xlane.f32.xlu0 %v2633_v47  ;;  %v10506_v47 = vld [vmem:[#allocation44_spill] sm:$0xff]  ;;  %v2016_v17 = vsel %vm1248_vm14, 1.0, %v1760_v2  ;;  %v2018_v51 = vsel %vm1250_vm7, 1.0, %v1762_v58  ;;  %v2019_v29 = vsel %vm1251_vm8, 1.0, %v1763_v11  ;;  %vm1254_vm6 = vcmp.lt.f32.partialorder %v10476_v54, %v10507_v12 }
 0x23d   : > { %2637 = vadd.xlane.f32.xlu1 %v2636_v22  ;;  %v8801_v55 = vpop.xlane.xlu0 %2430  ;;  %vm1508_vm0 = vcmp.eq.f32.partialorder %v10476_v54, %v10506_v47  ;;  %vm1509_vm1 = vcmp.eq.f32.partialorder %v10475_v21, %v10506_v47  ;;  %vm1252_vm12 = vcmp.lt.f32.partialorder %v10476_v54, %v10506_v47  ;;  %vm1253_vm13 = vcmp.lt.f32.partialorder %v10475_v21, %v10506_v47 }
 0x23e   : > { %v8803_v60 = vpop.xlane.xlu1 %2433  ;;  %v1764_v27 = vsel %vm1508_vm0, 1.0, %v10324_v61  ;;  %v1765_v36 = vsel %vm1509_vm1, %v6660_v48, 0.0  ;;  %vm1255_vm5 = vcmp.lt.f32.partialorder %v10475_v21, %v10507_v12  ;;  %v1766_v44 = vsel %vm1510_vm9, 1.0, %v10324_v61 }
 0x23f   : > { %v1767_v9 = vsel %vm1511_vm2, %v6787_v3, 0.0  ;;  %vm1512_vm15 = vcmp.eq.f32.partialorder %v10476_v54, %v7933_v14  ;;  %vm1513_vm3 = vcmp.eq.f32.partialorder %v10475_v21, %v7933_v14  ;;  %v2654_v63 = vadd.f32 %v2019_v29, %v2018_v51 }
 0x240   : > { %2640 = vadd.xlane.f32.xlu0 %v2639_v20  ;;  %v2017_v20 = vsel %vm1249_vm10, 1.0, %v1761_v62  ;;  %v2020_v48 = vsel %vm1252_vm12, 1.0, %v1764_v27  ;;  %v2021_v3 = vsel %vm1253_vm13, 1.0, %v1765_v36  ;;  %v2022_v49 = vsel %vm1254_vm6, 1.0, %v1766_v44  ;;  %v10508_v44 = vld [vmem:[#allocation8_spill] sm:$0xff] }
 0x241   : > { %2643 = vadd.xlane.f32.xlu1 %v2642_v53  ;;  %v8827_v7 = vpop.xlane.xlu0 %2436  ;;  %v2651_v30 = vadd.f32 %v2017_v20, %v2016_v17  ;;  %v2023_v23 = vsel %vm1255_vm5, 1.0, %v1767_v9  ;;  %vm1256_vm11 = vcmp.lt.f32.partialorder %v10476_v54, %v7933_v14  ;;  %vm1257_vm4 = vcmp.lt.f32.partialorder %v10475_v21, %v7933_v14 }
 0x242   : > { %v8829_v22 = vpop.xlane.xlu1 %2439  ;;  %v1768_v2 = vsel %vm1512_vm15, 1.0, %v10324_v61  ;;  %v1769_v62 = vsel %vm1513_vm3, %v6674_v18, 0.0  ;;  %v2657_v11 = vadd.f32 %v2021_v3, %v2020_v48  ;;  %v2660_v47 = vadd.f32 %v2023_v23, %v2022_v49 }
 0x243   : > { %v6085_v17 = vmov 1985246804   ;;  %v2024_v51 = vsel %vm1256_vm11, 1.0, %v1768_v2  ;;  %v2025_v29 = vsel %vm1257_vm4, 1.0, %v1769_v62  ;;  %vm5107_vm14 = vcmask 130112  }
 0x244   : > { %2646 = vadd.xlane.f32.xlu0 %v2645_v13  ;;  %v2802_v20 = vunpack.c.l.s4 %v6085_v17  ;;  %v2663_v61 = vadd.f32 %v2025_v29, %v2024_v51  ;;  %v10512_v51 = vld [vmem:[#allocation48_spill] sm:$0xff]  ;;  %vm5114_vm10 = vcmask 195712   ;;  %vm5121_vm7 = vcmask 261312  }
 0x245   : > { %2649 = vadd.xlane.f32.xlu1 %v2648_v52  ;;  %v8858_v25 = vpop.xlane.xlu0 %2442  ;;  %v6084_v52 = vmov 839922192   ;;  %vm5128_vm8 = vcmask 326912   ;;  %vm5135_vm0 = vcmask 392512   ;;  %vm5142_vm1 = vcmask 458112  }
 0x246   : > { %v8860_v53 = vpop.xlane.xlu1 %2445  ;;  %v2795_v12 = vunpack.c.l.s4 %v6084_v52  ;;  %v2803_v21 = vunpack.c.0.s8 %v2802_v20  ;;  %vm5149_vm9 = vcmask 523712   ;;  %vm5156_vm2 = vcmask 589312  }
 0x247   : > { %vm5163_vm12 = vcmask 654912   ;;  %vm5170_vm13 = vcmask 720512   ;;  %vm5177_vm6 = vcmask 786112   ;;  %vm10228_vm5 = vcmask 851712  }
 0x248   : > { %2652 = vadd.xlane.f32.xlu0 %v2651_v30  ;;  %v2796_v18 = vunpack.c.0.s8 %v2795_v12  ;;  %v8894_v30 = vsub.s32 %v2803_v21, %v10508_v44  ;;  %vm5191_vm15 = vcmask 917312   ;;  %vm5198_vm3 = vcmask 982912  }
 0x249   : > { %2655 = vadd.xlane.f32.xlu1 %v2654_v63  ;;  %v8878_v58 = vpop.xlane.xlu0 %2448  ;;  %vm5205_vm11 = vcmask 1048512   ;;  %vm5760_vm4 = vcmask 1041409  }
 0x24a   : > { %v8880_v13 = vpop.xlane.xlu1 %2451  ;;  %v8891_v9 = vsub.s32 %v2796_v18, %v10508_v44  ;;  %v2807_v49 = vrot.slane %v7935_v26, %v8894_v30  ;;  %v2849_v29 = vrot.slane %v10512_v51, %v8894_v30 }
 0x24c   : > { %2658 = vadd.xlane.f32.xlu0 %v2657_v11  ;;  %v2800_v3 = vrot.slane %v7935_v26, %v8891_v9  ;;  %v10510_v11 = vld [vmem:[#allocation46_spill] sm:$0xff]  ;;  %v2842_v26 = vrot.slane %v10512_v51, %v8891_v9  ;;  %v2940_v51 = vrot.slane %v8112_v32, %v8891_v9 }
 0x24d   : > { %2661 = vadd.xlane.f32.xlu1 %v2660_v47  ;;  %v8882_v54 = vpop.xlane.xlu0 %2454  ;;  %v2828_v47 = vrot.slane %v10510_v11, %v8891_v9  ;;  %v2835_v52 = vrot.slane %v10510_v11, %v8894_v30 }
 0x24e   : > { %v8884_v14 = vpop.xlane.xlu1 %2457  ;;  %v4586_v62 = vcombine.low %v2800_v3, %v2807_v49  ;;  %v4589_v11 = vcombine.low %v2842_v26, %v2849_v29  ;;  %v10517_v26 = vld [vmem:[#allocation50_spill] sm:$0xff] }
 0x24f   : > { %v4588_v20 = vcombine.low %v2828_v47, %v2835_v52  ;;  %v2870_v29 = vrot.slane %v10517_v26, %v8891_v9 }
 0x250   : > { %2664 = vadd.xlane.f32.xlu0 %v2663_v61  ;;  %v10513_v61 = vld [vmem:[#allocation45_spill] sm:$0xff] }
 0x251   : > { %v8886_v27 = vpop.xlane.xlu0 %2460  ;;  %v2814_v18 = vrot.slane %v10513_v61, %v8891_v9  ;;  %v2821_v21 = vrot.slane %v10513_v61, %v8894_v30 }
 0x252   : > { %v8888_v36 = vpop.xlane.xlu1 %2463 }
 0x253   : > { %v4587_v44 = vcombine.low %v2814_v18, %v2821_v21  ;;  %v2968_v21 = vrot.slane %v8164_v43, %v8891_v9 }
 0x255   : > { %v8896_v63 = vpop.xlane.xlu0 %2466 }
 0x256   : > { %v8898_v48 = vpop.xlane.xlu1 %2469 }
 0x259   : > { %v8904_v23 = vpop.xlane.xlu0 %2472 }
 0x25a   : > { %10509 = vst [vmem:[#allocation62_spill] sm:$0xff] %v8904_v23  ;;  %v8906_v2 = vpop.xlane.xlu1 %2475 }
 0x25d   : > { %v8912_v12 = vpop.xlane.xlu0 %2478 }
 0x25e   : > { %10511 = vst [vmem:[#allocation63_spill] sm:$0xff] %v8912_v12  ;;  %v8914_v17 = vpop.xlane.xlu1 %2481  ;;  %4715 = vperm.xlu1 %5967, %v4586_v62   ;;  %v10515_v62 = vld [vmem:[#allocation47_spill] sm:$0xff]  ;;  %v2947_v12 = vrot.slane %v8112_v32, %v8894_v30  ;;  %v2975_v32 = vrot.slane %v8164_v43, %v8894_v30  ;;  %v3003_v43 = vrot.slane %v8190_v35, %v8894_v30 }
 0x25f   : > { %v2856_v47 = vrot.slane %v10515_v62, %v8891_v9  ;;  %v2863_v52 = vrot.slane %v10515_v62, %v8894_v30  ;;  %v2877_v62 = vrot.slane %v10517_v26, %v8894_v30 }
 0x260   : > { %v4596_v18 = vcombine.low %v2940_v51, %v2947_v12  ;;  %v4598_v12 = vcombine.low %v2968_v21, %v2975_v32  ;;  %v2996_v51 = vrot.slane %v8190_v35, %v8891_v9  ;;  %v10523_v32 = vld [vmem:[#allocation59_spill] sm:$0xff] }
 0x261   : > { %v8924_v3 = vpop.xlane.xlu0 %2484  ;;  %v3031_v35 = vrot.slane %v10523_v32, %v8894_v30 }
 0x262   : > { %10514 = vst [vmem:[#allocation65_spill] sm:$0xff] %v8924_v3  ;;  %v8926_v49 = vpop.xlane.xlu1 %2487  ;;  %4721 = vperm.xlu1 %5967, %v4588_v20   ;;  %v4590_v20 = vcombine.low %v2856_v47, %v2863_v52  ;;  %v4600_v21 = vcombine.low %v2996_v51, %v3003_v43  ;;  %v3052_v43 = vrot.slane %v8261_v0, %v8891_v9 }
 0x265   : > { %v8936_v61 = vpop.xlane.xlu0 %2490 }
 0x266   : > { %10516 = vst [vmem:[#allocation67_spill] sm:$0xff] %v8936_v61  ;;  %v8938_v3 = vpop.xlane.xlu1 %2493  ;;  %4724 = vperm.xlu1 %5967, %v4589_v11   ;;  %4718 = vperm.xlu0 %5968, %v4587_v44   ;;  %v4591_v44 = vcombine.low %v2870_v29, %v2877_v62  ;;  %v10520_v11 = vld [vmem:[#allocation49_spill] sm:$0xff]  ;;  %v10522_v29 = vld [vmem:[#allocation52_spill] sm:$0xff] }
 0x267   : > { %v2884_v47 = vrot.slane %v10520_v11, %v8891_v9  ;;  %v2891_v52 = vrot.slane %v10520_v11, %v8894_v30  ;;  %v2898_v62 = vrot.slane %v10522_v29, %v8891_v9  ;;  %v3024_v11 = vrot.slane %v10523_v32, %v8891_v9 }
 0x269   : > { %v8948_v23 = vpop.xlane.xlu0 %2496  ;;  %v4602_v51 = vcombine.low %v3024_v11, %v3031_v35  ;;  %v10530_v35 = vld [vmem:[#allocation12_spill] sm:$0xff] }
 0x26a   : > { %10518 = vst [vmem:[#allocation68_spill] sm:$0xff] %v8948_v23  ;;  %v8950_v61 = vpop.xlane.xlu1 %2499  ;;  %4727 = vperm.xlu1 %5967, %v4590_v20   ;;  %4745 = vperm.xlu0 %5968, %v4596_v18   ;;  %v4592_v20 = vcombine.low %v2884_v47, %v2891_v52  ;;  %v2905_v18 = vrot.slane %v10522_v29, %v8894_v30  ;;  %v10526_v47 = vld [vmem:[#allocation51_spill] sm:$0xff] }
 0x26b   : > { %10519 = vst [vmem:[#allocation69_spill] sm:$0xff] %v8950_v61  ;;  %v2912_v52 = vrot.slane %v10526_v47, %v8891_v9  ;;  %v3059_v29 = vrot.slane %v8261_v0, %v8894_v30  ;;  %v3087_v0 = vrot.slane %v10530_v35, %v8894_v30 }
 0x26d   : > { %v8960_v26 = vpop.xlane.xlu0 %2502  ;;  %v4604_v11 = vcombine.low %v3052_v43, %v3059_v29  ;;  %v10533_v29 = vld [vmem:[#allocation61_spill] sm:$0xff] }
 0x26e   : > { %10521 = vst [vmem:[#allocation72_spill] sm:$0xff] %v8960_v26  ;;  %v8962_v23 = vpop.xlane.xlu1 %2505  ;;  %4730 = vperm.xlu1 %5967, %v4591_v44   ;;  %4751 = vperm.xlu0 %5968, %v4598_v12   ;;  %v4593_v44 = vcombine.low %v2898_v62, %v2905_v18  ;;  %v2919_v12 = vrot.slane %v10526_v47, %v8894_v30  ;;  %v10529_v62 = vld [vmem:[#allocation54_spill] sm:$0xff] }
 0x26f   : > { %v2926_v18 = vrot.slane %v10529_v62, %v8891_v9  ;;  %v3080_v47 = vrot.slane %v10530_v35, %v8891_v9  ;;  %v3115_v35 = vrot.slane %v10533_v29, %v8894_v30 }
 0x271   : > { %v8972_v61 = vpop.xlane.xlu0 %2508  ;;  %v4606_v43 = vcombine.low %v3080_v47, %v3087_v0  ;;  %v3136_v0 = vrot.slane %v8346_v46, %v8891_v9 }
 0x272   : > { %10524 = vst [vmem:[#allocation71_spill] sm:$0xff] %v8972_v61  ;;  %v8974_v26 = vpop.xlane.xlu1 %2511  ;;  %4733 = vperm.xlu1 %5967, %v4592_v20   ;;  %4757 = vperm.xlu0 %5968, %v4600_v21   ;;  %v4594_v20 = vcombine.low %v2912_v52, %v2919_v12  ;;  %v2933_v21 = vrot.slane %v10529_v62, %v8894_v30  ;;  %v10532_v52 = vld [vmem:[#allocation53_spill] sm:$0xff] }
 0x273   : > { %10525 = vst [vmem:[#allocation74_spill] sm:$0xff] %v8974_v26  ;;  %v2954_v12 = vrot.slane %v10532_v52, %v8891_v9  ;;  %v3108_v62 = vrot.slane %v10533_v29, %v8891_v9 }
 0x275   : > { %v8984_v32 = vpop.xlane.xlu0 %2514  ;;  %v4608_v47 = vcombine.low %v3108_v62, %v3115_v35  ;;  %v3164_v35 = vrot.slane %v8383_v15, %v8891_v9 }
 0x276   : > { %10527 = vst [vmem:[#allocation75_spill] sm:$0xff] %v8984_v32  ;;  %v8986_v61 = vpop.xlane.xlu1 %2517  ;;  %4736 = vperm.xlu1 %5967, %v4593_v44   ;;  %4763 = vperm.xlu0 %5968, %v4602_v51   ;;  %v4595_v44 = vcombine.low %v2926_v18, %v2933_v21  ;;  %v2961_v51 = vrot.slane %v10532_v52, %v8894_v30  ;;  %v10535_v18 = vld [vmem:[#allocation57_spill] sm:$0xff] }
 0x277   : > { %10528 = vst [vmem:[#allocation76_spill] sm:$0xff] %v8986_v61  ;;  %v2982_v21 = vrot.slane %v10535_v18, %v8891_v9  ;;  %v3143_v52 = vrot.slane %v8346_v46, %v8894_v30  ;;  %v3171_v46 = vrot.slane %v8383_v15, %v8894_v30  ;;  %v3199_v15 = vrot.slane %v8421_v40, %v8894_v30 }
 0x279   : > { %v8996_v26 = vpop.xlane.xlu0 %2520  ;;  %v4610_v62 = vcombine.low %v3136_v0, %v3143_v52  ;;  %v4612_v0 = vcombine.low %v3164_v35, %v3171_v46  ;;  %v3192_v52 = vrot.slane %v8421_v40, %v8891_v9  ;;  %v3220_v46 = vrot.slane %v8466_v38, %v8891_v9 }
 0x27a   : > { %10531 = vst [vmem:[#allocation77_spill] sm:$0xff] %v8996_v26  ;;  %v8998_v32 = vpop.xlane.xlu1 %2523  ;;  %4739 = vperm.xlu1 %5967, %v4594_v20   ;;  %4769 = vperm.xlu0 %5968, %v4604_v11   ;;  %v4597_v20 = vcombine.low %v2954_v12, %v2961_v51  ;;  %v2989_v11 = vrot.slane %v10535_v18, %v8894_v30  ;;  %v10537_v12 = vld [vmem:[#allocation55_spill] sm:$0xff] }
 0x27b   : > { %v3010_v51 = vrot.slane %v10537_v12, %v8891_v9  ;;  %v4614_v35 = vcombine.low %v3192_v52, %v3199_v15  ;;  %v3227_v40 = vrot.slane %v8466_v38, %v8894_v30  ;;  %v3248_v15 = vrot.slane %v8505_v39, %v8891_v9 }
 0x27c   : > { %v3255_v38 = vrot.slane %v8505_v39, %v8894_v30  ;;  %v3283_v39 = vrot.slane %v8556_v33, %v8894_v30 }
 0x27d   : > { %v9008_v61 = vpop.xlane.xlu0 %2526  ;;  %v4616_v52 = vcombine.low %v3220_v46, %v3227_v40  ;;  %v3276_v46 = vrot.slane %v8556_v33, %v8891_v9  ;;  %v3311_v33 = vrot.slane %v8602_v4, %v8894_v30 }
 0x27e   : > { %10534 = vst [vmem:[#allocation80_spill] sm:$0xff] %v9008_v61  ;;  %v9010_v26 = vpop.xlane.xlu1 %2529  ;;  %4742 = vperm.xlu1 %5967, %v4595_v44   ;;  %4775 = vperm.xlu0 %5968, %v4606_v43   ;;  %v4599_v44 = vcombine.low %v2982_v21, %v2989_v11  ;;  %v3017_v43 = vrot.slane %v10537_v12, %v8894_v30  ;;  %v10539_v21 = vld [vmem:[#allocation60_spill] sm:$0xff] }
 0x27f   : > { %v3038_v11 = vrot.slane %v10539_v21, %v8891_v9 }
 0x281   : > { %v9020_v29 = vpop.xlane.xlu0 %2532 }
 0x282   : > { %10536 = vst [vmem:[#allocation79_spill] sm:$0xff] %v9020_v29  ;;  %v9022_v61 = vpop.xlane.xlu1 %2535  ;;  %4748 = vperm.xlu1 %5967, %v4597_v20   ;;  %4781 = vperm.xlu0 %5968, %v4608_v47   ;;  %v4601_v20 = vcombine.low %v3010_v51, %v3017_v43  ;;  %v3045_v47 = vrot.slane %v10539_v21, %v8894_v30  ;;  %v10541_v51 = vld [vmem:[#allocation11_spill] sm:$0xff] }
 0x283   : > { %v3066_v43 = vrot.slane %v10541_v51, %v8891_v9 }
 0x285   : > { %v9032_v18 = vpop.xlane.xlu0 %2538 }
 0x286   : > { %10538 = vst [vmem:[#allocation81_spill] sm:$0xff] %v9032_v18  ;;  %v9034_v29 = vpop.xlane.xlu1 %2541  ;;  %4754 = vperm.xlu1 %5967, %v4599_v44   ;;  %4787 = vperm.xlu0 %5968, %v4610_v62   ;;  %v4603_v44 = vcombine.low %v3038_v11, %v3045_v47  ;;  %v3073_v62 = vrot.slane %v10541_v51, %v8894_v30  ;;  %v10543_v11 = vld [vmem:[#allocation58_spill] sm:$0xff] }
 0x287   : > { %v3094_v47 = vrot.slane %v10543_v11, %v8891_v9 }
 0x289   : > { %v9044_v12 = vpop.xlane.xlu0 %2544 }
 0x28a   : > { %10540 = vst [vmem:[#allocation78_spill] sm:$0xff] %v9044_v12  ;;  %v9046_v18 = vpop.xlane.xlu1 %2547  ;;  %4760 = vperm.xlu1 %5967, %v4601_v20   ;;  %4793 = vperm.xlu0 %5968, %v4612_v0   ;;  %v4605_v20 = vcombine.low %v3066_v43, %v3073_v62  ;;  %v3101_v0 = vrot.slane %v10543_v11, %v8894_v30 }
 0x28b   : > { %v3122_v43 = vrot.slane %v8344_v28, %v8891_v9  ;;  %v3129_v62 = vrot.slane %v8344_v28, %v8894_v30  ;;  %v3157_v28 = vrot.slane %v8381_v19, %v8894_v30 }
 0x28d   : > { %v9056_v21 = vpop.xlane.xlu0 %2550 }
 0x28e   : > { %10542 = vst [vmem:[#allocation82_spill] sm:$0xff] %v9056_v21  ;;  %v9058_v12 = vpop.xlane.xlu1 %2553  ;;  %4766 = vperm.xlu1 %5967, %v4603_v44   ;;  %4799 = vperm.xlu0 %5968, %v4614_v35   ;;  %v4607_v44 = vcombine.low %v3094_v47, %v3101_v0  ;;  %v4618_v35 = vcombine.low %v3248_v15, %v3255_v38 }
 0x28f   : > { %v3150_v47 = vrot.slane %v8381_v19, %v8891_v9  ;;  %v4620_v0 = vcombine.low %v3276_v46, %v3283_v39  ;;  %v3185_v19 = vrot.slane %v8419_v34, %v8894_v30 }
 0x291   : > { %v9068_v51 = vpop.xlane.xlu0 %2556 }
 0x292   : > { %v9070_v21 = vpop.xlane.xlu1 %2559  ;;  %4772 = vperm.xlu1 %5967, %v4605_v20   ;;  %4805 = vperm.xlu0 %5968, %v4616_v52   ;;  %v4609_v20 = vcombine.low %v3122_v43, %v3129_v62  ;;  %v3304_v52 = vrot.slane %v8602_v4, %v8891_v9  ;;  %v3178_v43 = vrot.slane %v8419_v34, %v8891_v9 }
 0x293   : > { %v3339_v4 = vrot.slane %v8632_v57, %v8894_v30  ;;  %v3213_v34 = vrot.slane %v8464_v31, %v8894_v30 }
 0x294   : > { %v4622_v62 = vcombine.low %v3304_v52, %v3311_v33 }
 0x295   : > { %v9080_v40 = vpop.xlane.xlu0 %2562 }
 0x296   : > { %v9082_v11 = vpop.xlane.xlu1 %2565  ;;  %4778 = vperm.xlu1 %5967, %v4607_v44   ;;  %4811 = vperm.xlu0 %5968, %v4618_v35   ;;  %v4611_v44 = vcombine.low %v3150_v47, %v3157_v28  ;;  %v3332_v35 = vrot.slane %v8632_v57, %v8891_v9  ;;  %v3206_v47 = vrot.slane %v8464_v31, %v8891_v9 }
 0x297   : > { %v3367_v57 = vrot.slane %v8663_v59, %v8894_v30  ;;  %v3241_v31 = vrot.slane %v8503_v16, %v8894_v30 }
 0x298   : > { %v4624_v28 = vcombine.low %v3332_v35, %v3339_v4 }
 0x299   : > { %v9092_v15 = vpop.xlane.xlu0 %2568 }
 0x29a   : > { %v9094_v38 = vpop.xlane.xlu1 %2571  ;;  %4784 = vperm.xlu1 %5967, %v4609_v20   ;;  %4817 = vperm.xlu0 %5968, %v4620_v0   ;;  %v4613_v20 = vcombine.low %v3178_v43, %v3185_v19  ;;  %v3360_v0 = vrot.slane %v8663_v59, %v8891_v9  ;;  %v3234_v43 = vrot.slane %v8503_v16, %v8891_v9 }
 0x29b   : > { %v3395_v59 = vrot.slane %v8691_v45, %v8894_v30  ;;  %v3269_v16 = vrot.slane %v8554_v24, %v8894_v30 }
 0x29c   : > { %v4626_v19 = vcombine.low %v3360_v0, %v3367_v57 }
 0x29d   : > { %v9104_v46 = vpop.xlane.xlu0 %2574 }
 0x29e   : > { %v9106_v39 = vpop.xlane.xlu1 %2577  ;;  %4790 = vperm.xlu1 %5967, %v4611_v44   ;;  %4823 = vperm.xlu0 %5968, %v4622_v62   ;;  %v4615_v44 = vcombine.low %v3206_v47, %v3213_v34  ;;  %v3388_v62 = vrot.slane %v8691_v45, %v8891_v9  ;;  %v3262_v47 = vrot.slane %v8554_v24, %v8891_v9 }
 0x29f   : > { %v3423_v45 = vrot.slane %v8720_v42, %v8894_v30  ;;  %v3297_v24 = vrot.slane %v8600_v5, %v8894_v30 }
 0x2a0   : > { %v4628_v34 = vcombine.low %v3388_v62, %v3395_v59 }
 0x2a1   : > { %v9116_v52 = vpop.xlane.xlu0 %2580 }
 0x2a2   : > { %v9118_v33 = vpop.xlane.xlu1 %2583  ;;  %4796 = vperm.xlu1 %5967, %v4613_v20   ;;  %4829 = vperm.xlu0 %5968, %v4624_v28   ;;  %v4617_v20 = vcombine.low %v3234_v43, %v3241_v31  ;;  %v3416_v28 = vrot.slane %v8720_v42, %v8891_v9  ;;  %v3290_v43 = vrot.slane %v8600_v5, %v8891_v9 }
 0x2a3   : > { %v3451_v42 = vrot.slane %v8745_v37, %v8894_v30  ;;  %v3325_v5 = vrot.slane %v8630_v10, %v8894_v30 }
 0x2a4   : > { %v4630_v31 = vcombine.low %v3416_v28, %v3423_v45 }
 0x2a5   : > { %v9128_v35 = vpop.xlane.xlu0 %2586 }
 0x2a6   : > { %v9130_v4 = vpop.xlane.xlu1 %2589  ;;  %4802 = vperm.xlu1 %5967, %v4615_v44   ;;  %4835 = vperm.xlu0 %5968, %v4626_v19   ;;  %v4619_v44 = vcombine.low %v3262_v47, %v3269_v16  ;;  %v3444_v19 = vrot.slane %v8745_v37, %v8891_v9  ;;  %v3318_v47 = vrot.slane %v8630_v10, %v8891_v9 }
 0x2a7   : > { %v3479_v37 = vrot.slane %v8781_v50, %v8894_v30  ;;  %v3353_v10 = vrot.slane %v8661_v1, %v8894_v30 }
 0x2a8   : > { %v4632_v16 = vcombine.low %v3444_v19, %v3451_v42 }
 0x2a9   : > { %v9140_v0 = vpop.xlane.xlu0 %2592 }
 0x2aa   : > { %v9142_v57 = vpop.xlane.xlu1 %2595  ;;  %4808 = vperm.xlu1 %5967, %v4617_v20   ;;  %4841 = vperm.xlu0 %5968, %v4628_v34   ;;  %v4621_v20 = vcombine.low %v3290_v43, %v3297_v24  ;;  %v3472_v34 = vrot.slane %v8781_v50, %v8891_v9  ;;  %v3346_v43 = vrot.slane %v8661_v1, %v8891_v9 }
 0x2ab   : > { %v3507_v50 = vrot.slane %v8803_v60, %v8894_v30  ;;  %v3381_v1 = vrot.slane %v8689_v41, %v8894_v30 }
 0x2ac   : > { %v4634_v24 = vcombine.low %v3472_v34, %v3479_v37 }
 0x2ad   : > { %v9152_v62 = vpop.xlane.xlu0 %2598 }
 0x2ae   : > { %v9154_v59 = vpop.xlane.xlu1 %2601  ;;  %4814 = vperm.xlu1 %5967, %v4619_v44   ;;  %4847 = vperm.xlu0 %5968, %v4630_v31   ;;  %v4623_v44 = vcombine.low %v3318_v47, %v3325_v5  ;;  %v3500_v31 = vrot.slane %v8803_v60, %v8891_v9  ;;  %v3374_v47 = vrot.slane %v8689_v41, %v8891_v9 }
 0x2af   : > { %v3535_v60 = vrot.slane %v8829_v22, %v8894_v30  ;;  %v3409_v41 = vrot.slane %v8718_v6, %v8894_v30 }
 0x2b0   : > { %v4636_v5 = vcombine.low %v3500_v31, %v3507_v50 }
 0x2b1   : > { %v9164_v28 = vpop.xlane.xlu0 %2604 }
 0x2b2   : > { %v9166_v45 = vpop.xlane.xlu1 %2607  ;;  %4820 = vperm.xlu1 %5967, %v4621_v20   ;;  %4853 = vperm.xlu0 %5968, %v4632_v16   ;;  %v4625_v20 = vcombine.low %v3346_v43, %v3353_v10  ;;  %v3528_v16 = vrot.slane %v8829_v22, %v8891_v9  ;;  %v3402_v43 = vrot.slane %v8718_v6, %v8891_v9 }
 0x2b3   : > { %v3563_v22 = vrot.slane %v8860_v53, %v8894_v30  ;;  %v3437_v6 = vrot.slane %v8743_v8, %v8894_v30 }
 0x2b4   : > { %v4638_v10 = vcombine.low %v3528_v16, %v3535_v60 }
 0x2b5   : > { %v9176_v19 = vpop.xlane.xlu0 %2610 }
 0x2b6   : > { %v9178_v42 = vpop.xlane.xlu1 %2613  ;;  %4826 = vperm.xlu1 %5967, %v4623_v44   ;;  %4859 = vperm.xlu0 %5968, %v4634_v24   ;;  %v4627_v44 = vcombine.low %v3374_v47, %v3381_v1  ;;  %v3556_v24 = vrot.slane %v8860_v53, %v8891_v9  ;;  %v3430_v47 = vrot.slane %v8743_v8, %v8891_v9 }
 0x2b7   : > { %10544 = vst [vmem:[#allocation83_spill] sm:$0xff] %v9178_v42  ;;  %v3591_v53 = vrot.slane %v8880_v13, %v8894_v30  ;;  %v3465_v8 = vrot.slane %v8779_v56, %v8894_v30 }
 0x2b8   : > { %v4640_v1 = vcombine.low %v3556_v24, %v3563_v22 }
 0x2b9   : > { %v9188_v34 = vpop.xlane.xlu0 %2616 }
 0x2ba   : > { %10545 = vst [vmem:[#allocation84_spill] sm:$0xff] %v9188_v34  ;;  %v9190_v37 = vpop.xlane.xlu1 %2619  ;;  %4832 = vperm.xlu1 %5967, %v4625_v20   ;;  %4865 = vperm.xlu0 %5968, %v4636_v5   ;;  %v4629_v20 = vcombine.low %v3402_v43, %v3409_v41  ;;  %v3584_v5 = vrot.slane %v8880_v13, %v8891_v9 }
 0x2bb   : > { %v3458_v43 = vrot.slane %v8779_v56, %v8891_v9  ;;  %v3619_v13 = vrot.slane %v8884_v14, %v8894_v30  ;;  %v3493_v56 = vrot.slane %v8801_v55, %v8894_v30 }
 0x2bc   : > { %v4642_v41 = vcombine.low %v3584_v5, %v3591_v53 }
 0x2bd   : > { %v9200_v31 = vpop.xlane.xlu0 %2622 }
 0x2be   : > { %v9202_v50 = vpop.xlane.xlu1 %2625  ;;  %4838 = vperm.xlu1 %5967, %v4627_v44   ;;  %4871 = vperm.xlu0 %5968, %v4638_v10   ;;  %v4631_v44 = vcombine.low %v3430_v47, %v3437_v6  ;;  %v3612_v10 = vrot.slane %v8884_v14, %v8891_v9  ;;  %v3486_v47 = vrot.slane %v8801_v55, %v8891_v9 }
 0x2bf   : > { %v3647_v14 = vrot.slane %v8888_v36, %v8894_v30  ;;  %v3521_v55 = vrot.slane %v8827_v7, %v8894_v30 }
 0x2c0   : > { %v4644_v6 = vcombine.low %v3612_v10, %v3619_v13 }
 0x2c1   : > { %v9212_v16 = vpop.xlane.xlu0 %2628 }
 0x2c2   : > { %v9214_v60 = vpop.xlane.xlu1 %2631  ;;  %4844 = vperm.xlu1 %5967, %v4629_v20   ;;  %4877 = vperm.xlu0 %5968, %v4640_v1   ;;  %v4633_v20 = vcombine.low %v3458_v43, %v3465_v8  ;;  %v3640_v1 = vrot.slane %v8888_v36, %v8891_v9  ;;  %v3514_v43 = vrot.slane %v8827_v7, %v8891_v9 }
 0x2c3   : > { %v3675_v36 = vrot.slane %v8898_v48, %v8894_v30  ;;  %v3549_v7 = vrot.slane %v8858_v25, %v8894_v30 }
 0x2c4   : > { %v4646_v8 = vcombine.low %v3640_v1, %v3647_v14 }
 0x2c5   : > { %v9224_v24 = vpop.xlane.xlu0 %2634 }
 0x2c6   : > { %v9226_v22 = vpop.xlane.xlu1 %2637  ;;  %4850 = vperm.xlu1 %5967, %v4631_v44   ;;  %4883 = vperm.xlu0 %5968, %v4642_v41   ;;  %v4635_v44 = vcombine.low %v3486_v47, %v3493_v56  ;;  %v3668_v41 = vrot.slane %v8898_v48, %v8891_v9  ;;  %v3542_v47 = vrot.slane %v8858_v25, %v8891_v9 }
 0x2c7   : > { %v3703_v48 = vrot.slane %v8906_v2, %v8894_v30  ;;  %v3577_v25 = vrot.slane %v8878_v58, %v8894_v30 }
 0x2c8   : > { %v4648_v56 = vcombine.low %v3668_v41, %v3675_v36 }
 0x2c9   : > { %v9236_v5 = vpop.xlane.xlu0 %2640 }
 0x2ca   : > { %v9238_v53 = vpop.xlane.xlu1 %2643  ;;  %4856 = vperm.xlu1 %5967, %v4633_v20   ;;  %4889 = vperm.xlu0 %5968, %v4644_v6   ;;  %v4637_v20 = vcombine.low %v3514_v43, %v3521_v55  ;;  %v3696_v6 = vrot.slane %v8906_v2, %v8891_v9  ;;  %v3570_v43 = vrot.slane %v8878_v58, %v8891_v9 }
 0x2cb   : > { %10546 = vst [vmem:[#allocation16_spill] sm:$0xff] %v9238_v53  ;;  %v3731_v2 = vrot.slane %v8914_v17, %v8894_v30 }
 0x2cc   : > { %v4650_v55 = vcombine.low %v3696_v6, %v3703_v48  ;;  %v4641_v36 = vcombine.low %v3570_v43, %v3577_v25  ;;  %v3780_v25 = vrot.slane %v8938_v3, %v8891_v9 }
 0x2cd   : > { %v9248_v10 = vpop.xlane.xlu0 %2646 }
 0x2ce   : > { %v9250_v13 = vpop.xlane.xlu1 %2649  ;;  %4862 = vperm.xlu1 %5967, %v4635_v44   ;;  %4895 = vperm.xlu0 %5968, %v4646_v8   ;;  %v4639_v44 = vcombine.low %v3542_v47, %v3549_v7  ;;  %v3724_v8 = vrot.slane %v8914_v17, %v8891_v9  ;;  %v3605_v47 = vrot.slane %v8882_v54, %v8894_v30 }
 0x2cf   : > { %10547 = vst [vmem:[#allocation70_spill] sm:$0xff] %v9250_v13  ;;  %v3759_v17 = vrot.slane %v8926_v49, %v8894_v30 }
 0x2d0   : > { %v4652_v58 = vcombine.low %v3724_v8, %v3731_v2 }
 0x2d1   : > { %v9260_v1 = vpop.xlane.xlu0 %2652 }
 0x2d2   : > { %10548 = vst [vmem:[#allocation15_spill] sm:$0xff] %v9260_v1  ;;  %v9262_v14 = vpop.xlane.xlu1 %2655  ;;  %4868 = vperm.xlu1 %5967, %v4637_v20   ;;  %4901 = vperm.xlu0 %5968, %v4648_v56   ;;  %v3598_v20 = vrot.slane %v8882_v54, %v8891_v9  ;;  %v3752_v56 = vrot.slane %v8926_v49, %v8891_v9 }
 0x2d3   : > { %10549 = vst [vmem:[#allocation18_spill] sm:$0xff] %v9262_v14  ;;  %v3633_v54 = vrot.slane %v8886_v27, %v8894_v30  ;;  %v4116_v14 = vrot.slane %v9082_v11, %v8891_v9 }
 0x2d4   : > { %v4643_v48 = vcombine.low %v3598_v20, %v3605_v47  ;;  %v4654_v43 = vcombine.low %v3752_v56, %v3759_v17  ;;  %v10555_v47 = vld [vmem:[#allocation69_spill] sm:$0xff] }
 0x2d5   : > { %v9278_v7 = vpop.xlane.xlu0 %2658 }
 0x2d6   : > { %v9272_v41 = vpop.xlane.xlu1 %2661  ;;  %4874 = vperm.xlu1 %5967, %v4639_v44   ;;  %4907 = vperm.xlu0 %5968, %v4650_v55   ;;  %10551 = vst [vmem:[#allocation19_spill] sm:$0xff] %v9278_v7  ;;  %v3626_v44 = vrot.slane %v8886_v27, %v8891_v9  ;;  %v3787_v55 = vrot.slane %v8938_v3, %v8894_v30 }
 0x2d7   : > { %10550 = vst [vmem:[#allocation73_spill] sm:$0xff] %v9272_v41  ;;  %v3661_v27 = vrot.slane %v8896_v63, %v8894_v30  ;;  %v3815_v3 = vrot.slane %v10555_v47, %v8894_v30 }
 0x2d8   : > { %v4645_v2 = vcombine.low %v3626_v44, %v3633_v54  ;;  %v4656_v20 = vcombine.low %v3780_v25, %v3787_v55  ;;  %v10558_v44 = vld [vmem:[#allocation62_spill] sm:$0xff]  ;;  %v3836_v25 = vrot.slane %v8962_v23, %v8891_v9  ;;  %v3843_v55 = vrot.slane %v8962_v23, %v8894_v30 }
 0x2d9   : > { %v9294_v8 = vpop.xlane.xlu0 %2664  ;;  %v3682_v54 = vrot.slane %v10558_v44, %v8891_v9 }
 0x2da   : > { %v9284_v6 = vpop.permute.xlu1 %4715  ;;  %4880 = vperm.xlu1 %5967, %v4641_v36   ;;  %4913 = vperm.xlu0 %5968, %v4652_v58   ;;  %10553 = vst [vmem:[#allocation13_spill] sm:$0xff] %v9294_v8  ;;  %v3654_v36 = vrot.slane %v8896_v63, %v8891_v9  ;;  %v3808_v58 = vrot.slane %v10555_v47, %v8891_v9  ;;  %v10585_v8 = vld [vmem:[#allocation79_spill] sm:$0xff] }
 0x2db   : > { %10552 = vst [vmem:[#allocation14_spill] sm:$0xff] %v9284_v6  ;;  %v3689_v63 = vrot.slane %v10558_v44, %v8894_v30  ;;  %v4095_v6 = vrot.slane %v9070_v21, %v8894_v30  ;;  %v3969_v41 = vrot.slane %v10585_v8, %v8894_v30 }
 0x2de   : > { %v9296_v49 = vpop.permute.xlu1 %4721  ;;  %4886 = vperm.xlu1 %5967, %v4643_v48   ;;  %4919 = vperm.xlu0 %5968, %v4654_v43   ;;  %v4647_v48 = vcombine.low %v3654_v36, %v3661_v27  ;;  %v4658_v43 = vcombine.low %v3808_v58, %v3815_v3  ;;  %v10561_v36 = vld [vmem:[#allocation63_spill] sm:$0xff]  ;;  %v4660_v58 = vcombine.low %v3836_v25, %v3843_v55  ;;  %v10562_v3 = vld [vmem:[#allocation74_spill] sm:$0xff]  ;;  %v10566_v55 = vld [vmem:[#allocation76_spill] sm:$0xff] }
 0x2df   : > { %10554 = vst [vmem:[#allocation17_spill] sm:$0xff] %v9296_v49  ;;  %v3710_v27 = vrot.slane %v10561_v36, %v8891_v9  ;;  %v3864_v44 = vrot.slane %v10562_v3, %v8891_v9  ;;  %v3871_v23 = vrot.slane %v10562_v3, %v8894_v30  ;;  %v3899_v3 = vrot.slane %v10566_v55, %v8894_v30 }
 0x2e1   : > { %v9306_v56 = vpop.permute.xlu0 %4718  ;;  %v4662_v25 = vcombine.low %v3864_v44, %v3871_v23  ;;  %v3920_v23 = vrot.slane %v8998_v32, %v8891_v9 }
 0x2e2   : > { %10556 = vst [vmem:[#allocation20_spill] sm:$0xff] %v9306_v56  ;;  %v9308_v17 = vpop.permute.xlu1 %4724  ;;  %4892 = vperm.xlu1 %5967, %v4645_v2   ;;  %4925 = vperm.xlu0 %5968, %v4656_v20   ;;  %v4649_v2 = vcombine.low %v3682_v54, %v3689_v63  ;;  %v3717_v20 = vrot.slane %v10561_v36, %v8894_v30  ;;  %v10565_v54 = vld [vmem:[#allocation65_spill] sm:$0xff]  ;;  %v10583_v56 = vld [vmem:[#allocation8_spill] sm:$0xff] }
 0x2e3   : > { %10557 = vst [vmem:[#allocation21_spill] sm:$0xff] %v9308_v17  ;;  %v3738_v63 = vrot.slane %v10565_v54, %v8891_v9  ;;  %v3892_v36 = vrot.slane %v10566_v55, %v8891_v9 }
 0x2e5   : > { %v9318_v47 = vpop.permute.xlu0 %4745  ;;  %v4664_v44 = vcombine.low %v3892_v36, %v3899_v3  ;;  %v3948_v3 = vrot.slane %v9010_v26, %v8891_v9 }
 0x2e6   : > { %10559 = vst [vmem:[#allocation22_spill] sm:$0xff] %v9318_v47  ;;  %v9320_v49 = vpop.permute.xlu1 %4727  ;;  %4898 = vperm.xlu1 %5967, %v4647_v48   ;;  %4931 = vperm.xlu0 %5968, %v4658_v43   ;;  %v4651_v48 = vcombine.low %v3710_v27, %v3717_v20  ;;  %v3745_v43 = vrot.slane %v10565_v54, %v8894_v30  ;;  %v10569_v27 = vld [vmem:[#allocation67_spill] sm:$0xff] }
 0x2e7   : > { %10560 = vst [vmem:[#allocation23_spill] sm:$0xff] %v9320_v49  ;;  %v3766_v20 = vrot.slane %v10569_v27, %v8891_v9  ;;  %v3927_v54 = vrot.slane %v8998_v32, %v8894_v30  ;;  %v3955_v32 = vrot.slane %v9010_v26, %v8894_v30  ;;  %v3983_v26 = vrot.slane %v9022_v61, %v8894_v30 }
 0x2e9   : > { %v9330_v17 = vpop.permute.xlu0 %4751  ;;  %v4666_v36 = vcombine.low %v3920_v23, %v3927_v54  ;;  %v4668_v23 = vcombine.low %v3948_v3, %v3955_v32  ;;  %v3976_v54 = vrot.slane %v9022_v61, %v8891_v9  ;;  %v4004_v32 = vrot.slane %v9034_v29, %v8891_v9 }
 0x2ea   : > { %10563 = vst [vmem:[#allocation24_spill] sm:$0xff] %v9330_v17  ;;  %v9332_v47 = vpop.permute.xlu1 %4730  ;;  %4904 = vperm.xlu1 %5967, %v4649_v2   ;;  %4937 = vperm.xlu0 %5968, %v4660_v58   ;;  %v4653_v2 = vcombine.low %v3738_v63, %v3745_v43  ;;  %v3773_v58 = vrot.slane %v10569_v27, %v8894_v30  ;;  %v10571_v63 = vld [vmem:[#allocation68_spill] sm:$0xff] }
 0x2eb   : > { %10564 = vst [vmem:[#allocation27_spill] sm:$0xff] %v9332_v47  ;;  %v3794_v43 = vrot.slane %v10571_v63, %v8891_v9  ;;  %v4670_v3 = vcombine.low %v3976_v54, %v3983_v26  ;;  %v4011_v61 = vrot.slane %v9034_v29, %v8894_v30  ;;  %v4032_v26 = vrot.slane %v9046_v18, %v8891_v9 }
 0x2ec   : > { %v4039_v29 = vrot.slane %v9046_v18, %v8894_v30  ;;  %v4067_v18 = vrot.slane %v9058_v12, %v8894_v30  ;;  %v4088_v47 = vrot.slane %v9070_v21, %v8891_v9 }
 0x2ed   : > { %v9342_v49 = vpop.permute.xlu0 %4757  ;;  %v4672_v54 = vcombine.low %v4004_v32, %v4011_v61  ;;  %v4060_v61 = vrot.slane %v9058_v12, %v8891_v9 }
 0x2ee   : > { %10567 = vst [vmem:[#allocation26_spill] sm:$0xff] %v9342_v49  ;;  %v9344_v17 = vpop.permute.xlu1 %4733  ;;  %4910 = vperm.xlu1 %5967, %v4651_v48   ;;  %4943 = vperm.xlu0 %5968, %v4662_v25   ;;  %v4655_v48 = vcombine.low %v3766_v20, %v3773_v58  ;;  %v3801_v25 = vrot.slane %v10571_v63, %v8894_v30  ;;  %v10573_v20 = vld [vmem:[#allocation72_spill] sm:$0xff] }
 0x2ef   : > { %10568 = vst [vmem:[#allocation10_spill] sm:$0xff] %v9344_v17  ;;  %v3822_v58 = vrot.slane %v10573_v20, %v8891_v9  ;;  %v4674_v32 = vcombine.low %v4032_v26, %v4039_v29  ;;  %v4676_v12 = vcombine.low %v4060_v61, %v4067_v18  ;;  %v10584_v18 = vld [vmem:[#allocation64_spill] sm:$0xff] }
 0x2f1   : > { %v9354_v55 = vpop.permute.xlu0 %4763 }
 0x2f2   : > { %v9356_v49 = vpop.permute.xlu1 %4736  ;;  %4916 = vperm.xlu1 %5967, %v4653_v2   ;;  %4949 = vperm.xlu0 %5968, %v4664_v44   ;;  %v4657_v2 = vcombine.low %v3794_v43, %v3801_v25  ;;  %v3829_v44 = vrot.slane %v10573_v20, %v8894_v30  ;;  %v10575_v43 = vld [vmem:[#allocation71_spill] sm:$0xff] }
 0x2f3   : > { %10570 = vst [vmem:[#allocation9_spill] sm:$0xff] %v9356_v49  ;;  %v3850_v25 = vrot.slane %v10575_v43, %v8891_v9 }
 0x2f5   : > { %v9366_v27 = vpop.permute.xlu0 %4769 }
 0x2f6   : > { %v9368_v17 = vpop.permute.xlu1 %4739  ;;  %4922 = vperm.xlu1 %5967, %v4655_v48   ;;  %4955 = vperm.xlu0 %5968, %v4666_v36   ;;  %v4659_v48 = vcombine.low %v3822_v58, %v3829_v44  ;;  %v3857_v36 = vrot.slane %v10575_v43, %v8894_v30  ;;  %v10577_v58 = vld [vmem:[#allocation75_spill] sm:$0xff] }
 0x2f7   : > { %10572 = vst [vmem:[#allocation28_spill] sm:$0xff] %v9368_v17  ;;  %v3878_v44 = vrot.slane %v10577_v58, %v8891_v9 }
 0x2f9   : > { %v9378_v63 = vpop.permute.xlu0 %4775 }
 0x2fa   : > { %v9380_v49 = vpop.permute.xlu1 %4742  ;;  %4928 = vperm.xlu1 %5967, %v4657_v2   ;;  %4961 = vperm.xlu0 %5968, %v4668_v23   ;;  %v4661_v2 = vcombine.low %v3850_v25, %v3857_v36  ;;  %v3885_v23 = vrot.slane %v10577_v58, %v8894_v30  ;;  %v10579_v25 = vld [vmem:[#allocation77_spill] sm:$0xff]  ;;  %v10580_v58 = vld [vmem:[#allocation56_spill] sm:$0xff] }
 0x2fb   : > { %10574 = vst [vmem:[#allocation25_spill] sm:$0xff] %v9380_v49  ;;  %v3906_v36 = vrot.slane %v10579_v25, %v8891_v9  ;;  %v5130_v61 = vadd.s32 4294967256, %v10580_v58 }
 0x2fd   : > { %v9390_v20 = vpop.permute.xlu0 %4781 }
 0x2fe   : > { %v9392_v17 = vpop.permute.xlu1 %4748  ;;  %4934 = vperm.xlu1 %5967, %v4659_v48   ;;  %4967 = vperm.xlu0 %5968, %v4670_v3   ;;  %v4663_v48 = vcombine.low %v3878_v44, %v3885_v23  ;;  %v3913_v3 = vrot.slane %v10579_v25, %v8894_v30  ;;  %v5116_v25 = vadd.s32 4294967272, %v10580_v58 }
 0x2ff   : > { %10576 = vst [vmem:[#allocation29_spill] sm:$0xff] %v9392_v17  ;;  %v5102_v17 = vadd.s32 4294967288, %v10580_v58 }
 0x300   : > { %v4665_v23 = vcombine.low %v3906_v36, %v3913_v3  ;;  %v9447_v7 = vsub.s32 %v5116_v25, %v10583_v56 }
 0x301   : > { %v9402_v43 = vpop.permute.xlu0 %4787 }
 0x302   : > { %v9404_v49 = vpop.permute.xlu1 %4754  ;;  %4940 = vperm.xlu1 %5967, %v4661_v2   ;;  %4973 = vperm.xlu0 %5968, %v4672_v54   ;;  %v10582_v54 = vld [vmem:[#allocation80_spill] sm:$0xff] }
 0x303   : > { %10578 = vst [vmem:[#allocation30_spill] sm:$0xff] %v9404_v49  ;;  %v5109_v49 = vadd.s32 4294967280, %v10580_v58  ;;  %v3934_v26 = vrot.slane %v10582_v54, %v8891_v9  ;;  %v3941_v29 = vrot.slane %v10582_v54, %v8894_v30  ;;  %v5210_v54 = vrot.slane %v9354_v55, %v10584_v18 }
 0x304   : > { %v4123_v55 = vrot.slane %v9082_v11, %v8894_v30  ;;  %v5144_v11 = vadd.s32 4294967240, %v10580_v58 }
 0x305   : > { %v9416_v2 = vpop.permute.xlu0 %4793 }
 0x306   : > { %v9418_v44 = vpop.permute.xlu1 %4760  ;;  %4946 = vperm.xlu1 %5967, %v4663_v48   ;;  %4979 = vperm.xlu0 %5968, %v4674_v32   ;;  %v9433_v48 = vsub.s32 %v5109_v49, %v10583_v56  ;;  %v5123_v32 = vadd.s32 4294967264, %v10580_v58  ;;  %v3962_v49 = vrot.slane %v10585_v8, %v8891_v9  ;;  %v4680_v13 = vcombine.low %v4116_v14, %v4123_v55 }
 0x307   : > { %10581 = vst [vmem:[#allocation31_spill] sm:$0xff] %v9418_v44  ;;  %v9430_v44 = vsub.s32 %v5102_v17, %v10583_v56  ;;  %v4667_v17 = vcombine.low %v3934_v26, %v3941_v29  ;;  %v5137_v26 = vadd.s32 4294967248, %v10580_v58  ;;  %v9485_v14 = vsub.s32 %v5144_v11, %v10583_v56 }
 0x308   : > { %v5219_v29 = vrot.slane %v9366_v27, %v9433_v48  ;;  %v5151_v55 = vadd.s32 4294967232, %v10580_v58  ;;  %v4172_v11 = vrot.slane %v9106_v39, %v8891_v9 }
 0x309   : > { %v9435_v36 = vpop.permute.xlu0 %4799 }
 0x30a   : > { %v4767_v3 = vpop.permute.xlu1 %4766  ;;  %4952 = vperm.xlu1 %5967, %v4665_v23   ;;  %4985 = vperm.xlu0 %5968, %v4676_v12   ;;  %v4678_v23 = vcombine.low %v4088_v47, %v4095_v6  ;;  %v9460_v6 = vsub.s32 %v5123_v32, %v10583_v56  ;;  %v9463_v47 = vsub.s32 %v5130_v61, %v10583_v56 }
 0x30b   : > { %v5214_v21 = vrot.slane %v4767_v3, %v9430_v44  ;;  %v4144_v32 = vrot.slane %v9094_v38, %v8891_v9  ;;  %v4151_v61 = vrot.slane %v9094_v38, %v8894_v30  ;;  %v5158_v38 = vadd.s32 4294967224, %v10580_v58 }
 0x30d   : > { %v5215_v3 = vsel %vm5107_vm14, %v5214_v21, %v5210_v54  ;;  %v9457_v8 = vpop.permute.xlu0 %4805  ;;  %v4669_v54 = vcombine.low %v3962_v49, %v3969_v41  ;;  %v10586_v21 = vld [vmem:[#allocation81_spill] sm:$0xff]  ;;  %v9478_v41 = vsub.s32 %v5137_v26, %v10583_v56  ;;  %v5229_v49 = vrot.slane %v9378_v63, %v9460_v6  ;;  %v10587_v26 = vld [vmem:[#allocation78_spill] sm:$0xff] }
 0x30e   : > { %v4773_v25 = vpop.permute.xlu1 %4772  ;;  %4958 = vperm.xlu1 %5967, %v4667_v17   ;;  %4991 = vperm.xlu0 %5968, %v4678_v23   ;;  %v3990_v1 = vrot.slane %v10586_v21, %v8891_v9  ;;  %v3997_v27 = vrot.slane %v10586_v21, %v8894_v30  ;;  %v5220_v17 = vsel %vm5114_vm10, %v5219_v29, %v5215_v3 }
 0x30f   : > { %v5224_v12 = vrot.slane %v4773_v25, %v9447_v7  ;;  %v4025_v63 = vrot.slane %v10587_v26, %v8894_v30 }
 0x310   : > { %v4671_v25 = vcombine.low %v3990_v1, %v3997_v27  ;;  %v5239_v1 = vrot.slane %v9390_v20, %v9478_v41 }
 0x311   : > { %v5225_v34 = vsel %vm5121_vm7, %v5224_v12, %v5220_v17  ;;  %v9482_v23 = vpop.permute.xlu0 %4811  ;;  %v4018_v12 = vrot.slane %v10587_v26, %v8891_v9  ;;  %v4179_v17 = vrot.slane %v9106_v39, %v8894_v30  ;;  %v5172_v39 = vadd.s32 4294967208, %v10580_v58 }
 0x312   : > { %v4779_v3 = vpop.permute.xlu1 %4778  ;;  %4964 = vperm.xlu1 %5967, %v4669_v54   ;;  %4997 = vperm.xlu0 %5968, %v4680_v13   ;;  %v5230_v21 = vsel %vm5128_vm8, %v5229_v49, %v5225_v34  ;;  %v4682_v54 = vcombine.low %v4144_v32, %v4151_v61  ;;  %v5165_v13 = vadd.s32 4294967216, %v10580_v58  ;;  %v9506_v34 = vsub.s32 %v5151_v55, %v10583_v56 }
 0x313   : > { %v5234_v29 = vrot.slane %v4779_v3, %v9463_v47  ;;  %v9509_v32 = vsub.s32 %v5158_v38, %v10583_v56  ;;  %v4673_v49 = vcombine.low %v4018_v12, %v4025_v63  ;;  %v4200_v55 = vrot.slane %v9118_v33, %v8891_v9 }
 0x314   : > { %v4207_v38 = vrot.slane %v9118_v33, %v8894_v30  ;;  %v5179_v12 = vadd.s32 4294967200, %v10580_v58  ;;  %v5249_v63 = vrot.slane %v9402_v43, %v9506_v34  ;;  %v5186_v33 = vadd.s32 4294967192, %v10580_v58 }
 0x315   : > { %v5235_v53 = vsel %vm5135_vm0, %v5234_v29, %v5230_v21  ;;  %v9503_v27 = vpop.permute.xlu0 %4817  ;;  %v10588_v29 = vld [vmem:[#allocation82_spill] sm:$0xff]  ;;  %v4684_v21 = vcombine.low %v4172_v11, %v4179_v17  ;;  %v9532_v11 = vsub.s32 %v5172_v39, %v10583_v56  ;;  %v4081_v43 = vrot.slane %v9068_v51, %v8894_v30 }
 0x316   : > { %v4785_v3 = vpop.permute.xlu1 %4784  ;;  %4970 = vperm.xlu1 %5967, %v4671_v25   ;;  %5003 = vperm.xlu0 %5968, %v4682_v54   ;;  %v4046_v26 = vrot.slane %v10588_v29, %v8891_v9  ;;  %v4053_v20 = vrot.slane %v10588_v29, %v8894_v30  ;;  %v5240_v25 = vsel %vm5142_vm1, %v5239_v1, %v5235_v53 }
 0x317   : > { %v5244_v61 = vrot.slane %v4785_v3, %v9485_v14  ;;  %v9524_v54 = vsub.s32 %v5165_v13, %v10583_v56  ;;  %v4074_v1 = vrot.slane %v9068_v51, %v8891_v9  ;;  %v4686_v29 = vcombine.low %v4200_v55, %v4207_v38 }
 0x318   : > { %v4675_v13 = vcombine.low %v4046_v26, %v4053_v20  ;;  %v4235_v39 = vrot.slane %v9130_v4, %v8894_v30  ;;  %v5193_v26 = vadd.s32 4294967184, %v10580_v58  ;;  %v9555_v55 = vsub.s32 %v5186_v33, %v10583_v56 }
 0x319   : > { %v5245_v42 = vsel %vm5149_vm9, %v5244_v61, %v5240_v25  ;;  %v9529_v3 = vpop.permute.xlu0 %4823  ;;  %v5259_v51 = vrot.slane %v9416_v2, %v9524_v54  ;;  %v4109_v2 = vrot.slane %v9080_v40, %v8894_v30  ;;  %v4263_v33 = vrot.slane %v9142_v57, %v8894_v30 }
 0x31a   : > { %v4791_v53 = vpop.permute.xlu1 %4790  ;;  %4976 = vperm.xlu1 %5967, %v4673_v49   ;;  %5009 = vperm.xlu0 %5968, %v4684_v21   ;;  %v5250_v61 = vsel %vm5156_vm2, %v5249_v63, %v5245_v42  ;;  %v4228_v49 = vrot.slane %v9130_v4, %v8891_v9  ;;  %v9547_v21 = vsub.s32 %v5179_v12, %v10583_v56  ;;  %v5200_v4 = vadd.s32 4294967176, %v10580_v58 }
 0x31b   : > { %v5254_v17 = vrot.slane %v4791_v53, %v9509_v32  ;;  %v4677_v12 = vcombine.low %v4074_v1, %v4081_v43  ;;  %v4102_v63 = vrot.slane %v9080_v40, %v8891_v9 }
 0x31c   : > { %v5269_v1 = vrot.slane %v9435_v36, %v9547_v21 }
 0x31d   : > { %v5255_v25 = vsel %vm5163_vm12, %v5254_v17, %v5250_v61  ;;  %v9552_v20 = vpop.permute.xlu0 %4829  ;;  %v4688_v17 = vcombine.low %v4228_v49, %v4235_v39  ;;  %v9570_v61 = vsub.s32 %v5193_v26, %v10583_v56  ;;  %v4130_v39 = vrot.slane %v9092_v15, %v8891_v9 }
 0x31e   : > { %v4797_v42 = vpop.permute.xlu1 %4796  ;;  %4982 = vperm.xlu1 %5967, %v4675_v13   ;;  %5015 = vperm.xlu0 %5968, %v4686_v29   ;;  %v5260_v53 = vsel %vm5170_vm13, %v5259_v51, %v5255_v25  ;;  %v4256_v13 = vrot.slane %v9142_v57, %v8891_v9  ;;  %v9577_v29 = vsub.s32 %v5200_v4, %v10583_v56 }
 0x31f   : > { %v5264_v38 = vrot.slane %v4797_v42, %v9532_v11  ;;  %v4679_v57 = vcombine.low %v4102_v63, %v4109_v2  ;;  %v4137_v25 = vrot.slane %v9092_v15, %v8894_v30  ;;  %v4284_v51 = vrot.slane %v9154_v59, %v8891_v9 }
 0x320   : > { %v4690_v26 = vcombine.low %v4256_v13, %v4263_v33  ;;  %v4291_v56 = vrot.slane %v9154_v59, %v8894_v30  ;;  %v5279_v4 = vrot.slane %v9457_v8, %v9570_v61  ;;  %v4158_v2 = vrot.slane %v9104_v46, %v8891_v9 }
 0x321   : > { %v5265_v58 = vsel %vm5177_vm6, %v5264_v38, %v5260_v53  ;;  %v9574_v43 = vpop.permute.xlu0 %4835  ;;  %v4681_v63 = vcombine.low %v4130_v39, %v4137_v25  ;;  %v4165_v59 = vrot.slane %v9104_v46, %v8894_v30  ;;  %v4382_v8 = vrot.slane %v9200_v31, %v8891_v9 }
 0x322   : > { %v4803_v40 = vpop.permute.xlu1 %4802  ;;  %4988 = vperm.xlu1 %5967, %v4677_v12   ;;  %5021 = vperm.xlu0 %5968, %v4688_v17   ;;  %v5270_v36 = vsel %vm10228_vm5, %v5269_v1, %v5265_v58  ;;  %v4692_v17 = vcombine.low %v4284_v51, %v4291_v56  ;;  %v4389_v13 = vrot.slane %v9200_v31, %v8894_v30 }
 0x323   : > { %v5274_v49 = vrot.slane %v4803_v40, %v9555_v55  ;;  %v5289_v40 = vrot.slane %v9482_v23, %v10584_v18  ;;  %v4193_v31 = vrot.slane %v9116_v52, %v8894_v30  ;;  %v5298_v39 = vrot.slane %v9503_v27, %v9433_v48 }
 0x324   : > { %v4699_v25 = vcombine.low %v4382_v8, %v4389_v13  ;;  %v4417_v23 = vrot.slane %v9212_v16, %v8894_v30  ;;  %v4214_v27 = vrot.slane %v9128_v35, %v8891_v9 }
 0x325   : > { %v5275_v42 = vsel %vm5191_vm15, %v5274_v49, %v5270_v36  ;;  %v9592_v38 = vpop.permute.xlu0 %4841  ;;  %v4683_v49 = vcombine.low %v4158_v2, %v4165_v59  ;;  %v4410_v36 = vrot.slane %v9212_v16, %v8891_v9  ;;  %v5308_v16 = vrot.slane %v9529_v3, %v9460_v6 }
 0x326   : > { %v4809_v12 = vpop.permute.xlu1 %4808  ;;  %4994 = vperm.xlu1 %5967, %v4679_v57   ;;  %5027 = vperm.xlu0 %5968, %v4690_v26   ;;  %v5280_v53 = vsel %vm5198_vm3, %v5279_v4, %v5275_v42  ;;  %v4186_v57 = vrot.slane %v9116_v52, %v8891_v9  ;;  %v4445_v2 = vrot.slane %v9224_v24, %v8894_v30 }
 0x327   : > { %v5284_v15 = vrot.slane %v4809_v12, %v9577_v29  ;;  %v4221_v12 = vrot.slane %v9128_v35, %v8894_v30  ;;  %v4242_v3 = vrot.slane %v9140_v0, %v8891_v9 }
 0x328   : > { %v4685_v4 = vcombine.low %v4186_v57, %v4193_v31 }
 0x329   : > { %v9605_v33 = vsel %vm5205_vm11, %v5284_v15, %v5280_v53  ;;  %v9607_v58 = vpop.permute.xlu0 %4847  ;;  %v4701_v15 = vcombine.low %v4410_v36, %v4417_v23  ;;  %v4687_v13 = vcombine.low %v4214_v27, %v4221_v12  ;;  %v4277_v23 = vrot.slane %v9152_v62, %v8894_v30 }
 0x32a   : > { %v4815_v1 = vpop.permute.xlu1 %4814  ;;  %5000 = vperm.xlu1 %5967, %v4681_v63   ;;  %5033 = vperm.xlu0 %5968, %v4692_v17   ;;  %v4438_v63 = vrot.slane %v9224_v24, %v8891_v9  ;;  %v5318_v24 = vrot.slane %v9552_v20, %v9478_v41  ;;  %v4270_v20 = vrot.slane %v9152_v62, %v8891_v9 }
 0x32b   : > { %v5293_v46 = vrot.slane %v4815_v1, %v9430_v44  ;;  %v4249_v1 = vrot.slane %v9140_v0, %v8894_v30 }
 0x32d   : > { %v5294_v26 = vsel %vm5107_vm14, %v5293_v46, %v5289_v40  ;;  %v9623_v51 = vpop.permute.xlu0 %4853  ;;  %v4703_v40 = vcombine.low %v4438_v63, %v4445_v2  ;;  %v4466_v46 = vrot.slane %v9236_v5, %v8891_v9  ;;  %v4689_v36 = vcombine.low %v4242_v3, %v4249_v1 }
 0x32e   : > { %v4821_v56 = vpop.permute.xlu1 %4820  ;;  %v5299_v42 = vsel %vm5114_vm10, %v5298_v39, %v5294_v26  ;;  %5006 = vperm.xlu1 %5967, %v4683_v49   ;;  %5054 = vperm.xlu0 %5968, %v4699_v25   ;;  %v4473_v49 = vrot.slane %v9236_v5, %v8894_v30  ;;  %v5328_v5 = vrot.slane %v9574_v43, %v9506_v34 }
 0x32f   : > { %v5303_v52 = vrot.slane %v4821_v56, %v9447_v7  ;;  %v4494_v56 = vrot.slane %v9248_v10, %v8891_v9  ;;  %v4368_v43 = vrot.slane %v9190_v37, %v8891_v9  ;;  %v4298_v63 = vrot.slane %v9164_v28, %v8891_v9 }
 0x330   : > { %v4705_v26 = vcombine.low %v4466_v46, %v4473_v49  ;;  %v4305_v2 = vrot.slane %v9164_v28, %v8894_v30  ;;  %v4403_v1 = vrot.slane %v9202_v50, %v8894_v30  ;;  %v5348_v28 = vrot.slane %v9607_v58, %v9547_v21 }
 0x331   : > { %v5304_v59 = vsel %vm5121_vm7, %v5303_v52, %v5299_v42  ;;  %v9638_v53 = vpop.permute.xlu0 %4859  ;;  %v4501_v42 = vrot.slane %v9248_v10, %v8894_v30  ;;  %v5338_v10 = vrot.slane %v9592_v38, %v9524_v54  ;;  %v4396_v38 = vrot.slane %v9202_v50, %v8891_v9 }
 0x332   : > { %v4827_v17 = vpop.permute.xlu1 %4826  ;;  %v5309_v8 = vsel %vm5128_vm8, %v5308_v16, %v5304_v59  ;;  %5012 = vperm.xlu1 %5967, %v4685_v4   ;;  %5060 = vperm.xlu0 %5968, %v4701_v15   ;;  %v4691_v16 = vcombine.low %v4270_v20, %v4277_v23  ;;  %v4375_v15 = vrot.slane %v9190_v37, %v8894_v30 }
 0x333   : > { %v5313_v35 = vrot.slane %v4827_v17, %v9463_v47  ;;  %v4707_v59 = vcombine.low %v4494_v56, %v4501_v42  ;;  %v4319_v46 = vrot.slane %v9166_v45, %v8894_v30  ;;  %v4424_v58 = vrot.slane %v9214_v60, %v8891_v9 }
 0x334   : > { %v4698_v3 = vcombine.low %v4368_v43, %v4375_v15  ;;  %v4326_v23 = vrot.slane %v9176_v19, %v8891_v9 }
 0x335   : > { %v5314_v57 = vsel %vm5135_vm0, %v5313_v35, %v5309_v8  ;;  %v9653_v31 = vpop.permute.xlu0 %4865 }
 0x336   : > { %v4833_v39 = vpop.permute.xlu1 %4832  ;;  %v5319_v25 = vsel %vm5142_vm1, %v5318_v24, %v5314_v57  ;;  %5018 = vperm.xlu1 %5967, %v4687_v13   ;;  %5066 = vperm.xlu0 %5968, %v4703_v40   ;;  %v4693_v24 = vcombine.low %v4298_v63, %v4305_v2  ;;  %v4312_v40 = vrot.slane %v9166_v45, %v8891_v9 }
 0x337   : > { %v5323_v0 = vrot.slane %v4833_v39, %v9485_v14  ;;  %v5358_v45 = vrot.slane %v9623_v51, %v9570_v61  ;;  %v4452_v51 = vrot.slane %v9226_v22, %v8891_v9  ;;  %v5368_v2 = vrot.slane %v9638_v53, %v10584_v18 }
 0x338   : > { %v4694_v20 = vcombine.low %v4312_v40, %v4319_v46 }
 0x339   : > { %v5324_v52 = vsel %vm5149_vm9, %v5323_v0, %v5319_v25  ;;  %v9668_v4 = vpop.permute.xlu0 %4871  ;;  %v4700_v0 = vcombine.low %v4396_v38, %v4403_v1  ;;  %v10591_v38 = vld [vmem:[#allocation84_spill] sm:$0xff] }
 0x33a   : > { %v4839_v27 = vpop.permute.xlu1 %4838  ;;  %v5329_v12 = vsel %vm5156_vm2, %v5328_v5, %v5324_v52  ;;  %5024 = vperm.xlu1 %5967, %v4689_v36   ;;  %5072 = vperm.xlu0 %5968, %v4705_v26   ;;  %v4431_v36 = vrot.slane %v9214_v60, %v8894_v30  ;;  %v4333_v5 = vrot.slane %v9176_v19, %v8894_v30  ;;  %v10589_v19 = vld [vmem:[#allocation83_spill] sm:$0xff] }
 0x33b   : > { %v5333_v62 = vrot.slane %v4839_v27, %v9509_v32  ;;  %v4347_v43 = vrot.slane %v10589_v19, %v8894_v30  ;;  %v4354_v1 = vrot.slane %v10591_v38, %v8891_v9  ;;  %v4361_v53 = vrot.slane %v10591_v38, %v8894_v30 }
 0x33c   : > { %v4702_v27 = vcombine.low %v4424_v58, %v4431_v36 }
 0x33d   : > { %v5334_v17 = vsel %vm5163_vm12, %v5333_v62, %v5329_v12  ;;  %v9683_v8 = vpop.permute.xlu0 %4877  ;;  %v4459_v12 = vrot.slane %v9226_v22, %v8894_v30  ;;  %v4695_v62 = vcombine.low %v4326_v23, %v4333_v5  ;;  %v4697_v58 = vcombine.low %v4354_v1, %v4361_v53 }
 0x33e   : > { %v4845_v35 = vpop.permute.xlu1 %4844  ;;  %v5339_v13 = vsel %vm5170_vm13, %v5338_v10, %v5334_v17  ;;  %5030 = vperm.xlu1 %5967, %v4691_v16   ;;  %5078 = vperm.xlu0 %5968, %v4707_v59   ;;  %v4340_v16 = vrot.slane %v10589_v19, %v8891_v9  ;;  %v10590_v17 = vld [vmem:[#allocation16_spill] sm:$0xff] }
 0x33f   : > { %v5343_v37 = vrot.slane %v4845_v35, %v9532_v11  ;;  %v4704_v22 = vcombine.low %v4452_v51, %v4459_v12  ;;  %v4480_v35 = vrot.slane %v10590_v17, %v8891_v9 }
 0x341   : > { %v5344_v49 = vsel %vm5177_vm6, %v5343_v37, %v5339_v13  ;;  %v9698_v57 = vpop.permute.xlu0 %4883  ;;  %v4487_v13 = vrot.slane %v10590_v17, %v8894_v30  ;;  %v5377_v37 = vrot.slane %v9653_v31, %v9433_v48  ;;  %v10592_v31 = vld [vmem:[#allocation70_spill] sm:$0xff] }
 0x342   : > { %v4851_v39 = vpop.permute.xlu1 %4850  ;;  %v5349_v25 = vsel %vm10228_vm5, %v5348_v28, %v5344_v49  ;;  %5051 = vperm.xlu1 %5967, %v4698_v3   ;;  %5036 = vperm.xlu0 %5968, %v4693_v24   ;;  %v4696_v3 = vcombine.low %v4340_v16, %v4347_v43  ;;  %v10594_v43 = vld [vmem:[#allocation18_spill] sm:$0xff] }
 0x343   : > { %v5353_v50 = vrot.slane %v4851_v39, %v9555_v55  ;;  %v4706_v39 = vcombine.low %v4480_v35, %v4487_v13 }
 0x345   : > { %v5354_v26 = vsel %vm5191_vm15, %v5353_v50, %v5349_v25  ;;  %v9713_v56 = vpop.permute.xlu0 %4889  ;;  %v4508_v25 = vrot.slane %v10592_v31, %v8891_v9  ;;  %v4515_v50 = vrot.slane %v10592_v31, %v8894_v30  ;;  %v10596_v31 = vld [vmem:[#allocation73_spill] sm:$0xff] }
 0x346   : > { %v4857_v42 = vpop.permute.xlu1 %4856  ;;  %v5359_v52 = vsel %vm5198_vm3, %v5358_v45, %v5354_v26  ;;  %5057 = vperm.xlu1 %5967, %v4700_v0   ;;  %5039 = vperm.xlu0 %5968, %v4694_v20   ;;  %v5387_v0 = vrot.slane %v9668_v4, %v9460_v6  ;;  %v5397_v4 = vrot.slane %v9683_v8, %v9478_v41 }
 0x347   : > { %v5363_v60 = vrot.slane %v4857_v42, %v9577_v29  ;;  %v4708_v26 = vcombine.low %v4508_v25, %v4515_v50  ;;  %v10593_v42 = vld [vmem:[#allocation15_spill] sm:$0xff]  ;;  %v5417_v53 = vrot.slane %v9713_v56, %v9524_v54  ;;  %v4564_v25 = vrot.slane %v10596_v31, %v8891_v9 }
 0x348   : > { %v4571_v50 = vrot.slane %v10596_v31, %v8894_v30 }
 0x349   : > { %v9726_v15 = vsel %vm5205_vm11, %v5363_v60, %v5359_v52  ;;  %v9728_v10 = vpop.permute.xlu0 %4895  ;;  %v4522_v52 = vrot.slane %v10593_v42, %v8891_v9  ;;  %v4529_v60 = vrot.slane %v10593_v42, %v8894_v30 }
 0x34a   : > { %v4863_v63 = vpop.permute.xlu1 %4862  ;;  %5063 = vperm.xlu1 %5967, %v4702_v27   ;;  %5042 = vperm.xlu0 %5968, %v4695_v62   ;;  %v5427_v56 = vrot.slane %v9728_v10, %v9547_v21 }
 0x34b   : > { %v5372_v59 = vrot.slane %v4863_v63, %v9430_v44  ;;  %v4709_v16 = vcombine.low %v4522_v52, %v4529_v60  ;;  %v4536_v63 = vrot.slane %v10594_v43, %v8891_v9 }
 0x34d   : > { %v5373_v28 = vsel %vm5107_vm14, %v5372_v59, %v5368_v2  ;;  %v9744_v24 = vpop.permute.xlu0 %4901  ;;  %v4543_v2 = vrot.slane %v10594_v43, %v8894_v30  ;;  %v5407_v59 = vrot.slane %v9698_v57, %v9506_v34 }
 0x34e   : > { %v4869_v40 = vpop.permute.xlu1 %4868  ;;  %v5378_v46 = vsel %vm5114_vm10, %v5377_v37, %v5373_v28  ;;  %5069 = vperm.xlu1 %5967, %v4704_v22   ;;  %5045 = vperm.xlu0 %5968, %v4696_v3   ;;  %v10595_v3 = vld [vmem:[#allocation19_spill] sm:$0xff]  ;;  %v5437_v10 = vrot.slane %v9744_v24, %v9570_v61 }
 0x34f   : > { %v5382_v49 = vrot.slane %v4869_v40, %v9447_v7  ;;  %v4710_v37 = vcombine.low %v4536_v63, %v4543_v2  ;;  %v4550_v38 = vrot.slane %v10595_v3, %v8891_v9  ;;  %v4557_v1 = vrot.slane %v10595_v3, %v8894_v30  ;;  %v10598_v2 = vld [vmem:[#allocation20_spill] sm:$0xff] }
 0x351   : > { %v5383_v36 = vsel %vm5121_vm7, %v5382_v49, %v5378_v46  ;;  %v9755_v45 = vpop.permute.xlu0 %4907 }
 0x352   : > { %v4875_v20 = vpop.permute.xlu1 %4874  ;;  %v5388_v23 = vsel %vm5128_vm8, %v5387_v0, %v5383_v36  ;;  %5075 = vperm.xlu1 %5967, %v4706_v39   ;;  %5048 = vperm.xlu0 %5968, %v4697_v58   ;;  %v4711_v39 = vcombine.low %v4550_v38, %v4557_v1  ;;  %v5447_v43 = vrot.slane %v9755_v45, %v10584_v18 }
 0x353   : > { %v5392_v5 = vrot.slane %v4875_v20, %v9463_v47 }
 0x355   : > { %v5393_v27 = vsel %vm5135_vm0, %v5392_v5, %v5388_v23  ;;  %v4914_v51 = vpop.permute.xlu0 %4913  ;;  %v4712_v5 = vcombine.low %v4564_v25, %v4571_v50  ;;  %v10602_v50 = vld [vmem:[#allocation23_spill] sm:$0xff] }
 0x356   : > { %v4881_v12 = vpop.permute.xlu1 %4880  ;;  %v5398_v62 = vsel %vm5142_vm1, %v5397_v4, %v5393_v27  ;;  %5081 = vperm.xlu1 %5967, %v4708_v26   ;;  %v10597_v26 = vld [vmem:[#allocation13_spill] sm:$0xff] }
 0x357   : > { %v5402_v19 = vrot.slane %v4881_v12, %v9485_v14  ;;  %v4578_v42 = vrot.slane %v10597_v26, %v8891_v9  ;;  %v4585_v52 = vrot.slane %v10597_v26, %v8894_v30 }
 0x359   : > { %v5403_v8 = vsel %vm5149_vm9, %v5402_v19, %v5398_v62  ;;  %v4920_v22 = vpop.permute.xlu0 %4919  ;;  %v4713_v19 = vcombine.low %v4578_v42, %v4585_v52  ;;  %v10605_v52 = vld [vmem:[#allocation9_spill] sm:$0xff] }
 0x35a   : > { %v4887_v17 = vpop.permute.xlu1 %4886  ;;  %v5408_v35 = vsel %vm5156_vm2, %v5407_v59, %v5403_v8  ;;  %5084 = vperm.xlu1 %5967, %v4709_v16   ;;  %v5106_v59 = vrot.slane %v10598_v2, %v9430_v44  ;;  %v5456_v8 = vrot.slane %v4914_v51, %v9433_v48  ;;  %v5466_v1 = vrot.slane %v4920_v22, %v9460_v6 }
 0x35b   : > { %v5412_v13 = vrot.slane %v4887_v17, %v9509_v32 }
 0x35d   : > { %v5413_v57 = vsel %vm5163_vm12, %v5412_v13, %v5408_v35  ;;  %v9784_v28 = vpop.permute.xlu0 %4925  ;;  %v10599_v35 = vld [vmem:[#allocation14_spill] sm:$0xff] }
 0x35e   : > { %v4893_v40 = vpop.permute.xlu1 %4892  ;;  %v5418_v46 = vsel %vm5170_vm13, %v5417_v53, %v5413_v57  ;;  %5087 = vperm.xlu1 %5967, %v4710_v37   ;;  %v10600_v53 = vld [vmem:[#allocation17_spill] sm:$0xff] }
 0x35f   : > { %v5422_v49 = vrot.slane %v4893_v40, %v9532_v11  ;;  %v5113_v57 = vrot.slane %v10600_v53, %v9433_v48  ;;  %v10601_v40 = vld [vmem:[#allocation21_spill] sm:$0xff] }
 0x361   : > { %v5423_v0 = vsel %vm5177_vm6, %v5422_v49, %v5418_v46  ;;  %v9795_v58 = vpop.permute.xlu0 %4931  ;;  %v5120_v46 = vrot.slane %v10601_v40, %v9447_v7 }
 0x362   : > { %v4899_v36 = vpop.permute.xlu1 %4898  ;;  %v5428_v20 = vsel %vm10228_vm5, %v5427_v56, %v5423_v0  ;;  %5090 = vperm.xlu1 %5967, %v4711_v39   ;;  %v5127_v56 = vrot.slane %v10602_v50, %v9460_v6  ;;  %v10603_v0 = vld [vmem:[#allocation27_spill] sm:$0xff]  ;;  %v5486_v2 = vrot.slane %v9795_v58, %v9506_v34 }
 0x363   : > { %v5432_v23 = vrot.slane %v4899_v36, %v9555_v55  ;;  %v5134_v36 = vrot.slane %v10603_v0, %v9463_v47 }
 0x365   : > { %v5433_v60 = vsel %vm5191_vm15, %v5432_v23, %v5428_v20  ;;  %v9806_v4 = vpop.permute.xlu0 %4937  ;;  %v5476_v20 = vrot.slane %v9784_v28, %v9478_v41  ;;  %v10604_v23 = vld [vmem:[#allocation10_spill] sm:$0xff] }
 0x366   : > { %v4905_v27 = vpop.permute.xlu1 %4904  ;;  %v5438_v12 = vsel %vm5198_vm3, %v5437_v10, %v5433_v60  ;;  %5093 = vperm.xlu1 %5967, %v4712_v5   ;;  %v5141_v5 = vrot.slane %v10604_v23, %v9478_v41  ;;  %v5148_v10 = vrot.slane %v10605_v52, %v9485_v14  ;;  %v5496_v58 = vrot.slane %v9806_v4, %v9524_v54 }
 0x367   : > { %v5442_v62 = vrot.slane %v4905_v27, %v9577_v29 }
 0x369   : > { %v5443_v9 = vsel %vm5205_vm11, %v5442_v62, %v5438_v12  ;;  %v9815_v16 = vpop.permute.xlu0 %4943 }
 0x36a   : > { %v9813_v30 = vsel %vm5760_vm4, %v5443_v9, %v9605_v33  ;;  %v4911_v24 = vpop.permute.xlu1 %4910  ;;  %5096 = vperm.xlu1 %5967, %v4713_v19   ;;  %v5101_v33 = vrot.slane %v10599_v35, %v10584_v18  ;;  %v10606_v19 = vld [vmem:[#allocation28_spill] sm:$0xff]  ;;  %v5506_v4 = vrot.slane %v9815_v16, %v9547_v21 }
 0x36b   : > { %v5451_v63 = vrot.slane %v4911_v24, %v9430_v44  ;;  %v5155_v9 = vrot.slane %v10606_v19, %v9506_v34  ;;  %v10613_v19 = vld [vmem:[#allocation26_spill] sm:$0xff] }
 0x36c   : > { %v5108_v45 = vsel %vm5107_vm14, %v5106_v59, %v5101_v33 }
 0x36d   : > { %v5452_v17 = vsel %vm5107_vm14, %v5451_v63, %v5447_v43  ;;  %v9826_v13 = vpop.permute.xlu0 %4949  ;;  %v5115_v25 = vsel %vm5114_vm10, %v5113_v57, %v5108_v45  ;;  %v10607_v43 = vld [vmem:[#allocation25_spill] sm:$0xff]  ;;  %v10609_v57 = vld [vmem:[#allocation22_spill] sm:$0xff] }
 0x36e   : > { %v4917_v37 = vpop.permute.xlu1 %4916  ;;  %v5457_v3 = vsel %vm5114_vm10, %v5456_v8, %v5452_v17  ;;  %v5122_v42 = vsel %vm5121_vm7, %v5120_v46, %v5115_v25  ;;  %v5162_v63 = vrot.slane %v10607_v43, %v9509_v32  ;;  %v5516_v16 = vrot.slane %v9826_v13, %v9570_v61 }
 0x36f   : > { %v5461_v38 = vrot.slane %v4917_v37, %v9447_v7  ;;  %v5129_v62 = vsel %vm5128_vm8, %v5127_v56, %v5122_v42 }
 0x370   : > { %v5136_v24 = vsel %vm5135_vm0, %v5134_v36, %v5129_v62  ;;  %v10611_v36 = vld [vmem:[#allocation24_spill] sm:$0xff] }
 0x371   : > { %v5462_v51 = vsel %vm5121_vm7, %v5461_v38, %v5457_v3  ;;  %v9837_v49 = vpop.permute.xlu0 %4955  ;;  %v5143_v59 = vsel %vm5142_vm1, %v5141_v5, %v5136_v24 }
 0x372   : > { %v4923_v39 = vpop.permute.xlu1 %4922  ;;  %v5467_v31 = vsel %vm5128_vm8, %v5466_v1, %v5462_v51  ;;  %v5150_v17 = vsel %vm5149_vm9, %v5148_v10, %v5143_v59  ;;  %v10608_v1 = vld [vmem:[#allocation29_spill] sm:$0xff]  ;;  %v5169_v51 = vrot.slane %v10609_v57, %v9524_v54 }
 0x373   : > { %v5471_v22 = vrot.slane %v4923_v39, %v9463_v47  ;;  %v5157_v3 = vsel %vm5156_vm2, %v5155_v9, %v5150_v17  ;;  %v5176_v53 = vrot.slane %v10608_v1, %v9532_v11  ;;  %v5197_v9 = vrot.slane %v10613_v19, %v9570_v61 }
 0x374   : > { %v5164_v45 = vsel %vm5163_vm12, %v5162_v63, %v5157_v3 }
 0x375   : > { %v5472_v26 = vsel %vm5135_vm0, %v5471_v22, %v5467_v31  ;;  %v4962_v60 = vpop.permute.xlu0 %4961  ;;  %v5171_v25 = vsel %vm5170_vm13, %v5169_v51, %v5164_v45  ;;  %v10610_v22 = vld [vmem:[#allocation30_spill] sm:$0xff] }
 0x376   : > { %v4929_v27 = vpop.permute.xlu1 %4928  ;;  %v5477_v12 = vsel %vm5142_vm1, %v5476_v20, %v5472_v26  ;;  %v5178_v56 = vsel %vm5177_vm6, %v5176_v53, %v5171_v25  ;;  %v5190_v0 = vrot.slane %v10610_v22, %v9555_v55  ;;  %v5183_v20 = vrot.slane %v10611_v36, %v9547_v21 }
 0x377   : > { %v5481_v28 = vrot.slane %v4929_v27, %v9485_v14  ;;  %v5535_v1 = vrot.slane %v4962_v60, %v9433_v48 }
 0x378   : > { %v5185_v52 = vsel %vm10228_vm5, %v5183_v20, %v5178_v56 }
 0x379   : > { %v5482_v8 = vsel %vm5149_vm9, %v5481_v28, %v5477_v12  ;;  %v4968_v35 = vpop.permute.xlu0 %4967  ;;  %v5192_v27 = vsel %vm5191_vm15, %v5190_v0, %v5185_v52  ;;  %v10612_v12 = vld [vmem:[#allocation31_spill] sm:$0xff] }
 0x37a   : > { %v4935_v33 = vpop.permute.xlu1 %4934  ;;  %v5487_v37 = vsel %vm5156_vm2, %v5486_v2, %v5482_v8  ;;  %v5204_v62 = vrot.slane %v10612_v12, %v9577_v29  ;;  %v5199_v2 = vsel %vm5198_vm3, %v5197_v9, %v5192_v27 }
 0x37b   : > { %v5491_v38 = vrot.slane %v4935_v33, %v9509_v32 }
 0x37c   : > { %v5206_v8 = vsel %vm5205_vm11, %v5204_v62, %v5199_v2 }
 0x37d   : > { %v5492_v40 = vsel %vm5163_vm12, %v5491_v38, %v5487_v37  ;;  %v4974_v46 = vpop.permute.xlu0 %4973  ;;  %v5761_v17 = vsel %vm5760_vm4, %v9726_v15, %v5206_v8  ;;  %v5526_v38 = vrot.slane %v9837_v49, %v10584_v18  ;;  %vm10614_vm4 = vcmask 851712  }
 0x37e   : > { %v4941_v39 = vpop.permute.xlu1 %4940  ;;  %v5497_v31 = vsel %vm5170_vm13, %v5496_v58, %v5492_v40  ;;  %v5545_v40 = vrot.slane %v4968_v35, %v9460_v6  ;;  %v5555_v60 = vrot.slane %v4974_v46, %v9478_v41 }
 0x37f   : > { %v5501_v50 = vrot.slane %v4941_v39, %v9532_v11 }
 0x381   : > { %v5502_v23 = vsel %vm5177_vm6, %v5501_v50, %v5497_v31  ;;  %v4980_v5 = vpop.permute.xlu0 %4979 }
 0x382   : > { %v4947_v26 = vpop.permute.xlu1 %4946  ;;  %v5507_v42 = vsel %vm10228_vm5, %v5506_v4, %v5502_v23  ;;  %vm5762_vm5 = vcmask 1042434   ;;  %v5565_v35 = vrot.slane %v4980_v5, %v9506_v34 }
 0x383   : > { %v5511_v10 = vrot.slane %v4947_v26, %v9555_v55 }
 0x385   : > { %v5512_v28 = vsel %vm5191_vm15, %v5511_v10, %v5507_v42  ;;  %v4986_v24 = vpop.permute.xlu0 %4985 }
 0x386   : > { %v4953_v43 = vpop.permute.xlu1 %4952  ;;  %v5517_v63 = vsel %vm5198_vm3, %v5516_v16, %v5512_v28  ;;  %v5575_v46 = vrot.slane %v4986_v24, %v9524_v54 }
 0x387   : > { %v5521_v59 = vrot.slane %v4953_v43, %v9577_v29 }
 0x389   : > { %v5522_v13 = vsel %vm5205_vm11, %v5521_v59, %v5517_v63  ;;  %v4992_v37 = vpop.permute.xlu0 %4991 }
 0x38a   : > { %v9908_v33 = vsel %vm5762_vm5, %v5522_v13, %v5761_v17  ;;  %v4959_v3 = vpop.permute.xlu1 %4958  ;;  %v5585_v5 = vrot.slane %v4992_v37, %v9547_v21 }
 0x38b   : > { %v5530_v45 = vrot.slane %v4959_v3, %v9430_v44 }
 0x38d   : > { %v5531_v53 = vsel %vm5107_vm14, %v5530_v45, %v5526_v38  ;;  %v4998_v58 = vpop.permute.xlu0 %4997 }
 0x38e   : > { %v4965_v57 = vpop.permute.xlu1 %4964  ;;  %v5536_v15 = vsel %vm5114_vm10, %v5535_v1, %v5531_v53  ;;  %v5595_v2 = vrot.slane %v4998_v58, %v9570_v61 }
 0x38f   : > { %v5540_v51 = vrot.slane %v4965_v57, %v9447_v7 }
 0x391   : > { %v5541_v39 = vsel %vm5121_vm7, %v5540_v51, %v5536_v15  ;;  %v5004_v31 = vpop.permute.xlu0 %5003 }
 0x392   : > { %v4971_v25 = vpop.permute.xlu1 %4970  ;;  %v5546_v49 = vsel %vm5128_vm8, %v5545_v40, %v5541_v39 }
 0x393   : > { %v5550_v50 = vrot.slane %v4971_v25, %v9463_v47 }
 0x395   : > { %v5551_v56 = vsel %vm5135_vm0, %v5550_v50, %v5546_v49  ;;  %v5010_v22 = vpop.permute.xlu0 %5009 }
 0x396   : > { %v4977_v0 = vpop.permute.xlu1 %4976  ;;  %v5556_v4 = vsel %vm5142_vm1, %v5555_v60, %v5551_v56 }
 0x397   : > { %v5560_v36 = vrot.slane %v4977_v0, %v9485_v14 }
 0x399   : > { %v5561_v20 = vsel %vm5149_vm9, %v5560_v36, %v5556_v4  ;;  %v5016_v23 = vpop.permute.xlu0 %5015 }
 0x39a   : > { %v4983_v26 = vpop.permute.xlu1 %4982  ;;  %v5566_v42 = vsel %vm5156_vm2, %v5565_v35, %v5561_v20  ;;  %v5614_v35 = vrot.slane %v5010_v22, %v9433_v48 }
 0x39b   : > { %v5570_v52 = vrot.slane %v4983_v26, %v9509_v32 }
 0x39d   : > { %v5571_v10 = vsel %vm5163_vm12, %v5570_v52, %v5566_v42  ;;  %v5022_v27 = vpop.permute.xlu0 %5021 }
 0x39e   : > { %v4989_v12 = vpop.permute.xlu1 %4988  ;;  %v5576_v62 = vsel %vm5170_vm13, %v5575_v46, %v5571_v10 }
 0x39f   : > { %v5580_v16 = vrot.slane %v4989_v12, %v9532_v11 }
 0x3a1   : > { %v5581_v19 = vsel %vm5177_vm6, %v5580_v16, %v5576_v62  ;;  %v9935_v9 = vpop.permute.xlu0 %5027  ;;  %v5624_v62 = vrot.slane %v5016_v23, %v9460_v6 }
 0x3a2   : > { %v4995_v28 = vpop.permute.xlu1 %4994  ;;  %v5586_v43 = vsel %vm10614_vm4, %v5585_v5, %v5581_v19 }
 0x3a3   : > { %v5590_v63 = vrot.slane %v4995_v28, %v9555_v55 }
 0x3a5   : > { %v5591_v24 = vsel %vm5191_vm15, %v5590_v63, %v5586_v43  ;;  %v9941_v59 = vpop.permute.xlu0 %5033  ;;  %v5634_v63 = vrot.slane %v5022_v27, %v9478_v41 }
 0x3a6   : > { %v5001_v8 = vpop.permute.xlu1 %5000  ;;  %v5596_v13 = vsel %vm5198_vm3, %v5595_v2, %v5591_v24 }
 0x3a7   : > { %v5600_v17 = vrot.slane %v5001_v8, %v9577_v29 }
 0x3a9   : > { %v5601_v37 = vsel %vm5205_vm11, %v5600_v17, %v5596_v13  ;;  %v5055_v38 = vpop.permute.xlu0 %5054 }
 0x3aa   : > { %v9948_v3 = vsel %vm5762_vm5, %v5601_v37, %v9813_v30  ;;  %v5007_v45 = vpop.permute.xlu1 %5006  ;;  %v5605_v30 = vrot.slane %v5004_v31, %v10584_v18  ;;  %v5688_v10 = vrot.slane %v5055_v38, %v9430_v44  ;;  %v5644_v37 = vrot.slane %v9935_v9, %v9506_v34 }
 0x3ab   : > { %v5609_v56 = vrot.slane %v5007_v45, %v9430_v44 }
 0x3ad   : > { %v5061_v53 = vpop.permute.xlu0 %5060  ;;  %v5610_v4 = vsel %vm5107_vm14, %v5609_v56, %v5605_v30 }
 0x3ae   : > { %v5013_v1 = vpop.permute.xlu1 %5012  ;;  %v5615_v52 = vsel %vm5114_vm10, %v5614_v35, %v5610_v4 }
 0x3af   : > { %v5619_v36 = vrot.slane %v5013_v1, %v9447_v7 }
 0x3b1   : > { %v5067_v15 = vpop.permute.xlu0 %5066  ;;  %v5620_v12 = vsel %vm5121_vm7, %v5619_v36, %v5615_v52 }
 0x3b2   : > { %v5019_v57 = vpop.permute.xlu1 %5018  ;;  %v5625_v22 = vsel %vm5128_vm8, %v5624_v62, %v5620_v12  ;;  %v5708_v13 = vrot.slane %v5067_v15, %v9463_v47  ;;  %v5654_v15 = vrot.slane %v9941_v59, %v9524_v54 }
 0x3b3   : > { %v5629_v31 = vrot.slane %v5019_v57, %v9463_v47 }
 0x3b5   : > { %v5073_v40 = vpop.permute.xlu0 %5072  ;;  %v5630_v44 = vsel %vm5135_vm0, %v5629_v31, %v5625_v22 }
 0x3b6   : > { %v5025_v58 = vpop.permute.xlu1 %5024  ;;  %v5635_v2 = vsel %vm5142_vm1, %v5634_v63, %v5630_v44 }
 0x3b7   : > { %v5639_v43 = vrot.slane %v5025_v58, %v9485_v14 }
 0x3b9   : > { %v9950_v25 = vpop.permute.xlu0 %5078 }
 0x3ba   : > { %v5031_v51 = vpop.permute.xlu1 %5030 }
 0x3bd   : > { %v5037_v60 = vpop.permute.xlu0 %5036 }
 0x3be   : > { %v5052_v39 = vpop.permute.xlu1 %5051  ;;  %v5659_v9 = vrot.slane %v5037_v60, %v9532_v11 }
 0x3bf   : > { %v5684_v42 = vrot.slane %v5052_v39, %v10584_v18 }
 0x3c1   : > { %v5040_v20 = vpop.permute.xlu0 %5039  ;;  %v5689_v5 = vsel %vm5107_vm14, %v5688_v10, %v5684_v42  ;;  %vm10615_vm14 = vmmov %vm10614_vm4 }
 0x3c2   : > { %v5058_v49 = vpop.permute.xlu1 %5057 }
 0x3c3   : > { %v5693_v46 = vrot.slane %v5058_v49, %v9433_v48  ;;  %v5698_v48 = vrot.slane %v5061_v53, %v9447_v7  ;;  %v5649_v7 = vrot.slane %v5031_v51, %v9509_v32  ;;  %v5664_v49 = vrot.slane %v5040_v20, %v9547_v21 }
 0x3c5   : > { %v5694_v19 = vsel %vm5114_vm10, %v5693_v46, %v5689_v5  ;;  %v5043_v18 = vpop.permute.xlu0 %5042  ;;  %vm10616_vm10 = vmmov %vm10614_vm4 }
 0x3c6   : > { %v5064_v50 = vpop.permute.xlu1 %5063  ;;  %v5699_v23 = vsel %vm5121_vm7, %v5698_v48, %v5694_v19  ;;  %vm5764_vm7 = vcmask 1043459  }
 0x3c7   : > { %v5703_v28 = vrot.slane %v5064_v50, %v9460_v6  ;;  %v5640_v6 = vsel %vm5149_vm9, %v5639_v43, %v5635_v2 }
 0x3c8   : > { %v5645_v1 = vsel %vm5156_vm2, %v5644_v37, %v5640_v6 }
 0x3c9   : > { %v5704_v8 = vsel %vm5128_vm8, %v5703_v28, %v5699_v23  ;;  %v5046_v38 = vpop.permute.xlu0 %5045  ;;  %v5650_v47 = vsel %vm5163_vm12, %v5649_v7, %v5645_v1 }
 0x3ca   : > { %v5070_v0 = vpop.permute.xlu1 %5069  ;;  %v5709_v45 = vsel %vm5135_vm0, %v5708_v13, %v5704_v8  ;;  %v5655_v39 = vsel %vm5170_vm13, %v5654_v15, %v5650_v47  ;;  %v5674_v60 = vrot.slane %v5046_v38, %v9570_v61 }
 0x3cb   : > { %v5713_v17 = vrot.slane %v5070_v0, %v9478_v41  ;;  %v5718_v41 = vrot.slane %v5073_v40, %v9485_v14  ;;  %v5728_v14 = vrot.slane %v9950_v25, %v9509_v32  ;;  %v5669_v40 = vrot.slane %v5043_v18, %v9555_v55 }
 0x3cc   : > { %v5660_v4 = vsel %vm5177_vm6, %v5659_v9, %v5655_v39 }
 0x3cd   : > { %v5714_v53 = vsel %vm5142_vm1, %v5713_v17, %v5709_v45  ;;  %v5049_v50 = vpop.permute.xlu0 %5048  ;;  %v5665_v32 = vsel %vm10615_vm14, %v5664_v49, %v5660_v4 }
 0x3ce   : > { %v5076_v26 = vpop.permute.xlu1 %5075  ;;  %v5719_v51 = vsel %vm5149_vm9, %v5718_v41, %v5714_v53  ;;  %v5679_v36 = vrot.slane %v5049_v50, %v9577_v29  ;;  %v5670_v20 = vsel %vm5191_vm15, %v5669_v40, %v5665_v32 }
 0x3cf   : > { %v5723_v57 = vrot.slane %v5076_v26, %v9506_v34  ;;  %v5675_v26 = vsel %vm5198_vm3, %v5674_v60, %v5670_v20 }
 0x3d0   : > { %v5680_v46 = vsel %vm5205_vm11, %v5679_v36, %v5675_v26 }
 0x3d1   : > { %v5724_v56 = vsel %vm5156_vm2, %v5723_v57, %v5719_v51  ;;  %v5765_v31 = vsel %vm5764_vm7, %v5680_v46, %v9908_v33 }
 0x3d2   : > { %v5082_v16 = vpop.permute.xlu1 %5081  ;;  %v5729_v35 = vsel %vm5163_vm12, %v5728_v14, %v5724_v56 }
 0x3d3   : > { %v5733_v34 = vrot.slane %v5082_v16, %v9524_v54 }
 0x3d5   : > { %v5734_v25 = vsel %vm5170_vm13, %v5733_v34, %v5729_v35 }
 0x3d6   : > { %v5085_v24 = vpop.permute.xlu1 %5084 }
 0x3d7   : > { %v5738_v59 = vrot.slane %v5085_v24, %v9532_v11 }
 0x3da   : > { %v5088_v27 = vpop.permute.xlu1 %5087 }
 0x3db   : > { %v5743_v0 = vrot.slane %v5088_v27, %v9547_v21  ;;  %v5739_v21 = vsel %vm5177_vm6, %v5738_v59, %v5734_v25 }
 0x3dd   : > { %v5744_v42 = vsel %vm10616_vm10, %v5743_v0, %v5739_v21 }
 0x3de   : > { %v5091_v58 = vpop.permute.xlu1 %5090 }
 0x3df   : > { %v5748_v54 = vrot.slane %v5091_v58, %v9555_v55 }
 0x3e1   : > { %v5749_v55 = vsel %vm5191_vm15, %v5748_v54, %v5744_v42 }
 0x3e2   : > { %v5094_v30 = vpop.permute.xlu1 %5093 }
 0x3e3   : > { %v5753_v11 = vrot.slane %v5094_v30, %v9570_v61 }
 0x3e5   : > { %v5754_v61 = vsel %vm5198_vm3, %v5753_v11, %v5749_v55 }
 0x3e6   : > { %v5097_v52 = vpop.permute.xlu1 %5096 }
 0x3e7   : > { %v5758_v10 = vrot.slane %v5097_v52, %v9577_v29 }
 0x3e9   : > { %v5759_v12 = vsel %vm5205_vm11, %v5758_v10, %v5754_v61 }
 0x3ea   : > { %v5768_v62 = vsel %vm5764_vm7, %v5759_v12, %v9948_v3 }
 0x3eb   : > { %v5769_v16 = vcombine.low %v5765_v31, %v5768_v62 }
 0x3ed   : > { %5771 = vst [vmem:[%s159_s22] sm:$0xff] %v5769_v16 }
 0x3ee   : > { %6011 = shalt.err (!%p6008_p3)
}
 0x3ef   : > { %s6012_s2 = scalar_lea.hbm %s5789_s26, 128  ;;  %s6016_s5 = scalar_lea.hbm %s10062_s1, 256 }
 0x3f0   : > { %p6013_p5 = scmp.ne.s32.totalorder %s5789_s26, %s6012_s2  ;;  %p6017_p10 = scmp.lt.s32.totalorder %s5789_s26, %s10062_s1 }
 0x3f1   : > { %p6018_p4 = scmp.lt.s32.totalorder %s6016_s5, %s6012_s2 }
 0x3f2   : > { %p6014_p6 = pnand %p6013_p5, %p6148_p9 }
 0x3f3   : > { %p6019_p13 = por %p6018_p4, %p6017_p10 }
 0x3f4   : > { %p6015_p7 = pneg %p6014_p6 }
 0x3f6   : > { %p6020_p8 = pnand %p6019_p13, %p6015_p7 }
 0x3f8   : > { %6023 = shalt.err (!%p6020_p8)
}
 0x3f9   : > { %5902 = dma.vmem_to_hbm [thread:$0]  (%p6148_p9), %s5792_s23, 128, %s5789_s26, %s5773_s27  }
 0x3fa PF: > { %s5803_s15 = sand.u32 1, %s6058_s6   ;;  %p10617_p11 = scmp.ne.s32.totalorder %s10232_s21, 0 }
 0x3fb   : > { %p10618_p12 = scmp.ge.s32.totalorder %s6078_s11, 2  ;;  %s5804_s16 = scalar_lea.sflag [#allocation4], %s5803_s15 }
 0x3fd   : > { %p5909_p0 = pnand %p10618_p12, %p10617_p11 }
 0x3ff   : > { %p5910_p1 = pneg %p5909_p0 }
 0x401   : > { %6053 = dma.done.wait (%p5910_p1), %s5804_s16, 128  }
 0x402   : > { %6055 = vsyncadd (%p5910_p1), %s5804_s16, 4294967168  ;;  %s17_s11 = sadd.s32 1, %s6078_s11   ;;  %s10619_s6 = smov %s6062_s7 }
 0x403   : > { %p14_p2 = scmp.ge.s32.totalorder %s17_s11, 4   ;;  %s10620_s7 = smov %s6066_s8 }
 0x404   : > { %s10621_s8 = smov %s6153_s20  ;;  %s10622_s9 = smov %s6074_s10 }
 0x405   : > { %s10623_s10 = smov %s10625_s14  ;;  %16 = sbr.rel (!%p14_p2) target bundleno = 6 (0x6), region = 70 }
 0x40a   :  { %5809 = vsyncpa [#allocation3], 1 }
 0x40b   :  { %5811 = vsyncpa [#allocation3 + $0x1], 1 }
 0x40c   :  { %5812 = vsyncpa [#allocation4], 1 }
 0x40d   :  { %5814 = vsyncpa [#allocation4 + $0x1], 1 }

</bundles_post_ra>
